<compile_context>
chip_gen: v7x
topology: tpu7x:2x2x1
jax: 0.10.0
libtpu: 0.0.40
codegen_flags: <defaults>
</compile_context>

<pallas_src>
import functools
import math

import jax
import jax.numpy as jnp
from jax.experimental import pallas as pl
from jax.experimental.pallas import tpu as pltpu

_LN_EPS = 1e-5                      # PyTorch nn.LayerNorm default
_VMEM_LIMIT = 32 * 1024 * 1024      # safe on v5e/v6e/v7x


def _largest_divisor_leq(n, target):
    t = max(1, min(n, int(target)))
    while n % t:
        t -= 1
    return t


# ============================================================================ kernel 1
# LayerNorm(x) fused with the q / k / v projections.

def _ln_qkv_kernel(x_ref, g_ref, b_ref, wq_ref, wk_ref, wv_ref,
                   q_ref, k_ref, v_ref):
    x = x_ref[...].astype(jnp.float32)                       # (tm, C)
    mu = jnp.mean(x, axis=-1, keepdims=True)
    var = jnp.mean((x - mu) ** 2, axis=-1, keepdims=True)
    y = (x - mu) * jax.lax.rsqrt(var + _LN_EPS)
    y = y * g_ref[...].astype(jnp.float32) + b_ref[...].astype(jnp.float32)
    # qkv_bias=False -> no bias adds.
    q_ref[...] = jnp.dot(y, wq_ref[...].astype(jnp.float32),
                         preferred_element_type=jnp.float32).astype(q_ref.dtype)
    k_ref[...] = jnp.dot(y, wk_ref[...].astype(jnp.float32),
                         preferred_element_type=jnp.float32).astype(k_ref.dtype)
    v_ref[...] = jnp.dot(y, wv_ref[...].astype(jnp.float32),
                         preferred_element_type=jnp.float32).astype(v_ref.dtype)


def ln_qkv(x_flat, g, b, wq, wk, wv, m_tile):
    M, C = x_flat.shape
    tm = _largest_divisor_leq(M, m_tile)
    row = pl.BlockSpec((tm, C), lambda i: (i, 0))
    vec = pl.BlockSpec((1, C), lambda i: (0, 0))
    mat = pl.BlockSpec((C, C), lambda i: (0, 0))
    return pl.pallas_call(
        _ln_qkv_kernel,
        out_shape=tuple(jax.ShapeDtypeStruct((M, C), x_flat.dtype) for _ in range(3)),
        grid=(M // tm,),
        in_specs=[row, vec, vec, mat, mat, mat],
        out_specs=(row, row, row),
        compiler_params=pltpu.CompilerParams(
            dimension_semantics=("parallel",),
            vmem_limit_bytes=_VMEM_LIMIT),
    )(x_flat, g, b, wq, wk, wv)


# ============================================================================ kernel 2
# Flash attention (online softmax over KV tiles) + output projection + residual.

def _flash_attn_proj_kernel(q_ref, k_ref, v_ref, x_ref, wp_ref, bp_ref, o_ref,
                            m_ref, l_ref, acc_ref, *, num_heads, scale):
    ki = pl.program_id(2)
    nk = pl.num_programs(2)

    @pl.when(ki == 0)
    def _():
        m_ref[...] = jnp.full_like(m_ref, -jnp.inf)
        l_ref[...] = jnp.zeros_like(l_ref)
        acc_ref[...] = jnp.zeros_like(acc_ref)

    q = q_ref[0].astype(jnp.float32)                         # (tq, C)
    k = k_ref[0].astype(jnp.float32)                         # (tk, C)
    v = v_ref[0].astype(jnp.float32)                         # (tk, C)
    C = q.shape[-1]
    hd = C // num_heads

    for h in range(num_heads):                               # heads are few -> unrolled
        qh = q[:, h * hd:(h + 1) * hd]
        kh = k[:, h * hd:(h + 1) * hd]
        vh = v[:, h * hd:(h + 1) * hd]
        s = jax.lax.dot_general(qh, kh, (((1,), (1,)), ((), ())),
                                preferred_element_type=jnp.float32) * scale   # (tq, tk)
        m_prev = m_ref[h]                                    # (tq, 1)
        m_new = jnp.maximum(m_prev, jnp.max(s, axis=-1, keepdims=True))
        alpha = jnp.exp(m_prev - m_new)
        p = jnp.exp(s - m_new)
        l_ref[h] = alpha * l_ref[h] + jnp.sum(p, axis=-1, keepdims=True)
        acc_ref[h] = alpha * acc_ref[h] + jnp.dot(p, vh,
                                                  preferred_element_type=jnp.float32)
        m_ref[h] = m_new

    @pl.when(ki == nk - 1)
    def _():
        # epilogue: normalize, out-projection, bias, residual -> single store
        wp = wp_ref[...].astype(jnp.float32)                 # (C, C)
        y = x_ref[0].astype(jnp.float32) + bp_ref[...].astype(jnp.float32)
        for h in range(num_heads):
            oh = acc_ref[h] * pl.reciprocal(l_ref[h], approx=True)          # (tq, hd)
            y = y + jnp.dot(oh, wp[h * hd:(h + 1) * hd, :],
                            preferred_element_type=jnp.float32)
        o_ref[0] = y.astype(o_ref.dtype)


def attention_block(x, q, k, v, wp, bp, num_heads, q_tile, k_tile):
    B, N, C = x.shape
    hd = C // num_heads
    scale = hd ** (-0.5)
    tq = _largest_divisor_leq(N, q_tile)
    tk = _largest_divisor_leq(N, k_tile)
    q_spec = pl.BlockSpec((1, tq, C), lambda b, qi, ki: (b, qi, 0))
    kv_spec = pl.BlockSpec((1, tk, C), lambda b, qi, ki: (b, ki, 0))
    kern = functools.partial(_flash_attn_proj_kernel, num_heads=num_heads, scale=scale)
    return pl.pallas_call(
        kern,
        out_shape=jax.ShapeDtypeStruct((B, N, C), x.dtype),
        grid=(B, N // tq, N // tk),
        in_specs=[q_spec, kv_spec, kv_spec, q_spec,
                  pl.BlockSpec((C, C), lambda b, qi, ki: (0, 0)),
                  pl.BlockSpec((1, C), lambda b, qi, ki: (0, 0))],
        out_specs=q_spec,
        scratch_shapes=[pltpu.VMEM((num_heads, tq, 1), jnp.float32),
                        pltpu.VMEM((num_heads, tq, 1), jnp.float32),
                        pltpu.VMEM((num_heads, tq, hd), jnp.float32)],
        compiler_params=pltpu.CompilerParams(
            dimension_semantics=("parallel", "parallel", "arbitrary"),
            vmem_limit_bytes=_VMEM_LIMIT),
    )(q, k, v, x, wp, bp)


# ============================================================================ kernel 3
# LN2 + fc1 + depthwise 3x3 conv + GELU + fc2 + residual, tiled over row strips of H.

def _mlp_kernel(xp_ref, xc_ref, xn_ref, g_ref, b_ref, w1_ref, b1_ref,
                dw_ref, dwb_ref, w2_ref, b2_ref, o_ref, *, th, W):
    i = pl.program_id(1)
    nrow = pl.num_programs(1)
    C = xc_ref.shape[-1]
    hidden = w1_ref.shape[-1]

    def ln_fc1(rows):                                        # rows: (R, C) -> (R, hidden)
        r = rows.astype(jnp.float32)
        mu = jnp.mean(r, axis=-1, keepdims=True)
        var = jnp.mean((r - mu) ** 2, axis=-1, keepdims=True)
        y = (r - mu) * jax.lax.rsqrt(var + _LN_EPS)
        y = y * g_ref[...].astype(jnp.float32) + b_ref[...].astype(jnp.float32)
        return (jnp.dot(y, w1_ref[...].astype(jnp.float32),
                        preferred_element_type=jnp.float32)
                + b1_ref[...].astype(jnp.float32))

    xc = xc_ref[0]                                           # (th, W, C) residual tile
    hc = ln_fc1(xc.reshape(th * W, C)).reshape(th, W, hidden)
    # halo rows: last row of the previous strip / first row of the next strip
    # (index_maps are clamped at the image border; masked to zero -> zero padding)
    hp = ln_fc1(xp_ref[0, th - 1])                           # (W, hidden)
    hn = ln_fc1(xn_ref[0, 0])                                # (W, hidden)
    hp = jnp.where(i > 0, hp, jnp.zeros_like(hp))
    hn = jnp.where(i < nrow - 1, hn, jnp.zeros_like(hn))

    strip = jnp.concatenate([hp[None], hc, hn[None]], axis=0)            # (th+2, W, hid)
    zcol = jnp.zeros((th + 2, 1, hidden), jnp.float32)
    strip = jnp.concatenate([zcol, strip, zcol], axis=1)                 # (th+2, W+2, hid)

    acc = jnp.zeros((th, W, hidden), jnp.float32)
    for dy in range(3):
        for dx in range(3):
            tap = dw_ref[dy * 3 + dx: dy * 3 + dx + 1, :].astype(jnp.float32)   # (1, hid)
            acc = acc + strip[dy:dy + th, dx:dx + W, :] * tap
    acc = acc + dwb_ref[...].astype(jnp.float32)
    # TODO(synk): PyTorch nn.GELU() defaults to the exact erf form; the tanh approximation
    # is used here since exact-erf lowering availability on Mosaic is not guaranteed.
    act = jax.nn.gelu(acc, approximate=True)

    y = jnp.dot(act.reshape(th * W, hidden), w2_ref[...].astype(jnp.float32),
                preferred_element_type=jnp.float32)
    y = y + b2_ref[...].astype(jnp.float32)
    y = y + xc.reshape(th * W, C).astype(jnp.float32)        # residual
    o_ref[0] = y.reshape(th, W, C).astype(o_ref.dtype)


def mlp_block(x_img, g2, be2, w1, fb1, dw_w, dw_b, w2, fb2, row_tile):
    B, H, W, C = x_img.shape
    hidden = w1.shape[-1]
    th = _largest_divisor_leq(H, row_tile)
    nrow = H // th
    center = pl.BlockSpec((1, th, W, C), lambda b, i: (b, i, 0, 0))
    prev = pl.BlockSpec((1, th, W, C), lambda b, i: (b, jnp.maximum(i - 1, 0), 0, 0))
    nxt = pl.BlockSpec((1, th, W, C), lambda b, i: (b, jnp.minimum(i + 1, nrow - 1), 0, 0))

    def full(shape):
        return pl.BlockSpec(shape, lambda b, i: tuple(0 for _ in shape))

    kern = functools.partial(_mlp_kernel, th=th, W=W)
    return pl.pallas_call(
        kern,
        out_shape=jax.ShapeDtypeStruct((B, H, W, C), x_img.dtype),
        grid=(B, nrow),
        in_specs=[prev, center, nxt,
                  full((1, C)), full((1, C)),
                  full((C, hidden)), full((1, hidden)),
                  full((9, hidden)), full((1, hidden)),
                  full((hidden, C)), full((1, C))],
        out_specs=center,
        compiler_params=pltpu.CompilerParams(
            dimension_semantics=("parallel", "parallel"),
            vmem_limit_bytes=_VMEM_LIMIT),
    )(x_img, x_img, x_img, g2, be2, w1, fb1, dw_w, dw_b, w2, fb2)


# ============================================================================ Block forward

def block_forward(x, p, H, W, num_heads, *,
                  m_tile=512, q_tile=256, k_tile=256, row_tile=16):
    B, N, C = x.shape
    assert N == H * W

    # ---- attention branch: x = x + proj(MHA(LN1(x))) ----
    q, k, v = ln_qkv(x.reshape(B * N, C), p["norm1_g"], p["norm1_b"],
                     p["q_w"], p["k_w"], p["v_w"], m_tile)
    x = attention_block(x, q.reshape(B, N, C), k.reshape(B, N, C), v.reshape(B, N, C),
                        p["proj_w"], p["proj_b"], num_heads, q_tile, k_tile)

    # ---- MLP branch: x = x + fc2(GELU(dwconv3x3(fc1(LN2(x))))) ----
    y = mlp_block(x.reshape(B, H, W, C), p["norm2_g"], p["norm2_b"],
                  p["fc1_w"], p["fc1_b"], p["dw_w"], p["dw_b"],
                  p["fc2_w"], p["fc2_b"], row_tile)
    return y.reshape(B, N, C)


# ============================================================================ params / reference

def init_params(key, dim, num_heads, mlp_ratio):
    hidden = int(dim * mlp_ratio)
    ks = jax.random.split(key, 8)
    tn = lambda k, shape: 0.02 * jax.random.truncated_normal(k, -2.0, 2.0, shape, jnp.float32)
    return {
        "norm1_g": jnp.ones((1, dim), jnp.float32),
        "norm1_b": jnp.zeros((1, dim), jnp.float32),
        "norm2_g": jnp.ones((1, dim), jnp.float32),
        "norm2_b": jnp.zeros((1, dim), jnp.float32),
        # attention (qkv_bias=False -> no q/kv biases); k_w/v_w are the two halves of `kv`
        "q_w": tn(ks[0], (dim, dim)),
        "k_w": tn(ks[1], (dim, dim)),
        "v_w": tn(ks[2], (dim, dim)),
        "proj_w": tn(ks[3], (dim, dim)),
        "proj_b": jnp.zeros((1, dim), jnp.float32),
        # mlp
        "fc1_w": tn(ks[4], (dim, hidden)),
        "fc1_b": jnp.zeros((1, hidden), jnp.float32),
        # depthwise Conv2d(hidden, hidden, 3, groups=hidden): fan_out = 9
        "dw_w": (math.sqrt(2.0 / 9.0)
                 * jax.random.normal(ks[5], (3, 3, hidden), jnp.float32)).reshape(9, hidden),
        "dw_b": jnp.zeros((1, hidden), jnp.float32),
        "fc2_w": tn(ks[6], (hidden, dim)),
        "fc2_b": jnp.zeros((1, dim), jnp.float32),
    }


def _reference_block(x, p, H, W, num_heads):
    """Pure-JAX reference of the Block forward (for numerical validation)."""
    B, N, C = x.shape
    hd = C // num_heads
    scale = hd ** (-0.5)

    def ln(v, g, b):
        mu = v.mean(-1, keepdims=True)
        var = ((v - mu) ** 2).mean(-1, keepdims=True)
        return (v - mu) * jax.lax.rsqrt(var + _LN_EPS) * g + b

    h = ln(x, p["norm1_g"], p["norm1_b"])
    q = (h @ p["q_w"]).reshape(B, N, num_heads, hd).transpose(0, 2, 1, 3)
    k = (h @ p["k_w"]).reshape(B, N, num_heads, hd).transpose(0, 2, 1, 3)
    v = (h @ p["v_w"]).reshape(B, N, num_heads, hd).transpose(0, 2, 1, 3)
    s = (q @ jnp.swapaxes(k, -1, -2)) * scale
    a = jax.nn.softmax(s, axis=-1)
    o = (a @ v).transpose(0, 2, 1, 3).reshape(B, N, C)
    x = x + o @ p["proj_w"] + p["proj_b"]

    h = ln(x, p["norm2_g"], p["norm2_b"])
    h = h @ p["fc1_w"] + p["fc1_b"]
    himg = h.reshape(B, H, W, -1)
    w33 = p["dw_w"].reshape(3, 3, -1)
    hp = jnp.pad(himg, ((0, 0), (1, 1), (1, 1), (0, 0)))
    acc = sum(hp[:, dy:dy + H, dx:dx + W, :] * w33[dy, dx]
              for dy in range(3) for dx in range(3))
    acc = acc + p["dw_b"]
    act = jax.nn.gelu(acc, approximate=True).reshape(B, N, -1)
    x = x + act @ p["fc2_w"] + p["fc2_b"]
    return x


# ============================================================================ main

if __name__ == "__main__":
    B, H, W = 2, 8, 8
    dim, num_heads, mlp_ratio = 32, 4, 4.0
    N = H * W

    key = jax.random.PRNGKey(0)
    kp, kx = jax.random.split(key)
    params = init_params(kp, dim, num_heads, mlp_ratio)
    x = jax.random.normal(kx, (B, N, dim), jnp.float32)

    # small tiles so the toy run exercises the tiled / multi-step paths
    # (M tiling, online-softmax KV accumulation, row-strip halos)
    fwd = jax.jit(functools.partial(block_forward, H=H, W=W, num_heads=num_heads,
                                    m_tile=64, q_tile=32, k_tile=32, row_tile=4))
    y = fwd(x, params)
    jax.block_until_ready(y)

    y_ref = _reference_block(x, params, H, W, num_heads)
    err = float(jnp.max(jnp.abs(y - y_ref)))
    assert y.shape == (B, N, dim)
    assert err < 2e-2, f"max abs err vs reference: {err}"
    print("KERNEL_OK")
</pallas_src>

<mosaic_0001>
module attributes {stable_mosaic.version = 11 : i64} {
  func.func @_flash_attn_proj_kernel(%arg0: i32, %arg1: i32, %arg2: i32, %arg3: memref<1x32x32xf32, #tpu.memory_space<vmem>>, %arg4: memref<1x32x32xf32, #tpu.memory_space<vmem>>, %arg5: memref<1x32x32xf32, #tpu.memory_space<vmem>>, %arg6: memref<1x32x32xf32, #tpu.memory_space<vmem>>, %arg7: memref<32x32xf32, #tpu.memory_space<vmem>>, %arg8: memref<1x32xf32, #tpu.memory_space<vmem>>, %arg9: memref<1x32x32xf32, #tpu.memory_space<vmem>>, %arg10: memref<4x32x1xf32, #tpu.memory_space<vmem>>, %arg11: memref<4x32x1xf32, #tpu.memory_space<vmem>>, %arg12: memref<4x32x8xf32, #tpu.memory_space<vmem>>) attributes {dimension_semantics = [#tpu.dimension_semantics<parallel>, #tpu.dimension_semantics<parallel>, #tpu.dimension_semantics<arbitrary>], iteration_bounds = array<i64: 2, 2, 2>, scalar_prefetch = 0 : i64, scratch_operands = 3 : i64, tpu.core_type = #tpu.core_type<tc>, window_params = [{transform_indices = @transform_0, window_bounds = array<i64: 1, 32, 32>}, {transform_indices = @transform_1, window_bounds = array<i64: 1, 32, 32>}, {transform_indices = @transform_2, window_bounds = array<i64: 1, 32, 32>}, {transform_indices = @transform_3, window_bounds = array<i64: 1, 32, 32>}, {pipeline_mode = #tpu.pipeline_mode<synchronous>, transform_indices = @transform_4, window_bounds = array<i64: 32, 32>}, {pipeline_mode = #tpu.pipeline_mode<synchronous>, transform_indices = @transform_5, window_bounds = array<i64: 1, 32>}, {transform_indices = @transform_6, window_bounds = array<i64: 1, 32, 32>}]} {
    %c0_i32 = arith.constant 0 : i32
    %0 = arith.cmpi eq, %arg2, %c0_i32 : i32
    %1 = arith.extui %0 : i1 to i32
    %c0_i32_0 = arith.constant 0 : i32
    %2 = arith.cmpi ne, %1, %c0_i32_0 : i32
    scf.if %2 {
      %cst_98 = arith.constant 0xFF800000 : f32
      %160 = vector.broadcast %cst_98 : f32 to vector<4x32x1xf32>
      %c0_99 = arith.constant 0 : index
      %c0_100 = arith.constant 0 : index
      %c0_101 = arith.constant 0 : index
      %161 = vector.load %arg10[%c0_99, %c0_100, %c0_101] : memref<4x32x1xf32, #tpu.memory_space<vmem>>, vector<4x32x1xf32>
      tpu.vector_store %arg10[%c0_99, %c0_100, %c0_101], %160 {strides = array<i32>} : memref<4x32x1xf32, #tpu.memory_space<vmem>>, vector<4x32x1xf32>,
      %cst_102 = arith.constant 0.000000e+00 : f32
      %162 = vector.broadcast %cst_102 : f32 to vector<4x32x1xf32>
      %c0_103 = arith.constant 0 : index
      %c0_104 = arith.constant 0 : index
      %c0_105 = arith.constant 0 : index
      %163 = vector.load %arg11[%c0_103, %c0_104, %c0_105] : memref<4x32x1xf32, #tpu.memory_space<vmem>>, vector<4x32x1xf32>
      tpu.vector_store %arg11[%c0_103, %c0_104, %c0_105], %162 {strides = array<i32>} : memref<4x32x1xf32, #tpu.memory_space<vmem>>, vector<4x32x1xf32>,
      %cst_106 = arith.constant 0.000000e+00 : f32
      %164 = vector.broadcast %cst_106 : f32 to vector<4x32x8xf32>
      %c0_107 = arith.constant 0 : index
      %c0_108 = arith.constant 0 : index
      %c0_109 = arith.constant 0 : index
      %165 = vector.load %arg12[%c0_107, %c0_108, %c0_109] : memref<4x32x8xf32, #tpu.memory_space<vmem>>, vector<4x32x8xf32>
      tpu.vector_store %arg12[%c0_107, %c0_108, %c0_109], %164 {strides = array<i32>} : memref<4x32x8xf32, #tpu.memory_space<vmem>>, vector<4x32x8xf32>,
    } else {
    }
    %c0 = arith.constant 0 : index
    %c0_1 = arith.constant 0 : index
    %c0_2 = arith.constant 0 : index
    %3 = vector.load %arg3[%c0, %c0_1, %c0_2] : memref<1x32x32xf32, #tpu.memory_space<vmem>>, vector<1x32x32xf32>
    %4 = vector.shape_cast %3 : vector<1x32x32xf32> to vector<32x32xf32>
    %c0_3 = arith.constant 0 : index
    %c0_4 = arith.constant 0 : index
    %c0_5 = arith.constant 0 : index
    %5 = vector.load %arg4[%c0_3, %c0_4, %c0_5] : memref<1x32x32xf32, #tpu.memory_space<vmem>>, vector<1x32x32xf32>
    %6 = vector.shape_cast %5 : vector<1x32x32xf32> to vector<32x32xf32>
    %c0_6 = arith.constant 0 : index
    %c0_7 = arith.constant 0 : index
    %c0_8 = arith.constant 0 : index
    %7 = vector.load %arg5[%c0_6, %c0_7, %c0_8] : memref<1x32x32xf32, #tpu.memory_space<vmem>>, vector<1x32x32xf32>
    %8 = vector.shape_cast %7 : vector<1x32x32xf32> to vector<32x32xf32>
    %9 = vector.extract_strided_slice %4 {offsets = [0, 0], sizes = [32, 8], strides = [1, 1]} : vector<32x32xf32> to vector<32x8xf32>
    %10 = vector.extract_strided_slice %6 {offsets = [0, 0], sizes = [32, 8], strides = [1, 1]} : vector<32x32xf32> to vector<32x8xf32>
    %11 = vector.extract_strided_slice %8 {offsets = [0, 0], sizes = [32, 8], strides = [1, 1]} : vector<32x32xf32> to vector<32x8xf32>
    %cst = arith.constant dense<0.000000e+00> : vector<32x32xf32>
    %12 = tpu.matmul %9, %10, %cst {dimension_numbers = #tpu.dot_dimension_numbers<[1], [1], [0], [0], [0, 0, 1, 0], [], []>} : vector<32x8xf32>, vector<32x8xf32>, vector<32x32xf32> -> vector<32x32xf32>
    %cst_9 = arith.constant 0.353553385 : f32
    %13 = vector.broadcast %cst_9 : f32 to vector<32x32xf32>
    %14 = arith.mulf %12, %13 : vector<32x32xf32>
    %c0_10 = arith.constant 0 : index
    %c0_11 = arith.constant 0 : index
    %c0_12 = arith.constant 0 : index
    %15 = vector.load %arg10[%c0_10, %c0_11, %c0_12] : memref<4x32x1xf32, #tpu.memory_space<vmem>>, vector<1x32x1xf32>
    %16 = vector.shape_cast %15 : vector<1x32x1xf32> to vector<32x1xf32>
    %cst_13 = arith.constant dense<0xFF800000> : vector<32xf32>
    %17 = vector.multi_reduction <maximumf>, %14, %cst_13 [1] : vector<32x32xf32> to vector<32xf32>
    %18 = vector.shape_cast %17 : vector<32xf32> to vector<32x1xf32>
    %19 = arith.maximumf %16, %18 : vector<32x1xf32>
    %20 = arith.subf %16, %19 : vector<32x1xf32>
    %21 = math.exp %20 : vector<32x1xf32>
    %22 = vector.broadcast %19 : vector<32x1xf32> to vector<32x32xf32>
    %23 = arith.subf %14, %22 : vector<32x32xf32>
    %24 = math.exp %23 : vector<32x32xf32>
    %c0_14 = arith.constant 0 : index
    %c0_15 = arith.constant 0 : index
    %c0_16 = arith.constant 0 : index
    %25 = vector.load %arg11[%c0_14, %c0_15, %c0_16] : memref<4x32x1xf32, #tpu.memory_space<vmem>>, vector<1x32x1xf32>
    %26 = vector.shape_cast %25 : vector<1x32x1xf32> to vector<32x1xf32>
    %27 = arith.mulf %21, %26 : vector<32x1xf32>
    %cst_17 = arith.constant dense<0.000000e+00> : vector<32xf32>
    %28 = vector.multi_reduction <add>, %24, %cst_17 [1] : vector<32x32xf32> to vector<32xf32>
    %29 = vector.shape_cast %28 : vector<32xf32> to vector<32x1xf32>
    %30 = arith.addf %27, %29 : vector<32x1xf32>
    %c0_18 = arith.constant 0 : index
    %c0_19 = arith.constant 0 : index
    %c0_20 = arith.constant 0 : index
    %31 = vector.load %arg11[%c0_18, %c0_19, %c0_20] : memref<4x32x1xf32, #tpu.memory_space<vmem>>, vector<1x32x1xf32>
    %32 = vector.shape_cast %31 : vector<1x32x1xf32> to vector<32x1xf32>
    %33 = vector.shape_cast %30 : vector<32x1xf32> to vector<1x32x1xf32>
    tpu.vector_store %arg11[%c0_18, %c0_19, %c0_20], %33 {strides = array<i32>} : memref<4x32x1xf32, #tpu.memory_space<vmem>>, vector<1x32x1xf32>,
    %c0_21 = arith.constant 0 : index
    %c0_22 = arith.constant 0 : index
    %c0_23 = arith.constant 0 : index
    %34 = vector.load %arg12[%c0_21, %c0_22, %c0_23] : memref<4x32x8xf32, #tpu.memory_space<vmem>>, vector<1x32x8xf32>
    %35 = vector.shape_cast %34 : vector<1x32x8xf32> to vector<32x8xf32>
    %36 = vector.broadcast %21 : vector<32x1xf32> to vector<32x8xf32>
    %37 = arith.mulf %36, %35 : vector<32x8xf32>
    %cst_24 = arith.constant dense<0.000000e+00> : vector<32x8xf32>
    %38 = tpu.matmul %24, %11, %cst_24 {dimension_numbers = #tpu.dot_dimension_numbers<[1], [0], [0], [1], [0, 0, 1, 1], [], []>} : vector<32x32xf32>, vector<32x8xf32>, vector<32x8xf32> -> vector<32x8xf32>
    %39 = arith.addf %37, %38 : vector<32x8xf32>
    %c0_25 = arith.constant 0 : index
    %c0_26 = arith.constant 0 : index
    %c0_27 = arith.constant 0 : index
    %40 = vector.load %arg12[%c0_25, %c0_26, %c0_27] : memref<4x32x8xf32, #tpu.memory_space<vmem>>, vector<1x32x8xf32>
    %41 = vector.shape_cast %40 : vector<1x32x8xf32> to vector<32x8xf32>
    %42 = vector.shape_cast %39 : vector<32x8xf32> to vector<1x32x8xf32>
    tpu.vector_store %arg12[%c0_25, %c0_26, %c0_27], %42 {strides = array<i32>} : memref<4x32x8xf32, #tpu.memory_space<vmem>>, vector<1x32x8xf32>,
    %c0_28 = arith.constant 0 : index
    %c0_29 = arith.constant 0 : index
    %c0_30 = arith.constant 0 : index
    %43 = vector.load %arg10[%c0_28, %c0_29, %c0_30] : memref<4x32x1xf32, #tpu.memory_space<vmem>>, vector<1x32x1xf32>
    %44 = vector.shape_cast %43 : vector<1x32x1xf32> to vector<32x1xf32>
    %45 = vector.shape_cast %19 : vector<32x1xf32> to vector<1x32x1xf32>
    tpu.vector_store %arg10[%c0_28, %c0_29, %c0_30], %45 {strides = array<i32>} : memref<4x32x1xf32, #tpu.memory_space<vmem>>, vector<1x32x1xf32>,
    %46 = vector.extract_strided_slice %4 {offsets = [0, 8], sizes = [32, 8], strides = [1, 1]} : vector<32x32xf32> to vector<32x8xf32>
    %47 = vector.extract_strided_slice %6 {offsets = [0, 8], sizes = [32, 8], strides = [1, 1]} : vector<32x32xf32> to vector<32x8xf32>
    %48 = vector.extract_strided_slice %8 {offsets = [0, 8], sizes = [32, 8], strides = [1, 1]} : vector<32x32xf32> to vector<32x8xf32>
    %cst_31 = arith.constant dense<0.000000e+00> : vector<32x32xf32>
    %49 = tpu.matmul %46, %47, %cst_31 {dimension_numbers = #tpu.dot_dimension_numbers<[1], [1], [0], [0], [0, 0, 1, 0], [], []>} : vector<32x8xf32>, vector<32x8xf32>, vector<32x32xf32> -> vector<32x32xf32>
    %cst_32 = arith.constant 0.353553385 : f32
    %50 = vector.broadcast %cst_32 : f32 to vector<32x32xf32>
    %51 = arith.mulf %49, %50 : vector<32x32xf32>
    %c1 = arith.constant 1 : index
    %c0_33 = arith.constant 0 : index
    %c0_34 = arith.constant 0 : index
    %52 = vector.load %arg10[%c1, %c0_33, %c0_34] : memref<4x32x1xf32, #tpu.memory_space<vmem>>, vector<1x32x1xf32>
    %53 = vector.shape_cast %52 : vector<1x32x1xf32> to vector<32x1xf32>
    %cst_35 = arith.constant dense<0xFF800000> : vector<32xf32>
    %54 = vector.multi_reduction <maximumf>, %51, %cst_35 [1] : vector<32x32xf32> to vector<32xf32>
    %55 = vector.shape_cast %54 : vector<32xf32> to vector<32x1xf32>
    %56 = arith.maximumf %53, %55 : vector<32x1xf32>
    %57 = arith.subf %53, %56 : vector<32x1xf32>
    %58 = math.exp %57 : vector<32x1xf32>
    %59 = vector.broadcast %56 : vector<32x1xf32> to vector<32x32xf32>
    %60 = arith.subf %51, %59 : vector<32x32xf32>
    %61 = math.exp %60 : vector<32x32xf32>
    %c1_36 = arith.constant 1 : index
    %c0_37 = arith.constant 0 : index
    %c0_38 = arith.constant 0 : index
    %62 = vector.load %arg11[%c1_36, %c0_37, %c0_38] : memref<4x32x1xf32, #tpu.memory_space<vmem>>, vector<1x32x1xf32>
    %63 = vector.shape_cast %62 : vector<1x32x1xf32> to vector<32x1xf32>
    %64 = arith.mulf %58, %63 : vector<32x1xf32>
    %cst_39 = arith.constant dense<0.000000e+00> : vector<32xf32>
    %65 = vector.multi_reduction <add>, %61, %cst_39 [1] : vector<32x32xf32> to vector<32xf32>
    %66 = vector.shape_cast %65 : vector<32xf32> to vector<32x1xf32>
    %67 = arith.addf %64, %66 : vector<32x1xf32>
    %c1_40 = arith.constant 1 : index
    %c0_41 = arith.constant 0 : index
    %c0_42 = arith.constant 0 : index
    %68 = vector.load %arg11[%c1_40, %c0_41, %c0_42] : memref<4x32x1xf32, #tpu.memory_space<vmem>>, vector<1x32x1xf32>
    %69 = vector.shape_cast %68 : vector<1x32x1xf32> to vector<32x1xf32>
    %70 = vector.shape_cast %67 : vector<32x1xf32> to vector<1x32x1xf32>
    tpu.vector_store %arg11[%c1_40, %c0_41, %c0_42], %70 {strides = array<i32>} : memref<4x32x1xf32, #tpu.memory_space<vmem>>, vector<1x32x1xf32>,
    %c1_43 = arith.constant 1 : index
    %c0_44 = arith.constant 0 : index
    %c0_45 = arith.constant 0 : index
    %71 = vector.load %arg12[%c1_43, %c0_44, %c0_45] : memref<4x32x8xf32, #tpu.memory_space<vmem>>, vector<1x32x8xf32>
    %72 = vector.shape_cast %71 : vector<1x32x8xf32> to vector<32x8xf32>
    %73 = vector.broadcast %58 : vector<32x1xf32> to vector<32x8xf32>
    %74 = arith.mulf %73, %72 : vector<32x8xf32>
    %cst_46 = arith.constant dense<0.000000e+00> : vector<32x8xf32>
    %75 = tpu.matmul %61, %48, %cst_46 {dimension_numbers = #tpu.dot_dimension_numbers<[1], [0], [0], [1], [0, 0, 1, 1], [], []>} : vector<32x32xf32>, vector<32x8xf32>, vector<32x8xf32> -> vector<32x8xf32>
    %76 = arith.addf %74, %75 : vector<32x8xf32>
    %c1_47 = arith.constant 1 : index
    %c0_48 = arith.constant 0 : index
    %c0_49 = arith.constant 0 : index
    %77 = vector.load %arg12[%c1_47, %c0_48, %c0_49] : memref<4x32x8xf32, #tpu.memory_space<vmem>>, vector<1x32x8xf32>
    %78 = vector.shape_cast %77 : vector<1x32x8xf32> to vector<32x8xf32>
    %79 = vector.shape_cast %76 : vector<32x8xf32> to vector<1x32x8xf32>
    tpu.vector_store %arg12[%c1_47, %c0_48, %c0_49], %79 {strides = array<i32>} : memref<4x32x8xf32, #tpu.memory_space<vmem>>, vector<1x32x8xf32>,
    %c1_50 = arith.constant 1 : index
    %c0_51 = arith.constant 0 : index
    %c0_52 = arith.constant 0 : index
    %80 = vector.load %arg10[%c1_50, %c0_51, %c0_52] : memref<4x32x1xf32, #tpu.memory_space<vmem>>, vector<1x32x1xf32>
    %81 = vector.shape_cast %80 : vector<1x32x1xf32> to vector<32x1xf32>
    %82 = vector.shape_cast %56 : vector<32x1xf32> to vector<1x32x1xf32>
    tpu.vector_store %arg10[%c1_50, %c0_51, %c0_52], %82 {strides = array<i32>} : memref<4x32x1xf32, #tpu.memory_space<vmem>>, vector<1x32x1xf32>,
    %83 = vector.extract_strided_slice %4 {offsets = [0, 16], sizes = [32, 8], strides = [1, 1]} : vector<32x32xf32> to vector<32x8xf32>
    %84 = vector.extract_strided_slice %6 {offsets = [0, 16], sizes = [32, 8], strides = [1, 1]} : vector<32x32xf32> to vector<32x8xf32>
    %85 = vector.extract_strided_slice %8 {offsets = [0, 16], sizes = [32, 8], strides = [1, 1]} : vector<32x32xf32> to vector<32x8xf32>
    %cst_53 = arith.constant dense<0.000000e+00> : vector<32x32xf32>
    %86 = tpu.matmul %83, %84, %cst_53 {dimension_numbers = #tpu.dot_dimension_numbers<[1], [1], [0], [0], [0, 0, 1, 0], [], []>} : vector<32x8xf32>, vector<32x8xf32>, vector<32x32xf32> -> vector<32x32xf32>
    %cst_54 = arith.constant 0.353553385 : f32
    %87 = vector.broadcast %cst_54 : f32 to vector<32x32xf32>
    %88 = arith.mulf %86, %87 : vector<32x32xf32>
    %c2 = arith.constant 2 : index
    %c0_55 = arith.constant 0 : index
    %c0_56 = arith.constant 0 : index
    %89 = vector.load %arg10[%c2, %c0_55, %c0_56] : memref<4x32x1xf32, #tpu.memory_space<vmem>>, vector<1x32x1xf32>
    %90 = vector.shape_cast %89 : vector<1x32x1xf32> to vector<32x1xf32>
    %cst_57 = arith.constant dense<0xFF800000> : vector<32xf32>
    %91 = vector.multi_reduction <maximumf>, %88, %cst_57 [1] : vector<32x32xf32> to vector<32xf32>
    %92 = vector.shape_cast %91 : vector<32xf32> to vector<32x1xf32>
    %93 = arith.maximumf %90, %92 : vector<32x1xf32>
    %94 = arith.subf %90, %93 : vector<32x1xf32>
    %95 = math.exp %94 : vector<32x1xf32>
    %96 = vector.broadcast %93 : vector<32x1xf32> to vector<32x32xf32>
    %97 = arith.subf %88, %96 : vector<32x32xf32>
    %98 = math.exp %97 : vector<32x32xf32>
    %c2_58 = arith.constant 2 : index
    %c0_59 = arith.constant 0 : index
    %c0_60 = arith.constant 0 : index
    %99 = vector.load %arg11[%c2_58, %c0_59, %c0_60] : memref<4x32x1xf32, #tpu.memory_space<vmem>>, vector<1x32x1xf32>
    %100 = vector.shape_cast %99 : vector<1x32x1xf32> to vector<32x1xf32>
    %101 = arith.mulf %95, %100 : vector<32x1xf32>
    %cst_61 = arith.constant dense<0.000000e+00> : vector<32xf32>
    %102 = vector.multi_reduction <add>, %98, %cst_61 [1] : vector<32x32xf32> to vector<32xf32>
    %103 = vector.shape_cast %102 : vector<32xf32> to vector<32x1xf32>
    %104 = arith.addf %101, %103 : vector<32x1xf32>
    %c2_62 = arith.constant 2 : index
    %c0_63 = arith.constant 0 : index
    %c0_64 = arith.constant 0 : index
    %105 = vector.load %arg11[%c2_62, %c0_63, %c0_64] : memref<4x32x1xf32, #tpu.memory_space<vmem>>, vector<1x32x1xf32>
    %106 = vector.shape_cast %105 : vector<1x32x1xf32> to vector<32x1xf32>
    %107 = vector.shape_cast %104 : vector<32x1xf32> to vector<1x32x1xf32>
    tpu.vector_store %arg11[%c2_62, %c0_63, %c0_64], %107 {strides = array<i32>} : memref<4x32x1xf32, #tpu.memory_space<vmem>>, vector<1x32x1xf32>,
    %c2_65 = arith.constant 2 : index
    %c0_66 = arith.constant 0 : index
    %c0_67 = arith.constant 0 : index
    %108 = vector.load %arg12[%c2_65, %c0_66, %c0_67] : memref<4x32x8xf32, #tpu.memory_space<vmem>>, vector<1x32x8xf32>
    %109 = vector.shape_cast %108 : vector<1x32x8xf32> to vector<32x8xf32>
    %110 = vector.broadcast %95 : vector<32x1xf32> to vector<32x8xf32>
    %111 = arith.mulf %110, %109 : vector<32x8xf32>
    %cst_68 = arith.constant dense<0.000000e+00> : vector<32x8xf32>
    %112 = tpu.matmul %98, %85, %cst_68 {dimension_numbers = #tpu.dot_dimension_numbers<[1], [0], [0], [1], [0, 0, 1, 1], [], []>} : vector<32x32xf32>, vector<32x8xf32>, vector<32x8xf32> -> vector<32x8xf32>
    %113 = arith.addf %111, %112 : vector<32x8xf32>
    %c2_69 = arith.constant 2 : index
    %c0_70 = arith.constant 0 : index
    %c0_71 = arith.constant 0 : index
    %114 = vector.load %arg12[%c2_69, %c0_70, %c0_71] : memref<4x32x8xf32, #tpu.memory_space<vmem>>, vector<1x32x8xf32>
    %115 = vector.shape_cast %114 : vector<1x32x8xf32> to vector<32x8xf32>
    %116 = vector.shape_cast %113 : vector<32x8xf32> to vector<1x32x8xf32>
    tpu.vector_store %arg12[%c2_69, %c0_70, %c0_71], %116 {strides = array<i32>} : memref<4x32x8xf32, #tpu.memory_space<vmem>>, vector<1x32x8xf32>,
    %c2_72 = arith.constant 2 : index
    %c0_73 = arith.constant 0 : index
    %c0_74 = arith.constant 0 : index
    %117 = vector.load %arg10[%c2_72, %c0_73, %c0_74] : memref<4x32x1xf32, #tpu.memory_space<vmem>>, vector<1x32x1xf32>
    %118 = vector.shape_cast %117 : vector<1x32x1xf32> to vector<32x1xf32>
    %119 = vector.shape_cast %93 : vector<32x1xf32> to vector<1x32x1xf32>
    tpu.vector_store %arg10[%c2_72, %c0_73, %c0_74], %119 {strides = array<i32>} : memref<4x32x1xf32, #tpu.memory_space<vmem>>, vector<1x32x1xf32>,
    %120 = vector.extract_strided_slice %4 {offsets = [0, 24], sizes = [32, 8], strides = [1, 1]} : vector<32x32xf32> to vector<32x8xf32>
    %121 = vector.extract_strided_slice %6 {offsets = [0, 24], sizes = [32, 8], strides = [1, 1]} : vector<32x32xf32> to vector<32x8xf32>
    %122 = vector.extract_strided_slice %8 {offsets = [0, 24], sizes = [32, 8], strides = [1, 1]} : vector<32x32xf32> to vector<32x8xf32>
    %cst_75 = arith.constant dense<0.000000e+00> : vector<32x32xf32>
    %123 = tpu.matmul %120, %121, %cst_75 {dimension_numbers = #tpu.dot_dimension_numbers<[1], [1], [0], [0], [0, 0, 1, 0], [], []>} : vector<32x8xf32>, vector<32x8xf32>, vector<32x32xf32> -> vector<32x32xf32>
    %cst_76 = arith.constant 0.353553385 : f32
    %124 = vector.broadcast %cst_76 : f32 to vector<32x32xf32>
    %125 = arith.mulf %123, %124 : vector<32x32xf32>
    %c3 = arith.constant 3 : index
    %c0_77 = arith.constant 0 : index
    %c0_78 = arith.constant 0 : index
    %126 = vector.load %arg10[%c3, %c0_77, %c0_78] : memref<4x32x1xf32, #tpu.memory_space<vmem>>, vector<1x32x1xf32>
    %127 = vector.shape_cast %126 : vector<1x32x1xf32> to vector<32x1xf32>
    %cst_79 = arith.constant dense<0xFF800000> : vector<32xf32>
    %128 = vector.multi_reduction <maximumf>, %125, %cst_79 [1] : vector<32x32xf32> to vector<32xf32>
    %129 = vector.shape_cast %128 : vector<32xf32> to vector<32x1xf32>
    %130 = arith.maximumf %127, %129 : vector<32x1xf32>
    %131 = arith.subf %127, %130 : vector<32x1xf32>
    %132 = math.exp %131 : vector<32x1xf32>
    %133 = vector.broadcast %130 : vector<32x1xf32> to vector<32x32xf32>
    %134 = arith.subf %125, %133 : vector<32x32xf32>
    %135 = math.exp %134 : vector<32x32xf32>
    %c3_80 = arith.constant 3 : index
    %c0_81 = arith.constant 0 : index
    %c0_82 = arith.constant 0 : index
    %136 = vector.load %arg11[%c3_80, %c0_81, %c0_82] : memref<4x32x1xf32, #tpu.memory_space<vmem>>, vector<1x32x1xf32>
    %137 = vector.shape_cast %136 : vector<1x32x1xf32> to vector<32x1xf32>
    %138 = arith.mulf %132, %137 : vector<32x1xf32>
    %cst_83 = arith.constant dense<0.000000e+00> : vector<32xf32>
    %139 = vector.multi_reduction <add>, %135, %cst_83 [1] : vector<32x32xf32> to vector<32xf32>
    %140 = vector.shape_cast %139 : vector<32xf32> to vector<32x1xf32>
    %141 = arith.addf %138, %140 : vector<32x1xf32>
    %c3_84 = arith.constant 3 : index
    %c0_85 = arith.constant 0 : index
    %c0_86 = arith.constant 0 : index
    %142 = vector.load %arg11[%c3_84, %c0_85, %c0_86] : memref<4x32x1xf32, #tpu.memory_space<vmem>>, vector<1x32x1xf32>
    %143 = vector.shape_cast %142 : vector<1x32x1xf32> to vector<32x1xf32>
    %144 = vector.shape_cast %141 : vector<32x1xf32> to vector<1x32x1xf32>
    tpu.vector_store %arg11[%c3_84, %c0_85, %c0_86], %144 {strides = array<i32>} : memref<4x32x1xf32, #tpu.memory_space<vmem>>, vector<1x32x1xf32>,
    %c3_87 = arith.constant 3 : index
    %c0_88 = arith.constant 0 : index
    %c0_89 = arith.constant 0 : index
    %145 = vector.load %arg12[%c3_87, %c0_88, %c0_89] : memref<4x32x8xf32, #tpu.memory_space<vmem>>, vector<1x32x8xf32>
    %146 = vector.shape_cast %145 : vector<1x32x8xf32> to vector<32x8xf32>
    %147 = vector.broadcast %132 : vector<32x1xf32> to vector<32x8xf32>
    %148 = arith.mulf %147, %146 : vector<32x8xf32>
    %cst_90 = arith.constant dense<0.000000e+00> : vector<32x8xf32>
    %149 = tpu.matmul %135, %122, %cst_90 {dimension_numbers = #tpu.dot_dimension_numbers<[1], [0], [0], [1], [0, 0, 1, 1], [], []>} : vector<32x32xf32>, vector<32x8xf32>, vector<32x8xf32> -> vector<32x8xf32>
    %150 = arith.addf %148, %149 : vector<32x8xf32>
    %c3_91 = arith.constant 3 : index
    %c0_92 = arith.constant 0 : index
    %c0_93 = arith.constant 0 : index
    %151 = vector.load %arg12[%c3_91, %c0_92, %c0_93] : memref<4x32x8xf32, #tpu.memory_space<vmem>>, vector<1x32x8xf32>
    %152 = vector.shape_cast %151 : vector<1x32x8xf32> to vector<32x8xf32>
    %153 = vector.shape_cast %150 : vector<32x8xf32> to vector<1x32x8xf32>
    tpu.vector_store %arg12[%c3_91, %c0_92, %c0_93], %153 {strides = array<i32>} : memref<4x32x8xf32, #tpu.memory_space<vmem>>, vector<1x32x8xf32>,
    %c3_94 = arith.constant 3 : index
    %c0_95 = arith.constant 0 : index
    %c0_96 = arith.constant 0 : index
    %154 = vector.load %arg10[%c3_94, %c0_95, %c0_96] : memref<4x32x1xf32, #tpu.memory_space<vmem>>, vector<1x32x1xf32>
    %155 = vector.shape_cast %154 : vector<1x32x1xf32> to vector<32x1xf32>
    %156 = vector.shape_cast %130 : vector<32x1xf32> to vector<1x32x1xf32>
    tpu.vector_store %arg10[%c3_94, %c0_95, %c0_96], %156 {strides = array<i32>} : memref<4x32x1xf32, #tpu.memory_space<vmem>>, vector<1x32x1xf32>,
    %c1_i32 = arith.constant 1 : i32
    %157 = arith.cmpi eq, %arg2, %c1_i32 : i32
    %158 = arith.extui %157 : i1 to i32
    %c0_i32_97 = arith.constant 0 : i32
    %159 = arith.cmpi ne, %158, %c0_i32_97 : i32
    scf.if %159 {
      %c0_98 = arith.constant 0 : index
      %c0_99 = arith.constant 0 : index
      %160 = vector.load %arg7[%c0_98, %c0_99] : memref<32x32xf32, #tpu.memory_space<vmem>>, vector<32x32xf32>
      %c0_100 = arith.constant 0 : index
      %c0_101 = arith.constant 0 : index
      %c0_102 = arith.constant 0 : index
      %161 = vector.load %arg6[%c0_100, %c0_101, %c0_102] : memref<1x32x32xf32, #tpu.memory_space<vmem>>, vector<1x32x32xf32>
      %162 = vector.shape_cast %161 : vector<1x32x32xf32> to vector<32x32xf32>
      %c0_103 = arith.constant 0 : index
      %c0_104 = arith.constant 0 : index
      %163 = vector.load %arg8[%c0_103, %c0_104] : memref<1x32xf32, #tpu.memory_space<vmem>>, vector<1x32xf32>
      %164 = vector.broadcast %163 : vector<1x32xf32> to vector<32x32xf32>
      %165 = arith.addf %162, %164 : vector<32x32xf32>
      %c0_105 = arith.constant 0 : index
      %c0_106 = arith.constant 0 : index
      %c0_107 = arith.constant 0 : index
      %166 = vector.load %arg12[%c0_105, %c0_106, %c0_107] : memref<4x32x8xf32, #tpu.memory_space<vmem>>, vector<1x32x8xf32>
      %167 = vector.shape_cast %166 : vector<1x32x8xf32> to vector<32x8xf32>
      %c0_108 = arith.constant 0 : index
      %c0_109 = arith.constant 0 : index
      %c0_110 = arith.constant 0 : index
      %168 = vector.load %arg11[%c0_108, %c0_109, %c0_110] : memref<4x32x1xf32, #tpu.memory_space<vmem>>, vector<1x32x1xf32>
      %169 = vector.shape_cast %168 : vector<1x32x1xf32> to vector<32x1xf32>
      %170 = tpu.reciprocal %169 {approx = true} : vector<32x1xf32> -> vector<32x1xf32>
      %171 = vector.broadcast %170 : vector<32x1xf32> to vector<32x8xf32>
      %172 = arith.mulf %167, %171 : vector<32x8xf32>
      %173 = vector.extract_strided_slice %160 {offsets = [0, 0], sizes = [8, 32], strides = [1, 1]} : vector<32x32xf32> to vector<8x32xf32>
      %cst_111 = arith.constant dense<0.000000e+00> : vector<32x32xf32>
      %174 = tpu.matmul %172, %173, %cst_111 {dimension_numbers = #tpu.dot_dimension_numbers<[1], [0], [0], [1], [0, 0, 1, 1], [], []>} : vector<32x8xf32>, vector<8x32xf32>, vector<32x32xf32> -> vector<32x32xf32>
      %175 = arith.addf %165, %174 : vector<32x32xf32>
      %c1_112 = arith.constant 1 : index
      %c0_113 = arith.constant 0 : index
      %c0_114 = arith.constant 0 : index
      %176 = vector.load %arg12[%c1_112, %c0_113, %c0_114] : memref<4x32x8xf32, #tpu.memory_space<vmem>>, vector<1x32x8xf32>
      %177 = vector.shape_cast %176 : vector<1x32x8xf32> to vector<32x8xf32>
      %c1_115 = arith.constant 1 : index
      %c0_116 = arith.constant 0 : index
      %c0_117 = arith.constant 0 : index
      %178 = vector.load %arg11[%c1_115, %c0_116, %c0_117] : memref<4x32x1xf32, #tpu.memory_space<vmem>>, vector<1x32x1xf32>
      %179 = vector.shape_cast %178 : vector<1x32x1xf32> to vector<32x1xf32>
      %180 = tpu.reciprocal %179 {approx = true} : vector<32x1xf32> -> vector<32x1xf32>
      %181 = vector.broadcast %180 : vector<32x1xf32> to vector<32x8xf32>
      %182 = arith.mulf %177, %181 : vector<32x8xf32>
      %183 = vector.extract_strided_slice %160 {offsets = [8, 0], sizes = [8, 32], strides = [1, 1]} : vector<32x32xf32> to vector<8x32xf32>
      %cst_118 = arith.constant dense<0.000000e+00> : vector<32x32xf32>
      %184 = tpu.matmul %182, %183, %cst_118 {dimension_numbers = #tpu.dot_dimension_numbers<[1], [0], [0], [1], [0, 0, 1, 1], [], []>} : vector<32x8xf32>, vector<8x32xf32>, vector<32x32xf32> -> vector<32x32xf32>
      %185 = arith.addf %175, %184 : vector<32x32xf32>
      %c2_119 = arith.constant 2 : index
      %c0_120 = arith.constant 0 : index
      %c0_121 = arith.constant 0 : index
      %186 = vector.load %arg12[%c2_119, %c0_120, %c0_121] : memref<4x32x8xf32, #tpu.memory_space<vmem>>, vector<1x32x8xf32>
      %187 = vector.shape_cast %186 : vector<1x32x8xf32> to vector<32x8xf32>
      %c2_122 = arith.constant 2 : index
      %c0_123 = arith.constant 0 : index
      %c0_124 = arith.constant 0 : index
      %188 = vector.load %arg11[%c2_122, %c0_123, %c0_124] : memref<4x32x1xf32, #tpu.memory_space<vmem>>, vector<1x32x1xf32>
      %189 = vector.shape_cast %188 : vector<1x32x1xf32> to vector<32x1xf32>
      %190 = tpu.reciprocal %189 {approx = true} : vector<32x1xf32> -> vector<32x1xf32>
      %191 = vector.broadcast %190 : vector<32x1xf32> to vector<32x8xf32>
      %192 = arith.mulf %187, %191 : vector<32x8xf32>
      %193 = vector.extract_strided_slice %160 {offsets = [16, 0], sizes = [8, 32], strides = [1, 1]} : vector<32x32xf32> to vector<8x32xf32>
      %cst_125 = arith.constant dense<0.000000e+00> : vector<32x32xf32>
      %194 = tpu.matmul %192, %193, %cst_125 {dimension_numbers = #tpu.dot_dimension_numbers<[1], [0], [0], [1], [0, 0, 1, 1], [], []>} : vector<32x8xf32>, vector<8x32xf32>, vector<32x32xf32> -> vector<32x32xf32>
      %195 = arith.addf %185, %194 : vector<32x32xf32>
      %c3_126 = arith.constant 3 : index
      %c0_127 = arith.constant 0 : index
      %c0_128 = arith.constant 0 : index
      %196 = vector.load %arg12[%c3_126, %c0_127, %c0_128] : memref<4x32x8xf32, #tpu.memory_space<vmem>>, vector<1x32x8xf32>
      %197 = vector.shape_cast %196 : vector<1x32x8xf32> to vector<32x8xf32>
      %c3_129 = arith.constant 3 : index
      %c0_130 = arith.constant 0 : index
      %c0_131 = arith.constant 0 : index
      %198 = vector.load %arg11[%c3_129, %c0_130, %c0_131] : memref<4x32x1xf32, #tpu.memory_space<vmem>>, vector<1x32x1xf32>
      %199 = vector.shape_cast %198 : vector<1x32x1xf32> to vector<32x1xf32>
      %200 = tpu.reciprocal %199 {approx = true} : vector<32x1xf32> -> vector<32x1xf32>
      %201 = vector.broadcast %200 : vector<32x1xf32> to vector<32x8xf32>
      %202 = arith.mulf %197, %201 : vector<32x8xf32>
      %203 = vector.extract_strided_slice %160 {offsets = [24, 0], sizes = [8, 32], strides = [1, 1]} : vector<32x32xf32> to vector<8x32xf32>
      %cst_132 = arith.constant dense<0.000000e+00> : vector<32x32xf32>
      %204 = tpu.matmul %202, %203, %cst_132 {dimension_numbers = #tpu.dot_dimension_numbers<[1], [0], [0], [1], [0, 0, 1, 1], [], []>} : vector<32x8xf32>, vector<8x32xf32>, vector<32x32xf32> -> vector<32x32xf32>
      %205 = arith.addf %195, %204 : vector<32x32xf32>
      %c0_133 = arith.constant 0 : index
      %c0_134 = arith.constant 0 : index
      %c0_135 = arith.constant 0 : index
      %206 = vector.load %arg9[%c0_133, %c0_134, %c0_135] : memref<1x32x32xf32, #tpu.memory_space<vmem>>, vector<1x32x32xf32>
      %207 = vector.shape_cast %206 : vector<1x32x32xf32> to vector<32x32xf32>
      %208 = vector.shape_cast %205 : vector<32x32xf32> to vector<1x32x32xf32>
      tpu.vector_store %arg9[%c0_133, %c0_134, %c0_135], %208 {strides = array<i32>} : memref<1x32x32xf32, #tpu.memory_space<vmem>>, vector<1x32x32xf32>,
    } else {
    }
    return
  }
  func.func @transform_0(%arg0: i32, %arg1: i32, %arg2: i32) -> (i32, i32, i32) {
    %c0_i32 = arith.constant 0 : i32
    %c0_i32_0 = arith.constant 0 : i32
    return %arg0, %arg1, %c0_i32 : i32, i32, i32
  }
  func.func @transform_1(%arg0: i32, %arg1: i32, %arg2: i32) -> (i32, i32, i32) {
    %c0_i32 = arith.constant 0 : i32
    %c0_i32_0 = arith.constant 0 : i32
    return %arg0, %arg2, %c0_i32 : i32, i32, i32
  }
  func.func @transform_2(%arg0: i32, %arg1: i32, %arg2: i32) -> (i32, i32, i32) {
    %c0_i32 = arith.constant 0 : i32
    %c0_i32_0 = arith.constant 0 : i32
    return %arg0, %arg2, %c0_i32 : i32, i32, i32
  }
  func.func @transform_3(%arg0: i32, %arg1: i32, %arg2: i32) -> (i32, i32, i32) {
    %c0_i32 = arith.constant 0 : i32
    %c0_i32_0 = arith.constant 0 : i32
    return %arg0, %arg1, %c0_i32 : i32, i32, i32
  }
  func.func @transform_4(%arg0: i32, %arg1: i32, %arg2: i32) -> (i32, i32) {
    %c0_i32 = arith.constant 0 : i32
    %c0_i32_0 = arith.constant 0 : i32
    %c0_i32_1 = arith.constant 0 : i32
    return %c0_i32, %c0_i32_0 : i32, i32
  }
  func.func @transform_5(%arg0: i32, %arg1: i32, %arg2: i32) -> (i32, i32) {
    %c0_i32 = arith.constant 0 : i32
    %c0_i32_0 = arith.constant 0 : i32
    %c0_i32_1 = arith.constant 0 : i32
    return %c0_i32, %c0_i32_0 : i32, i32
  }
  func.func @transform_6(%arg0: i32, %arg1: i32, %arg2: i32) -> (i32, i32, i32) {
    %c0_i32 = arith.constant 0 : i32
    %c0_i32_0 = arith.constant 0 : i32
    return %arg0, %arg1, %c0_i32 : i32, i32, i32
  }
}

module attributes {stable_mosaic.version = 11 : i64} {
  func.func @_ln_qkv_kernel(%arg0: i32, %arg1: memref<64x32xf32, #tpu.memory_space<vmem>>, %arg2: memref<1x32xf32, #tpu.memory_space<vmem>>, %arg3: memref<1x32xf32, #tpu.memory_space<vmem>>, %arg4: memref<32x32xf32, #tpu.memory_space<vmem>>, %arg5: memref<32x32xf32, #tpu.memory_space<vmem>>, %arg6: memref<32x32xf32, #tpu.memory_space<vmem>>, %arg7: memref<64x32xf32, #tpu.memory_space<vmem>>, %arg8: memref<64x32xf32, #tpu.memory_space<vmem>>, %arg9: memref<64x32xf32, #tpu.memory_space<vmem>>) attributes {dimension_semantics = [#tpu.dimension_semantics<parallel>], iteration_bounds = array<i64: 2>, scalar_prefetch = 0 : i64, scratch_operands = 0 : i64, tpu.core_type = #tpu.core_type<tc>, window_params = [{transform_indices = @transform_0, window_bounds = array<i64: 64, 32>}, {pipeline_mode = #tpu.pipeline_mode<synchronous>, transform_indices = @transform_1, window_bounds = array<i64: 1, 32>}, {pipeline_mode = #tpu.pipeline_mode<synchronous>, transform_indices = @transform_2, window_bounds = array<i64: 1, 32>}, {pipeline_mode = #tpu.pipeline_mode<synchronous>, transform_indices = @transform_3, window_bounds = array<i64: 32, 32>}, {pipeline_mode = #tpu.pipeline_mode<synchronous>, transform_indices = @transform_4, window_bounds = array<i64: 32, 32>}, {pipeline_mode = #tpu.pipeline_mode<synchronous>, transform_indices = @transform_5, window_bounds = array<i64: 32, 32>}, {transform_indices = @transform_6, window_bounds = array<i64: 64, 32>}, {transform_indices = @transform_7, window_bounds = array<i64: 64, 32>}, {transform_indices = @transform_8, window_bounds = array<i64: 64, 32>}]} {
    %c0 = arith.constant 0 : index
    %c0_0 = arith.constant 0 : index
    %0 = vector.load %arg1[%c0, %c0_0] : memref<64x32xf32, #tpu.memory_space<vmem>>, vector<64x32xf32>
    %cst = arith.constant dense<0.000000e+00> : vector<64xf32>
    %1 = vector.multi_reduction <add>, %0, %cst [1] : vector<64x32xf32> to vector<64xf32>
    %2 = vector.shape_cast %1 : vector<64xf32> to vector<64x1xf32>
    %cst_1 = arith.constant 3.200000e+01 : f32
    %3 = vector.broadcast %cst_1 : f32 to vector<64x1xf32>
    %4 = arith.divf %2, %3 : vector<64x1xf32>
    %5 = vector.broadcast %4 : vector<64x1xf32> to vector<64x32xf32>
    %6 = arith.subf %0, %5 : vector<64x32xf32>
    %7 = arith.mulf %6, %6 : vector<64x32xf32>
    %cst_2 = arith.constant dense<0.000000e+00> : vector<64xf32>
    %8 = vector.multi_reduction <add>, %7, %cst_2 [1] : vector<64x32xf32> to vector<64xf32>
    %9 = vector.shape_cast %8 : vector<64xf32> to vector<64x1xf32>
    %cst_3 = arith.constant 3.200000e+01 : f32
    %10 = vector.broadcast %cst_3 : f32 to vector<64x1xf32>
    %11 = arith.divf %9, %10 : vector<64x1xf32>
    %12 = vector.broadcast %4 : vector<64x1xf32> to vector<64x32xf32>
    %13 = arith.subf %0, %12 : vector<64x32xf32>
    %cst_4 = arith.constant 9.99999974E-6 : f32
    %14 = vector.broadcast %cst_4 : f32 to vector<64x1xf32>
    %15 = arith.addf %11, %14 : vector<64x1xf32>
    %16 = math.rsqrt %15 : vector<64x1xf32>
    %17 = vector.broadcast %16 : vector<64x1xf32> to vector<64x32xf32>
    %18 = arith.mulf %13, %17 : vector<64x32xf32>
    %c0_5 = arith.constant 0 : index
    %c0_6 = arith.constant 0 : index
    %19 = vector.load %arg2[%c0_5, %c0_6] : memref<1x32xf32, #tpu.memory_space<vmem>>, vector<1x32xf32>
    %20 = vector.broadcast %19 : vector<1x32xf32> to vector<64x32xf32>
    %21 = arith.mulf %18, %20 : vector<64x32xf32>
    %c0_7 = arith.constant 0 : index
    %c0_8 = arith.constant 0 : index
    %22 = vector.load %arg3[%c0_7, %c0_8] : memref<1x32xf32, #tpu.memory_space<vmem>>, vector<1x32xf32>
    %23 = vector.broadcast %22 : vector<1x32xf32> to vector<64x32xf32>
    %24 = arith.addf %21, %23 : vector<64x32xf32>
    %c0_9 = arith.constant 0 : index
    %c0_10 = arith.constant 0 : index
    %25 = vector.load %arg4[%c0_9, %c0_10] : memref<32x32xf32, #tpu.memory_space<vmem>>, vector<32x32xf32>
    %cst_11 = arith.constant dense<0.000000e+00> : vector<64x32xf32>
    %26 = tpu.matmul %24, %25, %cst_11 {dimension_numbers = #tpu.dot_dimension_numbers<[1], [0], [0], [1], [0, 0, 1, 1], [], []>} : vector<64x32xf32>, vector<32x32xf32>, vector<64x32xf32> -> vector<64x32xf32>
    %c0_12 = arith.constant 0 : index
    %c0_13 = arith.constant 0 : index
    %27 = vector.load %arg7[%c0_12, %c0_13] : memref<64x32xf32, #tpu.memory_space<vmem>>, vector<64x32xf32>
    tpu.vector_store %arg7[%c0_12, %c0_13], %26 {strides = array<i32>} : memref<64x32xf32, #tpu.memory_space<vmem>>, vector<64x32xf32>,
    %c0_14 = arith.constant 0 : index
    %c0_15 = arith.constant 0 : index
    %28 = vector.load %arg5[%c0_14, %c0_15] : memref<32x32xf32, #tpu.memory_space<vmem>>, vector<32x32xf32>
    %cst_16 = arith.constant dense<0.000000e+00> : vector<64x32xf32>
    %29 = tpu.matmul %24, %28, %cst_16 {dimension_numbers = #tpu.dot_dimension_numbers<[1], [0], [0], [1], [0, 0, 1, 1], [], []>} : vector<64x32xf32>, vector<32x32xf32>, vector<64x32xf32> -> vector<64x32xf32>
    %c0_17 = arith.constant 0 : index
    %c0_18 = arith.constant 0 : index
    %30 = vector.load %arg8[%c0_17, %c0_18] : memref<64x32xf32, #tpu.memory_space<vmem>>, vector<64x32xf32>
    tpu.vector_store %arg8[%c0_17, %c0_18], %29 {strides = array<i32>} : memref<64x32xf32, #tpu.memory_space<vmem>>, vector<64x32xf32>,
    %c0_19 = arith.constant 0 : index
    %c0_20 = arith.constant 0 : index
    %31 = vector.load %arg6[%c0_19, %c0_20] : memref<32x32xf32, #tpu.memory_space<vmem>>, vector<32x32xf32>
    %cst_21 = arith.constant dense<0.000000e+00> : vector<64x32xf32>
    %32 = tpu.matmul %24, %31, %cst_21 {dimension_numbers = #tpu.dot_dimension_numbers<[1], [0], [0], [1], [0, 0, 1, 1], [], []>} : vector<64x32xf32>, vector<32x32xf32>, vector<64x32xf32> -> vector<64x32xf32>
    %c0_22 = arith.constant 0 : index
    %c0_23 = arith.constant 0 : index
    %33 = vector.load %arg9[%c0_22, %c0_23] : memref<64x32xf32, #tpu.memory_space<vmem>>, vector<64x32xf32>
    tpu.vector_store %arg9[%c0_22, %c0_23], %32 {strides = array<i32>} : memref<64x32xf32, #tpu.memory_space<vmem>>, vector<64x32xf32>,
    return
  }
  func.func @transform_0(%arg0: i32) -> (i32, i32) {
    %c0_i32 = arith.constant 0 : i32
    %c0_i32_0 = arith.constant 0 : i32
    return %arg0, %c0_i32 : i32, i32
  }
  func.func @transform_1(%arg0: i32) -> (i32, i32) {
    %c0_i32 = arith.constant 0 : i32
    %c0_i32_0 = arith.constant 0 : i32
    %c0_i32_1 = arith.constant 0 : i32
    return %c0_i32, %c0_i32_0 : i32, i32
  }
  func.func @transform_2(%arg0: i32) -> (i32, i32) {
    %c0_i32 = arith.constant 0 : i32
    %c0_i32_0 = arith.constant 0 : i32
    %c0_i32_1 = arith.constant 0 : i32
    return %c0_i32, %c0_i32_0 : i32, i32
  }
  func.func @transform_3(%arg0: i32) -> (i32, i32) {
    %c0_i32 = arith.constant 0 : i32
    %c0_i32_0 = arith.constant 0 : i32
    %c0_i32_1 = arith.constant 0 : i32
    return %c0_i32, %c0_i32_0 : i32, i32
  }
  func.func @transform_4(%arg0: i32) -> (i32, i32) {
    %c0_i32 = arith.constant 0 : i32
    %c0_i32_0 = arith.constant 0 : i32
    %c0_i32_1 = arith.constant 0 : i32
    return %c0_i32, %c0_i32_0 : i32, i32
  }
  func.func @transform_5(%arg0: i32) -> (i32, i32) {
    %c0_i32 = arith.constant 0 : i32
    %c0_i32_0 = arith.constant 0 : i32
    %c0_i32_1 = arith.constant 0 : i32
    return %c0_i32, %c0_i32_0 : i32, i32
  }
  func.func @transform_6(%arg0: i32) -> (i32, i32) {
    %c0_i32 = arith.constant 0 : i32
    %c0_i32_0 = arith.constant 0 : i32
    return %arg0, %c0_i32 : i32, i32
  }
  func.func @transform_7(%arg0: i32) -> (i32, i32) {
    %c0_i32 = arith.constant 0 : i32
    %c0_i32_0 = arith.constant 0 : i32
    return %arg0, %c0_i32 : i32, i32
  }
  func.func @transform_8(%arg0: i32) -> (i32, i32) {
    %c0_i32 = arith.constant 0 : i32
    %c0_i32_0 = arith.constant 0 : i32
    return %arg0, %c0_i32 : i32, i32
  }
}

module attributes {stable_mosaic.version = 11 : i64} {
  func.func @_mlp_kernel(%arg0: i32, %arg1: i32, %arg2: memref<1x4x8x32xf32, #tpu.memory_space<vmem>>, %arg3: memref<1x4x8x32xf32, #tpu.memory_space<vmem>>, %arg4: memref<1x4x8x32xf32, #tpu.memory_space<vmem>>, %arg5: memref<1x32xf32, #tpu.memory_space<vmem>>, %arg6: memref<1x32xf32, #tpu.memory_space<vmem>>, %arg7: memref<32x128xf32, #tpu.memory_space<vmem>>, %arg8: memref<1x128xf32, #tpu.memory_space<vmem>>, %arg9: memref<9x128xf32, #tpu.memory_space<vmem>>, %arg10: memref<1x128xf32, #tpu.memory_space<vmem>>, %arg11: memref<128x32xf32, #tpu.memory_space<vmem>>, %arg12: memref<1x32xf32, #tpu.memory_space<vmem>>, %arg13: memref<1x4x8x32xf32, #tpu.memory_space<vmem>>) attributes {dimension_semantics = [#tpu.dimension_semantics<parallel>, #tpu.dimension_semantics<parallel>], iteration_bounds = array<i64: 2, 2>, scalar_prefetch = 0 : i64, scratch_operands = 0 : i64, tpu.core_type = #tpu.core_type<tc>, window_params = [{transform_indices = @transform_0, window_bounds = array<i64: 1, 4, 8, 32>}, {transform_indices = @transform_1, window_bounds = array<i64: 1, 4, 8, 32>}, {transform_indices = @transform_2, window_bounds = array<i64: 1, 4, 8, 32>}, {pipeline_mode = #tpu.pipeline_mode<synchronous>, transform_indices = @transform_3, window_bounds = array<i64: 1, 32>}, {pipeline_mode = #tpu.pipeline_mode<synchronous>, transform_indices = @transform_4, window_bounds = array<i64: 1, 32>}, {pipeline_mode = #tpu.pipeline_mode<synchronous>, transform_indices = @transform_5, window_bounds = array<i64: 32, 128>}, {pipeline_mode = #tpu.pipeline_mode<synchronous>, transform_indices = @transform_6, window_bounds = array<i64: 1, 128>}, {pipeline_mode = #tpu.pipeline_mode<synchronous>, transform_indices = @transform_7, window_bounds = array<i64: 9, 128>}, {pipeline_mode = #tpu.pipeline_mode<synchronous>, transform_indices = @transform_8, window_bounds = array<i64: 1, 128>}, {pipeline_mode = #tpu.pipeline_mode<synchronous>, transform_indices = @transform_9, window_bounds = array<i64: 128, 32>}, {pipeline_mode = #tpu.pipeline_mode<synchronous>, transform_indices = @transform_10, window_bounds = array<i64: 1, 32>}, {transform_indices = @transform_11, window_bounds = array<i64: 1, 4, 8, 32>}]} {
    %c0 = arith.constant 0 : index
    %c0_0 = arith.constant 0 : index
    %c0_1 = arith.constant 0 : index
    %c0_2 = arith.constant 0 : index
    %0 = vector.load %arg3[%c0, %c0_0, %c0_1, %c0_2] : memref<1x4x8x32xf32, #tpu.memory_space<vmem>>, vector<1x4x8x32xf32>
    %1 = vector.shape_cast %0 : vector<1x4x8x32xf32> to vector<4x8x32xf32>
    %2 = vector.shape_cast %1 : vector<4x8x32xf32> to vector<32x32xf32>
    %cst = arith.constant dense<0.000000e+00> : vector<32xf32>
    %3 = vector.multi_reduction <add>, %2, %cst [1] : vector<32x32xf32> to vector<32xf32>
    %4 = vector.shape_cast %3 : vector<32xf32> to vector<32x1xf32>
    %cst_3 = arith.constant 3.200000e+01 : f32
    %5 = vector.broadcast %cst_3 : f32 to vector<32x1xf32>
    %6 = arith.divf %4, %5 : vector<32x1xf32>
    %7 = vector.broadcast %6 : vector<32x1xf32> to vector<32x32xf32>
    %8 = arith.subf %2, %7 : vector<32x32xf32>
    %9 = arith.mulf %8, %8 : vector<32x32xf32>
    %cst_4 = arith.constant dense<0.000000e+00> : vector<32xf32>
    %10 = vector.multi_reduction <add>, %9, %cst_4 [1] : vector<32x32xf32> to vector<32xf32>
    %11 = vector.shape_cast %10 : vector<32xf32> to vector<32x1xf32>
    %cst_5 = arith.constant 3.200000e+01 : f32
    %12 = vector.broadcast %cst_5 : f32 to vector<32x1xf32>
    %13 = arith.divf %11, %12 : vector<32x1xf32>
    %14 = vector.broadcast %6 : vector<32x1xf32> to vector<32x32xf32>
    %15 = arith.subf %2, %14 : vector<32x32xf32>
    %cst_6 = arith.constant 9.99999974E-6 : f32
    %16 = vector.broadcast %cst_6 : f32 to vector<32x1xf32>
    %17 = arith.addf %13, %16 : vector<32x1xf32>
    %18 = math.rsqrt %17 : vector<32x1xf32>
    %19 = vector.broadcast %18 : vector<32x1xf32> to vector<32x32xf32>
    %20 = arith.mulf %15, %19 : vector<32x32xf32>
    %c0_7 = arith.constant 0 : index
    %c0_8 = arith.constant 0 : index
    %21 = vector.load %arg5[%c0_7, %c0_8] : memref<1x32xf32, #tpu.memory_space<vmem>>, vector<1x32xf32>
    %22 = vector.broadcast %21 : vector<1x32xf32> to vector<32x32xf32>
    %23 = arith.mulf %20, %22 : vector<32x32xf32>
    %c0_9 = arith.constant 0 : index
    %c0_10 = arith.constant 0 : index
    %24 = vector.load %arg6[%c0_9, %c0_10] : memref<1x32xf32, #tpu.memory_space<vmem>>, vector<1x32xf32>
    %25 = vector.broadcast %24 : vector<1x32xf32> to vector<32x32xf32>
    %26 = arith.addf %23, %25 : vector<32x32xf32>
    %c0_11 = arith.constant 0 : index
    %c0_12 = arith.constant 0 : index
    %27 = vector.load %arg7[%c0_11, %c0_12] : memref<32x128xf32, #tpu.memory_space<vmem>>, vector<32x128xf32>
    %cst_13 = arith.constant dense<0.000000e+00> : vector<32x128xf32>
    %28 = tpu.matmul %26, %27, %cst_13 {dimension_numbers = #tpu.dot_dimension_numbers<[1], [0], [0], [1], [0, 0, 1, 1], [], []>} : vector<32x32xf32>, vector<32x128xf32>, vector<32x128xf32> -> vector<32x128xf32>
    %c0_14 = arith.constant 0 : index
    %c0_15 = arith.constant 0 : index
    %29 = vector.load %arg8[%c0_14, %c0_15] : memref<1x128xf32, #tpu.memory_space<vmem>>, vector<1x128xf32>
    %30 = vector.broadcast %29 : vector<1x128xf32> to vector<32x128xf32>
    %31 = arith.addf %28, %30 : vector<32x128xf32>
    %32 = vector.shape_cast %31 : vector<32x128xf32> to vector<4x8x128xf32>
    %c0_16 = arith.constant 0 : index
    %c3 = arith.constant 3 : index
    %c0_17 = arith.constant 0 : index
    %c0_18 = arith.constant 0 : index
    %33 = vector.load %arg2[%c0_16, %c3, %c0_17, %c0_18] : memref<1x4x8x32xf32, #tpu.memory_space<vmem>>, vector<1x1x8x32xf32>
    %34 = vector.shape_cast %33 : vector<1x1x8x32xf32> to vector<8x32xf32>
    %cst_19 = arith.constant dense<0.000000e+00> : vector<8xf32>
    %35 = vector.multi_reduction <add>, %34, %cst_19 [1] : vector<8x32xf32> to vector<8xf32>
    %36 = vector.shape_cast %35 : vector<8xf32> to vector<8x1xf32>
    %cst_20 = arith.constant 3.200000e+01 : f32
    %37 = vector.broadcast %cst_20 : f32 to vector<8x1xf32>
    %38 = arith.divf %36, %37 : vector<8x1xf32>
    %39 = vector.broadcast %38 : vector<8x1xf32> to vector<8x32xf32>
    %40 = arith.subf %34, %39 : vector<8x32xf32>
    %41 = arith.mulf %40, %40 : vector<8x32xf32>
    %cst_21 = arith.constant dense<0.000000e+00> : vector<8xf32>
    %42 = vector.multi_reduction <add>, %41, %cst_21 [1] : vector<8x32xf32> to vector<8xf32>
    %43 = vector.shape_cast %42 : vector<8xf32> to vector<8x1xf32>
    %cst_22 = arith.constant 3.200000e+01 : f32
    %44 = vector.broadcast %cst_22 : f32 to vector<8x1xf32>
    %45 = arith.divf %43, %44 : vector<8x1xf32>
    %46 = vector.broadcast %38 : vector<8x1xf32> to vector<8x32xf32>
    %47 = arith.subf %34, %46 : vector<8x32xf32>
    %cst_23 = arith.constant 9.99999974E-6 : f32
    %48 = vector.broadcast %cst_23 : f32 to vector<8x1xf32>
    %49 = arith.addf %45, %48 : vector<8x1xf32>
    %50 = math.rsqrt %49 : vector<8x1xf32>
    %51 = vector.broadcast %50 : vector<8x1xf32> to vector<8x32xf32>
    %52 = arith.mulf %47, %51 : vector<8x32xf32>
    %c0_24 = arith.constant 0 : index
    %c0_25 = arith.constant 0 : index
    %53 = vector.load %arg5[%c0_24, %c0_25] : memref<1x32xf32, #tpu.memory_space<vmem>>, vector<1x32xf32>
    %54 = vector.broadcast %53 : vector<1x32xf32> to vector<8x32xf32>
    %55 = arith.mulf %52, %54 : vector<8x32xf32>
    %c0_26 = arith.constant 0 : index
    %c0_27 = arith.constant 0 : index
    %56 = vector.load %arg6[%c0_26, %c0_27] : memref<1x32xf32, #tpu.memory_space<vmem>>, vector<1x32xf32>
    %57 = vector.broadcast %56 : vector<1x32xf32> to vector<8x32xf32>
    %58 = arith.addf %55, %57 : vector<8x32xf32>
    %c0_28 = arith.constant 0 : index
    %c0_29 = arith.constant 0 : index
    %59 = vector.load %arg7[%c0_28, %c0_29] : memref<32x128xf32, #tpu.memory_space<vmem>>, vector<32x128xf32>
    %cst_30 = arith.constant dense<0.000000e+00> : vector<8x128xf32>
    %60 = tpu.matmul %58, %59, %cst_30 {dimension_numbers = #tpu.dot_dimension_numbers<[1], [0], [0], [1], [0, 0, 1, 1], [], []>} : vector<8x32xf32>, vector<32x128xf32>, vector<8x128xf32> -> vector<8x128xf32>
    %c0_31 = arith.constant 0 : index
    %c0_32 = arith.constant 0 : index
    %61 = vector.load %arg8[%c0_31, %c0_32] : memref<1x128xf32, #tpu.memory_space<vmem>>, vector<1x128xf32>
    %62 = vector.broadcast %61 : vector<1x128xf32> to vector<8x128xf32>
    %63 = arith.addf %60, %62 : vector<8x128xf32>
    %c0_33 = arith.constant 0 : index
    %c0_34 = arith.constant 0 : index
    %c0_35 = arith.constant 0 : index
    %c0_36 = arith.constant 0 : index
    %64 = vector.load %arg4[%c0_33, %c0_34, %c0_35, %c0_36] : memref<1x4x8x32xf32, #tpu.memory_space<vmem>>, vector<1x1x8x32xf32>
    %65 = vector.shape_cast %64 : vector<1x1x8x32xf32> to vector<8x32xf32>
    %cst_37 = arith.constant dense<0.000000e+00> : vector<8xf32>
    %66 = vector.multi_reduction <add>, %65, %cst_37 [1] : vector<8x32xf32> to vector<8xf32>
    %67 = vector.shape_cast %66 : vector<8xf32> to vector<8x1xf32>
    %cst_38 = arith.constant 3.200000e+01 : f32
    %68 = vector.broadcast %cst_38 : f32 to vector<8x1xf32>
    %69 = arith.divf %67, %68 : vector<8x1xf32>
    %70 = vector.broadcast %69 : vector<8x1xf32> to vector<8x32xf32>
    %71 = arith.subf %65, %70 : vector<8x32xf32>
    %72 = arith.mulf %71, %71 : vector<8x32xf32>
    %cst_39 = arith.constant dense<0.000000e+00> : vector<8xf32>
    %73 = vector.multi_reduction <add>, %72, %cst_39 [1] : vector<8x32xf32> to vector<8xf32>
    %74 = vector.shape_cast %73 : vector<8xf32> to vector<8x1xf32>
    %cst_40 = arith.constant 3.200000e+01 : f32
    %75 = vector.broadcast %cst_40 : f32 to vector<8x1xf32>
    %76 = arith.divf %74, %75 : vector<8x1xf32>
    %77 = vector.broadcast %69 : vector<8x1xf32> to vector<8x32xf32>
    %78 = arith.subf %65, %77 : vector<8x32xf32>
    %cst_41 = arith.constant 9.99999974E-6 : f32
    %79 = vector.broadcast %cst_41 : f32 to vector<8x1xf32>
    %80 = arith.addf %76, %79 : vector<8x1xf32>
    %81 = math.rsqrt %80 : vector<8x1xf32>
    %82 = vector.broadcast %81 : vector<8x1xf32> to vector<8x32xf32>
    %83 = arith.mulf %78, %82 : vector<8x32xf32>
    %c0_42 = arith.constant 0 : index
    %c0_43 = arith.constant 0 : index
    %84 = vector.load %arg5[%c0_42, %c0_43] : memref<1x32xf32, #tpu.memory_space<vmem>>, vector<1x32xf32>
    %85 = vector.broadcast %84 : vector<1x32xf32> to vector<8x32xf32>
    %86 = arith.mulf %83, %85 : vector<8x32xf32>
    %c0_44 = arith.constant 0 : index
    %c0_45 = arith.constant 0 : index
    %87 = vector.load %arg6[%c0_44, %c0_45] : memref<1x32xf32, #tpu.memory_space<vmem>>, vector<1x32xf32>
    %88 = vector.broadcast %87 : vector<1x32xf32> to vector<8x32xf32>
    %89 = arith.addf %86, %88 : vector<8x32xf32>
    %c0_46 = arith.constant 0 : index
    %c0_47 = arith.constant 0 : index
    %90 = vector.load %arg7[%c0_46, %c0_47] : memref<32x128xf32, #tpu.memory_space<vmem>>, vector<32x128xf32>
    %cst_48 = arith.constant dense<0.000000e+00> : vector<8x128xf32>
    %91 = tpu.matmul %89, %90, %cst_48 {dimension_numbers = #tpu.dot_dimension_numbers<[1], [0], [0], [1], [0, 0, 1, 1], [], []>} : vector<8x32xf32>, vector<32x128xf32>, vector<8x128xf32> -> vector<8x128xf32>
    %c0_49 = arith.constant 0 : index
    %c0_50 = arith.constant 0 : index
    %92 = vector.load %arg8[%c0_49, %c0_50] : memref<1x128xf32, #tpu.memory_space<vmem>>, vector<1x128xf32>
    %93 = vector.broadcast %92 : vector<1x128xf32> to vector<8x128xf32>
    %94 = arith.addf %91, %93 : vector<8x128xf32>
    %c0_i32 = arith.constant 0 : i32
    %95 = arith.cmpi sgt, %arg1, %c0_i32 : i32
    %cst_51 = arith.constant 0.000000e+00 : f32
    %96 = vector.broadcast %cst_51 : f32 to vector<8x128xf32>
    %97 = arith.select %95, %63, %96 : vector<8x128xf32>
    %c1_i32 = arith.constant 1 : i32
    %98 = arith.cmpi slt, %arg1, %c1_i32 : i32
    %cst_52 = arith.constant 0.000000e+00 : f32
    %99 = vector.broadcast %cst_52 : f32 to vector<8x128xf32>
    %100 = arith.select %98, %94, %99 : vector<8x128xf32>
    %101 = vector.shape_cast %97 : vector<8x128xf32> to vector<1x8x128xf32>
    %102 = vector.shape_cast %100 : vector<8x128xf32> to vector<1x8x128xf32>
    %103 = tpu.concatenate %101, %32, %102 in 0 : vector<1x8x128xf32>, vector<4x8x128xf32>, vector<1x8x128xf32> -> vector<6x8x128xf32>
    %cst_53 = arith.constant 0.000000e+00 : f32
    %104 = vector.broadcast %cst_53 : f32 to vector<6x1x128xf32>
    %105 = tpu.concatenate %104, %103, %104 in 1 : vector<6x1x128xf32>, vector<6x8x128xf32>, vector<6x1x128xf32> -> vector<6x10x128xf32>
    %cst_54 = arith.constant 0.000000e+00 : f32
    %106 = vector.broadcast %cst_54 : f32 to vector<4x8x128xf32>
    %c0_55 = arith.constant 0 : index
    %c0_56 = arith.constant 0 : index
    %107 = vector.load %arg9[%c0_55, %c0_56] : memref<9x128xf32, #tpu.memory_space<vmem>>, vector<1x128xf32>
    %108 = vector.extract_strided_slice %105 {offsets = [0, 0, 0], sizes = [4, 8, 128], strides = [1, 1, 1]} : vector<6x10x128xf32> to vector<4x8x128xf32>
    %109 = vector.shape_cast %107 : vector<1x128xf32> to vector<1x1x128xf32>
    %110 = vector.broadcast %109 : vector<1x1x128xf32> to vector<4x8x128xf32>
    %111 = arith.mulf %108, %110 : vector<4x8x128xf32>
    %112 = arith.addf %106, %111 : vector<4x8x128xf32>
    %c1 = arith.constant 1 : index
    %c0_57 = arith.constant 0 : index
    %113 = vector.load %arg9[%c1, %c0_57] : memref<9x128xf32, #tpu.memory_space<vmem>>, vector<1x128xf32>
    %114 = vector.extract_strided_slice %105 {offsets = [0, 1, 0], sizes = [4, 8, 128], strides = [1, 1, 1]} : vector<6x10x128xf32> to vector<4x8x128xf32>
    %115 = vector.shape_cast %113 : vector<1x128xf32> to vector<1x1x128xf32>
    %116 = vector.broadcast %115 : vector<1x1x128xf32> to vector<4x8x128xf32>
    %117 = arith.mulf %114, %116 : vector<4x8x128xf32>
    %118 = arith.addf %112, %117 : vector<4x8x128xf32>
    %c2 = arith.constant 2 : index
    %c0_58 = arith.constant 0 : index
    %119 = vector.load %arg9[%c2, %c0_58] : memref<9x128xf32, #tpu.memory_space<vmem>>, vector<1x128xf32>
    %120 = vector.extract_strided_slice %105 {offsets = [0, 2, 0], sizes = [4, 8, 128], strides = [1, 1, 1]} : vector<6x10x128xf32> to vector<4x8x128xf32>
    %121 = vector.shape_cast %119 : vector<1x128xf32> to vector<1x1x128xf32>
    %122 = vector.broadcast %121 : vector<1x1x128xf32> to vector<4x8x128xf32>
    %123 = arith.mulf %120, %122 : vector<4x8x128xf32>
    %124 = arith.addf %118, %123 : vector<4x8x128xf32>
    %c3_59 = arith.constant 3 : index
    %c0_60 = arith.constant 0 : index
    %125 = vector.load %arg9[%c3_59, %c0_60] : memref<9x128xf32, #tpu.memory_space<vmem>>, vector<1x128xf32>
    %126 = vector.extract_strided_slice %105 {offsets = [1, 0, 0], sizes = [4, 8, 128], strides = [1, 1, 1]} : vector<6x10x128xf32> to vector<4x8x128xf32>
    %127 = vector.shape_cast %125 : vector<1x128xf32> to vector<1x1x128xf32>
    %128 = vector.broadcast %127 : vector<1x1x128xf32> to vector<4x8x128xf32>
    %129 = arith.mulf %126, %128 : vector<4x8x128xf32>
    %130 = arith.addf %124, %129 : vector<4x8x128xf32>
    %c4 = arith.constant 4 : index
    %c0_61 = arith.constant 0 : index
    %131 = vector.load %arg9[%c4, %c0_61] : memref<9x128xf32, #tpu.memory_space<vmem>>, vector<1x128xf32>
    %132 = vector.extract_strided_slice %105 {offsets = [1, 1, 0], sizes = [4, 8, 128], strides = [1, 1, 1]} : vector<6x10x128xf32> to vector<4x8x128xf32>
    %133 = vector.shape_cast %131 : vector<1x128xf32> to vector<1x1x128xf32>
    %134 = vector.broadcast %133 : vector<1x1x128xf32> to vector<4x8x128xf32>
    %135 = arith.mulf %132, %134 : vector<4x8x128xf32>
    %136 = arith.addf %130, %135 : vector<4x8x128xf32>
    %c5 = arith.constant 5 : index
    %c0_62 = arith.constant 0 : index
    %137 = vector.load %arg9[%c5, %c0_62] : memref<9x128xf32, #tpu.memory_space<vmem>>, vector<1x128xf32>
    %138 = vector.extract_strided_slice %105 {offsets = [1, 2, 0], sizes = [4, 8, 128], strides = [1, 1, 1]} : vector<6x10x128xf32> to vector<4x8x128xf32>
    %139 = vector.shape_cast %137 : vector<1x128xf32> to vector<1x1x128xf32>
    %140 = vector.broadcast %139 : vector<1x1x128xf32> to vector<4x8x128xf32>
    %141 = arith.mulf %138, %140 : vector<4x8x128xf32>
    %142 = arith.addf %136, %141 : vector<4x8x128xf32>
    %c6 = arith.constant 6 : index
    %c0_63 = arith.constant 0 : index
    %143 = vector.load %arg9[%c6, %c0_63] : memref<9x128xf32, #tpu.memory_space<vmem>>, vector<1x128xf32>
    %144 = vector.extract_strided_slice %105 {offsets = [2, 0, 0], sizes = [4, 8, 128], strides = [1, 1, 1]} : vector<6x10x128xf32> to vector<4x8x128xf32>
    %145 = vector.shape_cast %143 : vector<1x128xf32> to vector<1x1x128xf32>
    %146 = vector.broadcast %145 : vector<1x1x128xf32> to vector<4x8x128xf32>
    %147 = arith.mulf %144, %146 : vector<4x8x128xf32>
    %148 = arith.addf %142, %147 : vector<4x8x128xf32>
    %c7 = arith.constant 7 : index
    %c0_64 = arith.constant 0 : index
    %149 = vector.load %arg9[%c7, %c0_64] : memref<9x128xf32, #tpu.memory_space<vmem>>, vector<1x128xf32>
    %150 = vector.extract_strided_slice %105 {offsets = [2, 1, 0], sizes = [4, 8, 128], strides = [1, 1, 1]} : vector<6x10x128xf32> to vector<4x8x128xf32>
    %151 = vector.shape_cast %149 : vector<1x128xf32> to vector<1x1x128xf32>
    %152 = vector.broadcast %151 : vector<1x1x128xf32> to vector<4x8x128xf32>
    %153 = arith.mulf %150, %152 : vector<4x8x128xf32>
    %154 = arith.addf %148, %153 : vector<4x8x128xf32>
    %c8 = arith.constant 8 : index
    %c0_65 = arith.constant 0 : index
    %155 = vector.load %arg9[%c8, %c0_65] : memref<9x128xf32, #tpu.memory_space<vmem>>, vector<1x128xf32>
    %156 = vector.extract_strided_slice %105 {offsets = [2, 2, 0], sizes = [4, 8, 128], strides = [1, 1, 1]} : vector<6x10x128xf32> to vector<4x8x128xf32>
    %157 = vector.shape_cast %155 : vector<1x128xf32> to vector<1x1x128xf32>
    %158 = vector.broadcast %157 : vector<1x1x128xf32> to vector<4x8x128xf32>
    %159 = arith.mulf %156, %158 : vector<4x8x128xf32>
    %160 = arith.addf %154, %159 : vector<4x8x128xf32>
    %c0_66 = arith.constant 0 : index
    %c0_67 = arith.constant 0 : index
    %161 = vector.load %arg10[%c0_66, %c0_67] : memref<1x128xf32, #tpu.memory_space<vmem>>, vector<1x128xf32>
    %162 = vector.shape_cast %161 : vector<1x128xf32> to vector<1x1x128xf32>
    %163 = vector.broadcast %162 : vector<1x1x128xf32> to vector<4x8x128xf32>
    %164 = arith.addf %160, %163 : vector<4x8x128xf32>
    %165 = arith.mulf %164, %164 : vector<4x8x128xf32>
    %166 = arith.mulf %164, %165 : vector<4x8x128xf32>
    %cst_68 = arith.constant 4.471500e-02 : f32
    %167 = vector.broadcast %cst_68 : f32 to vector<4x8x128xf32>
    %168 = arith.mulf %167, %166 : vector<4x8x128xf32>
    %169 = arith.addf %164, %168 : vector<4x8x128xf32>
    %cst_69 = arith.constant 0.797884583 : f32
    %170 = vector.broadcast %cst_69 : f32 to vector<4x8x128xf32>
    %171 = arith.mulf %170, %169 : vector<4x8x128xf32>
    %172 = math.tanh %171 : vector<4x8x128xf32>
    %cst_70 = arith.constant 1.000000e+00 : f32
    %173 = vector.broadcast %cst_70 : f32 to vector<4x8x128xf32>
    %174 = arith.addf %173, %172 : vector<4x8x128xf32>
    %cst_71 = arith.constant 5.000000e-01 : f32
    %175 = vector.broadcast %cst_71 : f32 to vector<4x8x128xf32>
    %176 = arith.mulf %175, %174 : vector<4x8x128xf32>
    %177 = arith.mulf %164, %176 : vector<4x8x128xf32>
    %178 = vector.shape_cast %177 : vector<4x8x128xf32> to vector<32x128xf32>
    %c0_72 = arith.constant 0 : index
    %c0_73 = arith.constant 0 : index
    %179 = vector.load %arg11[%c0_72, %c0_73] : memref<128x32xf32, #tpu.memory_space<vmem>>, vector<128x32xf32>
    %cst_74 = arith.constant dense<0.000000e+00> : vector<32x32xf32>
    %180 = tpu.matmul %178, %179, %cst_74 {dimension_numbers = #tpu.dot_dimension_numbers<[1], [0], [0], [1], [0, 0, 1, 1], [], []>} : vector<32x128xf32>, vector<128x32xf32>, vector<32x32xf32> -> vector<32x32xf32>
    %c0_75 = arith.constant 0 : index
    %c0_76 = arith.constant 0 : index
    %181 = vector.load %arg12[%c0_75, %c0_76] : memref<1x32xf32, #tpu.memory_space<vmem>>, vector<1x32xf32>
    %182 = vector.broadcast %181 : vector<1x32xf32> to vector<32x32xf32>
    %183 = arith.addf %180, %182 : vector<32x32xf32>
    %184 = vector.shape_cast %1 : vector<4x8x32xf32> to vector<32x32xf32>
    %185 = arith.addf %183, %184 : vector<32x32xf32>
    %186 = vector.shape_cast %185 : vector<32x32xf32> to vector<4x8x32xf32>
    %c0_77 = arith.constant 0 : index
    %c0_78 = arith.constant 0 : index
    %c0_79 = arith.constant 0 : index
    %c0_80 = arith.constant 0 : index
    %187 = vector.load %arg13[%c0_77, %c0_78, %c0_79, %c0_80] : memref<1x4x8x32xf32, #tpu.memory_space<vmem>>, vector<1x4x8x32xf32>
    %188 = vector.shape_cast %187 : vector<1x4x8x32xf32> to vector<4x8x32xf32>
    %189 = vector.shape_cast %186 : vector<4x8x32xf32> to vector<1x4x8x32xf32>
    tpu.vector_store %arg13[%c0_77, %c0_78, %c0_79, %c0_80], %189 {strides = array<i32>} : memref<1x4x8x32xf32, #tpu.memory_space<vmem>>, vector<1x4x8x32xf32>,
    return
  }
  func.func @transform_0(%arg0: i32, %arg1: i32) -> (i32, i32, i32, i32) {
    %c1_i32 = arith.constant 1 : i32
    %0 = arith.subi %arg1, %c1_i32 : i32
    %c0_i32 = arith.constant 0 : i32
    %1 = arith.maxsi %0, %c0_i32 : i32
    %c0_i32_0 = arith.constant 0 : i32
    %c0_i32_1 = arith.constant 0 : i32
    %c0_i32_2 = arith.constant 0 : i32
    return %arg0, %1, %c0_i32_0, %c0_i32_1 : i32, i32, i32, i32
  }
  func.func @transform_1(%arg0: i32, %arg1: i32) -> (i32, i32, i32, i32) {
    %c0_i32 = arith.constant 0 : i32
    %c0_i32_0 = arith.constant 0 : i32
    %c0_i32_1 = arith.constant 0 : i32
    return %arg0, %arg1, %c0_i32, %c0_i32_0 : i32, i32, i32, i32
  }
  func.func @transform_2(%arg0: i32, %arg1: i32) -> (i32, i32, i32, i32) {
    %c1_i32 = arith.constant 1 : i32
    %0 = arith.addi %arg1, %c1_i32 : i32
    %c1_i32_0 = arith.constant 1 : i32
    %1 = arith.minsi %0, %c1_i32_0 : i32
    %c0_i32 = arith.constant 0 : i32
    %c0_i32_1 = arith.constant 0 : i32
    %c0_i32_2 = arith.constant 0 : i32
    return %arg0, %1, %c0_i32, %c0_i32_1 : i32, i32, i32, i32
  }
  func.func @transform_3(%arg0: i32, %arg1: i32) -> (i32, i32) {
    %c0_i32 = arith.constant 0 : i32
    %c0_i32_0 = arith.constant 0 : i32
    %c0_i32_1 = arith.constant 0 : i32
    return %c0_i32, %c0_i32_0 : i32, i32
  }
  func.func @transform_4(%arg0: i32, %arg1: i32) -> (i32, i32) {
    %c0_i32 = arith.constant 0 : i32
    %c0_i32_0 = arith.constant 0 : i32
    %c0_i32_1 = arith.constant 0 : i32
    return %c0_i32, %c0_i32_0 : i32, i32
  }
  func.func @transform_5(%arg0: i32, %arg1: i32) -> (i32, i32) {
    %c0_i32 = arith.constant 0 : i32
    %c0_i32_0 = arith.constant 0 : i32
    %c0_i32_1 = arith.constant 0 : i32
    return %c0_i32, %c0_i32_0 : i32, i32
  }
  func.func @transform_6(%arg0: i32, %arg1: i32) -> (i32, i32) {
    %c0_i32 = arith.constant 0 : i32
    %c0_i32_0 = arith.constant 0 : i32
    %c0_i32_1 = arith.constant 0 : i32
    return %c0_i32, %c0_i32_0 : i32, i32
  }
  func.func @transform_7(%arg0: i32, %arg1: i32) -> (i32, i32) {
    %c0_i32 = arith.constant 0 : i32
    %c0_i32_0 = arith.constant 0 : i32
    %c0_i32_1 = arith.constant 0 : i32
    return %c0_i32, %c0_i32_0 : i32, i32
  }
  func.func @transform_8(%arg0: i32, %arg1: i32) -> (i32, i32) {
    %c0_i32 = arith.constant 0 : i32
    %c0_i32_0 = arith.constant 0 : i32
    %c0_i32_1 = arith.constant 0 : i32
    return %c0_i32, %c0_i32_0 : i32, i32
  }
  func.func @transform_9(%arg0: i32, %arg1: i32) -> (i32, i32) {
    %c0_i32 = arith.constant 0 : i32
    %c0_i32_0 = arith.constant 0 : i32
    %c0_i32_1 = arith.constant 0 : i32
    return %c0_i32, %c0_i32_0 : i32, i32
  }
  func.func @transform_10(%arg0: i32, %arg1: i32) -> (i32, i32) {
    %c0_i32 = arith.constant 0 : i32
    %c0_i32_0 = arith.constant 0 : i32
    %c0_i32_1 = arith.constant 0 : i32
    return %c0_i32, %c0_i32_0 : i32, i32
  }
  func.func @transform_11(%arg0: i32, %arg1: i32) -> (i32, i32, i32, i32) {
    %c0_i32 = arith.constant 0 : i32
    %c0_i32_0 = arith.constant 0 : i32
    %c0_i32_1 = arith.constant 0 : i32
    return %arg0, %arg1, %c0_i32, %c0_i32_0 : i32, i32, i32, i32
  }
}

</mosaic_0001>

<bundles_post_ra>
// kernel: block_forward.3
= control target key start
LH: loop header
LB: loop body
LE: loop exit
PB: predicated region body
PF: predicated region fallthrough
CT: control target
= control target key end

     0   :  { %s1221_s27 = smov 0   ;;  %s1414_s0 = inlined_call_operand.vmem [shape: f32[128,32], index: 0, kind: input, shape index: {}]   ;;  %s1415_s1 = inlined_call_operand.vmem [shape: f32[1,32], index: 1, kind: input, shape index: {}]   ;;  %s1416_s2 = inlined_call_operand.vmem [shape: f32[1,32], index: 2, kind: input, shape index: {}]   ;;  %s1417_s3 = inlined_call_operand.vmem [shape: f32[32,32], index: 3, kind: input, shape index: {}]   ;;  %s1418_s4 = inlined_call_operand.vmem [shape: f32[32,32], index: 4, kind: input, shape index: {}]   ;;  %s1419_s5 = inlined_call_operand.vmem [shape: f32[32,32], index: 5, kind: input, shape index: {}]   ;;  %s1420_s6 = inlined_call_operand.vmem [shape: f32[128,32], index: 6, kind: output, shape index: {0}]   ;;  %s1421_s7 = inlined_call_operand.vmem [shape: f32[128,32], index: 7, kind: output, shape index: {1}]   ;;  %s1422_s8 = inlined_call_operand.vmem [shape: f32[128,32], index: 8, kind: output, shape index: {2}]  }
   0x1 LB: > { %s979_s28 = sadd.s32 4294967295, %s1174_s27   ;;  %p983_p0 = scmp.ge.s32.totalorder %s1174_s27, 1  ;;  %s1174_s27 = sphi %s1221_s27, %s19_s27  }
   0x2   : > { %p268_p1 = scmp.lt.s32.totalorder %s1174_s27, 3 }
   0x4   : > { %p269_p2 = pnand %p983_p0, %p268_p1 }
   0x5   : > { %s984_s29 = sshll.u32 (!%p269_p2), %s979_s28, 3  ;;  %vm344_vm0 = vcmask (!%p269_p2), 261120   ;;  %v480_v56 = vld [vmem:[%s1417_s3] sm:$0xff] (!%p269_p2)  ;;  %v481_v57 = vld [vmem:[%s1417_s3 + $0x8] sm:$0xff] (!%p269_p2)  ;;  %v482_v59 = vld [vmem:[%s1417_s3 + $0x10] sm:$0xff] (!%p269_p2) }
   0x6   : > { %272 = sbr.rel (%p269_p2) target bundleno = 576 (0x240), region = 44  ;;  %p313_p3 = scmp.lt.s32.totalorder (!%p269_p2), %s984_s29, 15  ;;  %v1116_v58 = vpack.c.bf16 (!%p269_p2), %v481_v57, %v480_v56  ;;  %v483_v60 = vld [vmem:[%s1417_s3 + $0x18] sm:$0xff] (!%p269_p2)  ;;  %v738_v62 = vld [vmem:[%s1419_s5] sm:$0xff] (!%p269_p2)  ;;  %v739_v63 = vld [vmem:[%s1419_s5 + $0x8] sm:$0xff] (!%p269_p2) }
   0x7   : > { %v1120_v61 = vpack.c.bf16 (!%p269_p2), %v483_v60, %v482_v59 }
   0x8   : > { %1117 = vmatprep.subr.bf16.mxu0 (!%p269_p2), %v1116_v58  ;;  %1140 = vmatprep.subr.bf16.mxu1 (!%p269_p2), %v1116_v58 }
   0x9   : > { %1119 = vmatpush3.bf16.msra.mxu0 (!%p269_p2), %v1116_v58  ;;  %1142 = vmatpush3.bf16.msra.mxu1 (!%p269_p2), %v1116_v58 }
   0xa   : > { %1121 = vmatprep.subr.bf16.mxu0 (!%p269_p2), %v1120_v61  ;;  %1141 = vmatprep.subr.bf16.mxu1 (!%p269_p2), %v1120_v61 }
   0xd   : > { %s1424_s29 = smov (!%p313_p3, %s984_s29), 15  ;;  %1123 = vmatpush3.bf16.msra.mxu0 %v1120_v61  ;;  %1143 = vmatpush3.bf16.msra.mxu1 %v1120_v61 }
   0xe   : > { %s1229_s30 = sshll.u32 %s1424_s29, 3 }
   0xf   : > { %s316_s11 = scalar_lea.vmem %s1414_s0, %s1229_s30  ;;  %s322_s22 = scalar_lea.vmem %s1420_s6, %s1229_s30 }
  0x10   : > { %v336_v0 = vld [vmem:[%s316_s11] sm:$0xff]  ;;  %v337_v1 = vld [vmem:[%s316_s11 + $0x8] sm:$0xff]  ;;  %v338_v8 = vld [vmem:[%s316_s11 + $0x10] sm:$0xff]  ;;  %s1379_s25 = scalar_lea.vmem %s1422_s8, %s1229_s30  ;;  %s328_s29 = scalar_lea.vmem %s1421_s7, %s1229_s30 }
  0x11   : > { %v340_v2 = vld [vmem:[%s316_s11 + $0x20] sm:$0xff]  ;;  %v345_v3 = vsel %vm344_vm0, %v336_v0, 0.0  ;;  %v348_v4 = vsel %vm344_vm0, %v337_v1, 0.0  ;;  %v341_v5 = vld [vmem:[%s316_s11 + $0x28] sm:$0xff]  ;;  %v342_v9 = vld [vmem:[%s316_s11 + $0x30] sm:$0xff]  ;;  %v351_v10 = vsel %vm344_vm0, %v338_v8, 0.0 }
  0x12   : > { %346 = vadd.xlane.f32.xlu0 %v345_v3  ;;  %349 = vadd.xlane.f32.xlu1 %v348_v4  ;;  %v357_v6 = vsel %vm344_vm0, %v340_v2, 0.0  ;;  %v360_v7 = vsel %vm344_vm0, %v341_v5, 0.0  ;;  %v363_v11 = vsel %vm344_vm0, %v342_v9, 0.0  ;;  %v339_v12 = vld [vmem:[%s316_s11 + $0x18] sm:$0xff] }
  0x13   : > { %v343_v13 = vld [vmem:[%s316_s11 + $0x38] sm:$0xff]  ;;  %v354_v14 = vsel %vm344_vm0, %v339_v12, 0.0 }
  0x14   : > { %v366_v15 = vsel %vm344_vm0, %v343_v13, 0.0 }
  0x16   : > { %358 = vadd.xlane.f32.xlu0 %v357_v6  ;;  %361 = vadd.xlane.f32.xlu1 %v360_v7 }
  0x1a   : > { %352 = vadd.xlane.f32.xlu0 %v351_v10  ;;  %364 = vadd.xlane.f32.xlu1 %v363_v11 }
  0x1e   : > { %355 = vadd.xlane.f32.xlu0 %v354_v14  ;;  %367 = vadd.xlane.f32.xlu1 %v366_v15 }
  0x9f   : > { %v347_v16 = vpop.xlane.xlu0 %346  ;;  %v350_v17 = vpop.xlane.xlu1 %349 }
  0xa0   : > { %v370_v18 = vmul.f32 0.03125, %v347_v16  ;;  %v371_v19 = vmul.f32 0.03125, %v350_v17 }
  0xa2   : > { %v1243_v20 = vsub.f32 %v336_v0, %v370_v18  ;;  %v1245_v21 = vsub.f32 %v337_v1, %v371_v19  ;;  %v1301_v0 = vpack.c.bf16 %v739_v63, %v738_v62  ;;  %v621_v1 = vld [vmem:[%s1418_s4] sm:$0xff] }
  0xa3   : > { %v359_v22 = vpop.xlane.xlu0 %358  ;;  %v362_v23 = vpop.xlane.xlu1 %361 }
  0xa4   : > { %v374_v24 = vmul.f32 0.03125, %v359_v22  ;;  %v375_v25 = vmul.f32 0.03125, %v362_v23  ;;  %v386_v26 = vmul.f32 %v1243_v20, %v1243_v20  ;;  %v387_v27 = vmul.f32 %v1245_v21, %v1245_v21  ;;  %1133 = vmatprep.subr.bf16.mxu0 %v1301_v0 }
  0xa6   : > { %v1251_v28 = vsub.f32 %v340_v2, %v374_v24  ;;  %v1253_v29 = vsub.f32 %v341_v5, %v375_v25  ;;  %v394_v30 = vsel %vm344_vm0, %v386_v26, 0.0  ;;  %v397_v33 = vsel %vm344_vm0, %v387_v27, 0.0  ;;  %v622_v2 = vld [vmem:[%s1418_s4 + $0x8] sm:$0xff] }
  0xa7   : > { %395 = vadd.xlane.f32.xlu0 %v394_v30  ;;  %v353_v31 = vpop.xlane.xlu0 %352  ;;  %v365_v32 = vpop.xlane.xlu1 %364  ;;  %v1310_v3 = vpack.c.bf16 %v622_v2, %v621_v1  ;;  %v992_v30 = vld [vmem:[%s1415_s1] ss:$0 sm:$0xff] }
  0xa8   : > { %v372_v34 = vmul.f32 0.03125, %v353_v31  ;;  %v376_v35 = vmul.f32 0.03125, %v365_v32  ;;  %v390_v36 = vmul.f32 %v1251_v28, %v1251_v28  ;;  %v391_v37 = vmul.f32 %v1253_v29, %v1253_v29 }
  0xa9   : > { %1125 = vmatprep.subr.bf16.mxu1 %v1310_v3 }
  0xaa   : > { %v1261_v38 = vsub.f32 %v338_v8, %v372_v34  ;;  %v1263_v39 = vsub.f32 %v342_v9, %v376_v35  ;;  %v406_v40 = vsel %vm344_vm0, %v390_v36, 0.0  ;;  %v409_v43 = vsel %vm344_vm0, %v391_v37, 0.0  ;;  %v993_v34 = vld [vmem:[%s1416_s2] ss:$0 sm:$0xff] }
  0xab   : > { %398 = vadd.xlane.f32.xlu0 %v397_v33  ;;  %407 = vadd.xlane.f32.xlu1 %v406_v40  ;;  %v356_v41 = vpop.xlane.xlu0 %355  ;;  %v368_v42 = vpop.xlane.xlu1 %367 }
  0xac   : > { %v373_v44 = vmul.f32 0.03125, %v356_v41  ;;  %v377_v45 = vmul.f32 0.03125, %v368_v42  ;;  %v388_v46 = vmul.f32 %v1261_v38, %v1261_v38  ;;  %v392_v47 = vmul.f32 %v1263_v39, %v1263_v39 }
  0xae   : > { %v1271_v48 = vsub.f32 %v339_v12, %v373_v44  ;;  %v1273_v49 = vsub.f32 %v343_v13, %v377_v45  ;;  %v400_v50 = vsel %vm344_vm0, %v388_v46, 0.0  ;;  %v412_v51 = vsel %vm344_vm0, %v392_v47, 0.0  ;;  %v740_v44 = vld [vmem:[%s1419_s5 + $0x10] sm:$0xff]  ;;  %v741_v45 = vld [vmem:[%s1419_s5 + $0x18] sm:$0xff] }
  0xaf   : > { %410 = vadd.xlane.f32.xlu1 %v409_v43  ;;  %401 = vadd.xlane.f32.xlu0 %v400_v50 }
  0xb0   : > { %v389_v52 = vmul.f32 %v1271_v48, %v1271_v48  ;;  %v393_v53 = vmul.f32 %v1273_v49, %v1273_v49 }
  0xb2   : > { %v403_v54 = vsel %vm344_vm0, %v389_v52, 0.0  ;;  %v415_v55 = vsel %vm344_vm0, %v393_v53, 0.0  ;;  %v1136_v53 = vpack.c.bf16 %v741_v45, %v740_v44 }
  0xb3   : > { %413 = vadd.xlane.f32.xlu1 %v412_v51  ;;  %404 = vadd.xlane.f32.xlu0 %v403_v54  ;;  %v623_v54 = vld [vmem:[%s1418_s4 + $0x10] sm:$0xff] }
  0xb7   : > { %416 = vadd.xlane.f32.xlu1 %v415_v55  ;;  %v624_v55 = vld [vmem:[%s1418_s4 + $0x18] sm:$0xff] }
  0xb8   : > { %v1128_v60 = vpack.c.bf16 %v624_v55, %v623_v54 }
 0x134   : > { %v396_v4 = vpop.xlane.xlu0 %395 }
 0x135   : > { %v418_v5 = vmul.f32 0.03125, %v396_v4 }
 0x137   : > { %v426_v6 = vadd.f32 1e-05, %v418_v5 }
 0x138   : > { %v408_v7 = vpop.xlane.xlu1 %407  ;;  %v399_v8 = vpop.xlane.xlu0 %398 }
 0x139   : > { %1152 = vrsqrt.f32 %v426_v6  ;;  %v422_v9 = vmul.f32 0.03125, %v408_v7  ;;  %v419_v10 = vmul.f32 0.03125, %v399_v8 }
 0x13b   : > { %v430_v11 = vadd.f32 1e-05, %v422_v9  ;;  %v427_v12 = vadd.f32 1e-05, %v419_v10 }
 0x13c   : > { %v411_v13 = vpop.xlane.xlu1 %410  ;;  %v402_v14 = vpop.xlane.xlu0 %401 }
 0x13d   : > { %1154 = vrsqrt.f32 %v430_v11  ;;  %v423_v15 = vmul.f32 0.03125, %v411_v13  ;;  %v420_v16 = vmul.f32 0.03125, %v402_v14 }
 0x13e   : > { %1156 = vrsqrt.f32 %v427_v12 }
 0x13f   : > { %v431_v17 = vadd.f32 1e-05, %v423_v15  ;;  %v428_v18 = vadd.f32 1e-05, %v420_v16 }
 0x140   : > { %v414_v19 = vpop.xlane.xlu1 %413  ;;  %v405_v22 = vpop.xlane.xlu0 %404 }
 0x141   : > { %1158 = vrsqrt.f32 %v431_v17  ;;  %v424_v23 = vmul.f32 0.03125, %v414_v19  ;;  %v421_v24 = vmul.f32 0.03125, %v405_v22 }
 0x142   : > { %1160 = vrsqrt.f32 %v428_v18 }
 0x143   : > { %v1153_v25 = vpop.eup %1152  ;;  %v432_v26 = vadd.f32 1e-05, %v424_v23  ;;  %v429_v27 = vadd.f32 1e-05, %v421_v24 }
 0x144   : > { %v417_v31 = vpop.xlane.xlu1 %416  ;;  %v442_v32 = vmul.f32 %v1153_v25, %v1243_v20 }
 0x145   : > { %1162 = vrsqrt.f32 %v432_v26  ;;  %v425_v33 = vmul.f32 0.03125, %v417_v31 }
 0x146   : > { %1164 = vrsqrt.f32 %v429_v27  ;;  %v457_v35 = vmul.f32 %v992_v30, %v442_v32 }
 0x147   : > { %v1155_v36 = vpop.eup %1154  ;;  %v433_v37 = vadd.f32 1e-05, %v425_v33 }
 0x148   : > { %v1157_v40 = vpop.eup %1156  ;;  %v472_v41 = vadd.f32 %v993_v34, %v457_v35  ;;  %v446_v42 = vmul.f32 %v1155_v36, %v1251_v28 }
 0x149   : > { %1166 = vrsqrt.f32 %v433_v37  ;;  %v443_v43 = vmul.f32 %v1157_v40, %v1245_v21 }
 0x14a   : > { %1064 = vmatprep.mubr.msk.f32.mxu0 %vm344_vm0, %v472_v41  ;;  %v461_v20 = vmul.f32 %v992_v30, %v446_v42 }
 0x14b   : > { %v1159_v46 = vpop.eup %1158  ;;  %v458_v47 = vmul.f32 %v992_v30, %v443_v43 }
 0x14c   : > { %v1161_v50 = vpop.eup %1160  ;;  %v476_v51 = vadd.f32 %v993_v34, %v461_v20  ;;  %v447_v28 = vmul.f32 %v1159_v46, %v1253_v29 }
 0x14d   : > { %v473_v52 = vadd.f32 %v993_v34, %v458_v47  ;;  %v444_v21 = vmul.f32 %v1161_v50, %v1261_v38 }
 0x14e   : > { %1070 = vmatprep.mubr.msk.f32.mxu1 %vm344_vm0, %v476_v51  ;;  %v462_v56 = vmul.f32 %v992_v30, %v447_v28 }
 0x14f   : > { %v1163_v57 = vpop.eup %1162  ;;  %1065 = vmatmul.mubr.msk.f32.vlgmr.msra.gmra.mrb[0].mxu0 %vm344_vm0, %v473_v52  ;;  %v459_v58 = vmul.f32 %v992_v30, %v444_v21 }
 0x150   : > { %v1165_v29 = vpop.eup %1164  ;;  %v477_v59 = vadd.f32 %v993_v34, %v462_v56  ;;  %1135 = vmatpush3.bf16.msra.mxu0 %v1301_v0  ;;  %v448_v38 = vmul.f32 %v1163_v57, %v1263_v39 }
 0x151   : > { %v474_v61 = vadd.f32 %v993_v34, %v459_v58  ;;  %v445_v62 = vmul.f32 %v1165_v29, %v1271_v48  ;;  %1137 = vmatprep.subr.bf16.mxu0 %v1136_v53 }
 0x152   : > { %1071 = vmatmul.mubr.msk.f32.vlgmr.msra.gmra.mrb[0].mxu1 %vm344_vm0, %v477_v59  ;;  %v463_v63 = vmul.f32 %v992_v30, %v448_v38 }
 0x153   : > { %v1167_v1 = vpop.eup %1166  ;;  %1067 = vmatprep.mubr.msk.f32.mxu0 %vm344_vm0, %v474_v61  ;;  %v460_v2 = vmul.f32 %v992_v30, %v445_v62  ;;  %1127 = vmatpush3.bf16.msra.mxu1 %v1310_v3 }
 0x154   : > { %v478_v4 = vadd.f32 %v993_v34, %v463_v63  ;;  %1139 = vmatpush3.bf16.msra.mxu0 %v1136_v53  ;;  %1129 = vmatprep.subr.bf16.mxu1 %v1128_v60  ;;  %v449_v0 = vmul.f32 %v1167_v1, %v1273_v49 }
 0x155   : > { %v475_v39 = vadd.f32 %v993_v34, %v460_v2 }
 0x156   : > { %1073 = vmatprep.mubr.msk.f32.mxu1 %vm344_vm0, %v478_v4  ;;  %v464_v5 = vmul.f32 %v992_v30, %v449_v0 }
 0x157   : > { %1068 = vmatmul.mubr.msk.f32.gmra.mrb[2].mxu0 %vm344_vm0, %v475_v39  ;;  %1131 = vmatpush3.bf16.msra.mxu1 %v1128_v60 }
 0x158   : > { %1104 = vmatprep.mubr.msk.f32.mxu0 %vm344_vm0, %v472_v41  ;;  %v479_v48 = vadd.f32 %v993_v34, %v464_v5 }
 0x15a   : > { %1074 = vmatmul.mubr.msk.f32.gmra.mrb[2].mxu1 %vm344_vm0, %v479_v48 }
 0x15b   : > { %1105 = vmatmul.mubr.msk.f32.vlgmr.msra.gmra.mrb[4].mxu0 %vm344_vm0, %v473_v52  ;;  %1084 = vmatprep.mubr.msk.f32.mxu1 %vm344_vm0, %v472_v41 }
 0x15c   : > { %1107 = vmatprep.mubr.msk.f32.mxu0 %vm344_vm0, %v474_v61 }
 0x15e   : > { %1085 = vmatmul.mubr.msk.f32.vlgmr.msra.gmra.mrb[4].mxu1 %vm344_vm0, %v473_v52 }
 0x15f   : > { %1108 = vmatmul.mubr.msk.f32.gmra.mrb[6].mxu0 %vm344_vm0, %v475_v39  ;;  %1087 = vmatprep.mubr.msk.f32.mxu1 %vm344_vm0, %v474_v61 }
 0x160   : > { %1110 = vmatprep.mubr.msk.f32.mxu0 %vm344_vm0, %v476_v51 }
 0x162   : > { %1088 = vmatmul.mubr.msk.f32.gmra.mrb[6].mxu1 %vm344_vm0, %v475_v39 }
 0x163   : > { %1111 = vmatmul.mubr.msk.f32.gmra.mrb[8].mxu0 %vm344_vm0, %v477_v59  ;;  %1090 = vmatprep.mubr.msk.f32.mxu1 %vm344_vm0, %v476_v51 }
 0x164   : > { %1113 = vmatprep.mubr.msk.f32.mxu0 %vm344_vm0, %v478_v4 }
 0x166   : > { %1091 = vmatmul.mubr.msk.f32.gmra.mrb[8].mxu1 %vm344_vm0, %v477_v59 }
 0x167   : > { %1114 = vmatmul.mubr.msk.f32.gmra.mrb[10].mxu0 %vm344_vm0, %v479_v48  ;;  %1093 = vmatprep.mubr.msk.f32.mxu1 %vm344_vm0, %v478_v4 }
 0x16a   : > { %1094 = vmatmul.mubr.msk.f32.gmra.mrb[10].mxu1 %vm344_vm0, %v479_v48 }
 0x222   : > { %v1066_v49 = vpop.f32.mrb[0].mxu0 }
 0x223   : > { %614 = vst.msk [vmem:[%s322_s22 + $0x8] sm:$0xff] %vm344_vm0, %v1066_v49  ;;  %v574_v3 = vpop.f32.mrb[1].mxu0 }
 0x224   : > { %613 = vst.msk [vmem:[%s322_s22] sm:$0xff] %vm344_vm0, %v574_v3 }
 0x225   : > { %v1072_v6 = vpop.f32.mrb[0].mxu1 }
 0x226   : > { %618 = vst.msk [vmem:[%s322_s22 + $0x28] sm:$0xff] %vm344_vm0, %v1072_v6  ;;  %v594_v7 = vpop.f32.mrb[1].mxu1 }
 0x227   : > { %617 = vst.msk [vmem:[%s322_s22 + $0x20] sm:$0xff] %vm344_vm0, %v594_v7 }
 0x22a   : > { %v1069_v8 = vpop.f32.mrb[2].mxu0 }
 0x22b   : > { %616 = vst.msk [vmem:[%s322_s22 + $0x18] sm:$0xff] %vm344_vm0, %v1069_v8  ;;  %v584_v9 = vpop.f32.mrb[3].mxu0 }
 0x22c   : > { %615 = vst.msk [vmem:[%s322_s22 + $0x10] sm:$0xff] %vm344_vm0, %v584_v9 }
 0x22d   : > { %v1075_v10 = vpop.f32.mrb[2].mxu1 }
 0x22e   : > { %620 = vst.msk [vmem:[%s322_s22 + $0x38] sm:$0xff] %vm344_vm0, %v1075_v10  ;;  %v1106_v11 = vpop.f32.mrb[4].mxu0  ;;  %v604_v12 = vpop.f32.mrb[3].mxu1 }
 0x22f   : > { %848 = vst.msk [vmem:[%s1379_s25 + $0x8] sm:$0xff] %vm344_vm0, %v1106_v11  ;;  %619 = vst.msk [vmem:[%s322_s22 + $0x30] sm:$0xff] %vm344_vm0, %v604_v12  ;;  %v808_v13 = vpop.f32.mrb[5].mxu0 }
 0x230   : > { %847 = vst.msk [vmem:[%s1379_s25] sm:$0xff] %vm344_vm0, %v808_v13 }
 0x231   : > { %v1086_v14 = vpop.f32.mrb[4].mxu1 }
 0x232   : > { %731 = vst.msk [vmem:[%s328_s29 + $0x8] sm:$0xff] %vm344_vm0, %v1086_v14  ;;  %v1109_v15 = vpop.f32.mrb[6].mxu0  ;;  %v691_v16 = vpop.f32.mrb[5].mxu1 }
 0x233   : > { %850 = vst.msk [vmem:[%s1379_s25 + $0x18] sm:$0xff] %vm344_vm0, %v1109_v15  ;;  %730 = vst.msk [vmem:[%s328_s29] sm:$0xff] %vm344_vm0, %v691_v16  ;;  %v818_v17 = vpop.f32.mrb[7].mxu0 }
 0x234   : > { %849 = vst.msk [vmem:[%s1379_s25 + $0x10] sm:$0xff] %vm344_vm0, %v818_v17 }
 0x235   : > { %v1089_v18 = vpop.f32.mrb[6].mxu1 }
 0x236   : > { %733 = vst.msk [vmem:[%s328_s29 + $0x18] sm:$0xff] %vm344_vm0, %v1089_v18  ;;  %v1112_v19 = vpop.f32.mrb[8].mxu0  ;;  %v701_v22 = vpop.f32.mrb[7].mxu1 }
 0x237   : > { %852 = vst.msk [vmem:[%s1379_s25 + $0x28] sm:$0xff] %vm344_vm0, %v1112_v19  ;;  %732 = vst.msk [vmem:[%s328_s29 + $0x10] sm:$0xff] %vm344_vm0, %v701_v22  ;;  %v828_v23 = vpop.f32.mrb[9].mxu0 }
 0x238   : > { %851 = vst.msk [vmem:[%s1379_s25 + $0x20] sm:$0xff] %vm344_vm0, %v828_v23 }
 0x239   : > { %v1092_v24 = vpop.f32.mrb[8].mxu1 }
 0x23a   : > { %735 = vst.msk [vmem:[%s328_s29 + $0x28] sm:$0xff] %vm344_vm0, %v1092_v24  ;;  %v1115_v25 = vpop.f32.mrb[10].mxu0  ;;  %v711_v26 = vpop.f32.mrb[9].mxu1 }
 0x23b   : > { %854 = vst.msk [vmem:[%s1379_s25 + $0x38] sm:$0xff] %vm344_vm0, %v1115_v25  ;;  %734 = vst.msk [vmem:[%s328_s29 + $0x20] sm:$0xff] %vm344_vm0, %v711_v26  ;;  %v838_v27 = vpop.f32.mrb[11].mxu0 }
 0x23c   : > { %853 = vst.msk [vmem:[%s1379_s25 + $0x30] sm:$0xff] %vm344_vm0, %v838_v27 }
 0x23d   : > { %v1095_v30 = vpop.f32.mrb[10].mxu1 }
 0x23e   : > { %737 = vst.msk [vmem:[%s328_s29 + $0x38] sm:$0xff] %vm344_vm0, %v1095_v30  ;;  %v721_v31 = vpop.f32.mrb[11].mxu1 }
 0x23f   : > { %736 = vst.msk [vmem:[%s328_s29 + $0x30] sm:$0xff] %vm344_vm0, %v721_v31 }
 0x240 PF: > { %s19_s27 = sadd.s32 1, %s1174_s27  }
 0x241   : > { %p16_p4 = scmp.ge.s32.totalorder %s19_s27, 4  }
 0x243   :  { %18 = sbr.rel (!%p16_p4) target bundleno = 1 (0x1), region = 98 }

// kernel: block_forward.5
= control target key start
LH: loop header
LB: loop body
LE: loop exit
PB: predicated region body
PF: predicated region fallthrough
CT: control target
= control target key end

     0   :  { %s1897_s17 = smov 0   ;;  %s1899_s18 = smov 0   ;;  %s2391_s0 = inlined_call_operand.vmem [shape: f32[2,8,8,32], index: 0, kind: input, shape index: {}, may-alias: {0,1,2}]   ;;  %s2392_s1 = inlined_call_operand.vmem [shape: f32[2,8,8,32], index: 1, kind: input, shape index: {}, may-alias: {0,1,2}]   ;;  %s2393_s2 = inlined_call_operand.vmem [shape: f32[2,8,8,32], index: 2, kind: input, shape index: {}, may-alias: {0,1,2}]   ;;  %s2394_s3 = inlined_call_operand.vmem [shape: f32[1,32], index: 3, kind: input, shape index: {}]   ;;  %s2395_s4 = inlined_call_operand.vmem [shape: f32[1,32], index: 4, kind: input, shape index: {}]   ;;  %s2396_s5 = inlined_call_operand.vmem [shape: f32[32,128], index: 5, kind: input, shape index: {}]   ;;  %s2397_s6 = inlined_call_operand.vmem [shape: f32[1,128], index: 6, kind: input, shape index: {}]   ;;  %s2398_s7 = inlined_call_operand.vmem [shape: f32[9,128], index: 7, kind: input, shape index: {}]   ;;  %s2399_s8 = inlined_call_operand.vmem [shape: f32[1,128], index: 8, kind: input, shape index: {}]   ;;  %s2400_s9 = inlined_call_operand.vmem [shape: f32[128,32], index: 9, kind: input, shape index: {}]   ;;  %s2401_s10 = inlined_call_operand.vmem [shape: f32[1,32], index: 10, kind: input, shape index: {}]   ;;  %s2402_s11 = inlined_call_operand.vmem [shape: f32[2,8,8,32], index: 11, kind: output, shape index: {}]  }
   0x1   :  { %2403 = sst [smem:[#allocation3_spill]] %s2392_s1  ;;  %s1901_s19 = smov 0  }
   0x2   :  { %s1903_s20 = smov 0   ;;  %s1905_s21 = smov 0  }
   0x3 LB: > { %s30_s22 = sadd.s32 1, %s1824_s19  ;;  %s33_s23 = sadd.s32 1, %s1828_s20  ;;  %s1832_s21 = sphi %s1905_s21, %s21_s21   ;;  %s1828_s20 = sphi %s1903_s20, %s2414_s20   ;;  %s1824_s19 = sphi %s1901_s19, %s2413_s19   ;;  %s1820_s18 = sphi %s1899_s18, %s2412_s18   ;;  %s1816_s17 = sphi %s1897_s17, %s2411_s17  }
   0x4   : > { %p31_p0 = scmp.ge.s32.totalorder %s30_s22, 2  ;;  %p1530_p1 = scmp.ge.s32.totalorder %s1832_s21, 1 }
   0x5   : > { %p416_p2 = scmp.lt.s32.totalorder %s1832_s21, 5 }
   0x6   : > { %s2416_s22 = smov (%p31_p0, %s30_s22), 0  ;;  %s2418_s23 = smov (!%p31_p0, %s33_s23), %s1828_s20 }
   0x7   : > { %p417_p3 = pnand %p1530_p1, %p416_p2  ;;  %p35_p4 = scmp.ge.s32.totalorder %s2418_s23, 2 }
   0x8   : > { %p492_p5 = scmp.lt.s32.totalorder (!%p417_p3), %s1820_s18, 1  ;;  %s1535_s24 = sshll.u32 (!%p417_p3), %s1816_s17, 2  ;;  %vm544_vm0 = vcmask (!%p417_p3), 261120   ;;  %v620_v42 = vld [vmem:[%s2396_s5] sm:$0xff] (!%p417_p3)  ;;  %v621_v43 = vld [vmem:[%s2396_s5 + $0x8] sm:$0xff] (!%p417_p3)  ;;  %v622_v45 = vld [vmem:[%s2396_s5 + $0x10] sm:$0xff] (!%p417_p3) }
   0x9   : > { %s2420_s23 = smov (%p35_p4, %s2418_s23), 0  ;;  %420 = sbr.rel (%p417_p3) target bundleno = 856 (0x358), region = 64 }
   0xa   : > { %2404 = sst [smem:[#allocation2_spill]] %s2420_s23  ;;  %p507_p6 = scmp.lt.s32.totalorder (!%p417_p3), %s1535_s24, 7  ;;  %v2007_v44 = vpack.c.bf16 (!%p417_p3), %v621_v43, %v620_v42  ;;  %v623_v46 = vld [vmem:[%s2396_s5 + $0x18] sm:$0xff] (!%p417_p3)  ;;  %v1834_v48 = vmov (!%p417_p3), 0.0|0.0   ;;  %vm1835_vm1 = vmmov (!%p417_p3), 0   ;;  %v1288_v43 = vld [vmem:[%s2400_s9 + $0x30] sm:$0xff] (!%p417_p3) }
   0xb   : > { %s1531_s25 = sadd.s32 (!%p417_p3), 4294967295, %s1816_s17  ;;  %s514_s28 = sadd.s32 (!%p417_p3), 1, %s1816_s17  ;;  %v2017_v47 = vpack.c.bf16 (!%p417_p3), %v623_v46, %v622_v45  ;;  %v1290_v46 = vld [vmem:[%s2400_s9 + $0x40] sm:$0xff] (!%p417_p3)  ;;  %vm935_vm2 = vcmask (!%p417_p3), 1040384   ;;  %vm982_vm3 = vcmask (!%p417_p3), 1046528   ;;  %vm1024_vm4 = vcmask (!%p417_p3), 1045504  }
   0xc   : > { %p489_p7 = scmp.gt.s32.totalorder (!%p417_p3), %s1531_s25, 0  ;;  %p515_p8 = scmp.lt.s32.totalorder (!%p417_p3), %s514_s28, 1  ;;  %1680 = vmatprep.subr.bf16.mxu0 (!%p417_p3), %v2007_v44 }
   0xd   : > { %s2405_s1 = sld [smem:[#allocation3_spill]] (!%p417_p3)  ;;  %1682 = vmatpush3.bf16.msra.mxu0 (!%p417_p3), %v2007_v44  ;;  %p907_p11 = scmp.gt.s32.totalorder (!%p417_p3), %s1816_s17, 0 }
   0xe   : > { %1684 = vmatprep.subr.bf16.mxu0 (!%p417_p3), %v2017_v47  ;;  %p912_p12 = scmp.lt.s32.totalorder (!%p417_p3), %s1816_s17, 1 }
  0x10   : > { %s2422_s18 = smov (!%p492_p5, %s1820_s18), 1  ;;  %s2424_s24 = smov (!%p507_p6, %s1535_s24), 7 }
  0x11   : > { %s1931_s26 = sshll.u32 %s2422_s18, 3  ;;  %s2426_s25 = smov (!%p489_p7, %s1531_s25), 0  ;;  %1686 = vmatpush3.bf16.msra.mxu0 %v2017_v47 }
  0x12   : > { %s510_s27 = sadd.s32 %s1931_s26, %s2424_s24  ;;  %s2428_s28 = smov (!%p515_p8, %s514_s28), 1  ;;  %1687 = vmatprep.subr.bf16.mxu0 %v1834_v48 }
  0x13   : > { %s1935_s29 = sshll.u32 %s510_s27, 3  ;;  %s1532_s14 = sshll.u32 %s2426_s25, 2 }
  0x14   : > { %s512_s13 = scalar_lea.vmem %s2405_s1, %s1935_s29  ;;  %p494_p9 = scmp.lt.s32.totalorder %s1532_s14, 7 }
  0x15   : > { %v1941_v0 = vld [vmem:[%s512_s13] sm:$0xff]  ;;  %v1943_v1 = vld [vmem:[%s512_s13 + $0x10] sm:$0xff]  ;;  %v1945_v2 = vld [vmem:[%s512_s13 + $0x8] sm:$0xff]  ;;  %s1538_s15 = sshll.u32 %s2428_s28, 2  ;;  %s538_s1 = scalar_lea.vmem %s2402_s11, %s1935_s29 }
  0x16   : > { %v545_v3 = vsel %vm544_vm0, %v1941_v0, 0.0  ;;  %v551_v4 = vsel %vm544_vm0, %v1943_v1, 0.0  ;;  %v1951_v5 = vld [vmem:[%s512_s13 + $0x18] sm:$0xff]  ;;  %v548_v6 = vsel %vm544_vm0, %v1945_v2, 0.0  ;;  %p520_p10 = scmp.lt.s32.totalorder %s1538_s15, 7  ;;  %s2430_s14 = smov (!%p494_p9, %s1532_s14), 7 }
  0x17   : > { %546 = vadd.xlane.f32.xlu0 %v545_v3  ;;  %552 = vadd.xlane.f32.xlu1 %v551_v4  ;;  %v554_v7 = vsel %vm544_vm0, %v1951_v5, 0.0  ;;  %s497_s16 = sadd.s32 %s1931_s26, %s2430_s14 }
  0x18   : > { %s2432_s15 = smov (!%p520_p10, %s1538_s15), 7  ;;  %s1534_s18 = sshll.u32 %s497_s16, 3 }
  0x19   : > { %s523_s24 = sadd.s32 %s1931_s26, %s2432_s15  ;;  %s499_s25 = scalar_lea.vmem %s2391_s0, %s1534_s18 }
  0x1a   : > { %s1540_s12 = sshll.u32 %s523_s24, 3  ;;  %v1551_v8 = vld [vmem:[%s499_s25 + $0x18] sm:$0xff] }
  0x1b   : > { %549 = vadd.xlane.f32.xlu0 %v548_v6  ;;  %555 = vadd.xlane.f32.xlu1 %v554_v7  ;;  %s525_s23 = scalar_lea.vmem %s2393_s2, %s1540_s12  ;;  %v730_v9 = vsel %vm544_vm0, %v1551_v8, 0.0 }
  0x1c   : > { %v818_v10 = vld [vmem:[%s525_s23] sm:$0xff]  ;;  %s2102_s14 = scalar_select %p907_p11, 1, 0 }
  0x1d   : > { %v819_v11 = vsel %vm544_vm0, %v818_v10, 0.0  ;;  %s2105_s15 = scalar_select %p912_p12, 1, 0 }
  0x1f   : > { %731 = vadd.xlane.f32.xlu0 %v730_v9  ;;  %820 = vadd.xlane.f32.xlu1 %v819_v11 }
  0xa4   : > { %v547_v12 = vpop.xlane.xlu0 %546  ;;  %v553_v13 = vpop.xlane.xlu1 %552 }
  0xa5   : > { %v558_v14 = vmul.f32 0.03125, %v547_v12  ;;  %v560_v15 = vmul.f32 0.03125, %v553_v13 }
  0xa7   : > { %v1968_v16 = vsub.f32 %v1941_v0, %v558_v14  ;;  %v1971_v17 = vsub.f32 %v1943_v1, %v560_v15 }
  0xa8   : > { %v550_v18 = vpop.xlane.xlu0 %549  ;;  %v556_v19 = vpop.xlane.xlu1 %555 }
  0xa9   : > { %v559_v20 = vmul.f32 0.03125, %v550_v18  ;;  %v561_v21 = vmul.f32 0.03125, %v556_v19  ;;  %v566_v22 = vmul.f32 %v1968_v16, %v1968_v16  ;;  %v568_v23 = vmul.f32 %v1971_v17, %v1971_v17 }
  0xab   : > { %v1978_v24 = vsub.f32 %v1945_v2, %v559_v20  ;;  %v1981_v25 = vsub.f32 %v1951_v5, %v561_v21  ;;  %v570_v26 = vsel %vm544_vm0, %v566_v22, 0.0  ;;  %v576_v28 = vsel %vm544_vm0, %v568_v23, 0.0 }
  0xac   : > { %571 = vadd.xlane.f32.xlu0 %v570_v26  ;;  %v732_v30 = vpop.xlane.xlu0 %731  ;;  %v821_v32 = vpop.xlane.xlu1 %820 }
  0xad   : > { %v567_v27 = vmul.f32 %v1978_v24, %v1978_v24  ;;  %v569_v29 = vmul.f32 %v1981_v25, %v1981_v25  ;;  %v733_v31 = vmul.f32 0.03125, %v732_v30  ;;  %v822_v34 = vmul.f32 0.03125, %v821_v32 }
  0xaf   : > { %v573_v33 = vsel %vm544_vm0, %v567_v27, 0.0  ;;  %v1990_v35 = vsub.f32 %v1551_v8, %v733_v31  ;;  %v579_v36 = vsel %vm544_vm0, %v569_v29, 0.0  ;;  %v1993_v37 = vsub.f32 %v818_v10, %v822_v34  ;;  %v1544_v8 = vld [vmem:[%s2394_s3] ss:$0 sm:$0xff] }
  0xb0   : > { %574 = vadd.xlane.f32.xlu1 %v573_v33  ;;  %577 = vadd.xlane.f32.xlu0 %v576_v28  ;;  %v1545_v10 = vld [vmem:[%s2395_s4] ss:$0 sm:$0xff] }
  0xb1   : > { %v735_v38 = vmul.f32 %v1990_v35, %v1990_v35  ;;  %v824_v39 = vmul.f32 %v1993_v37, %v1993_v37  ;;  %v1282_v34 = vld [vmem:[%s2400_s9] sm:$0xff] }
  0xb3   : > { %v736_v40 = vsel %vm544_vm0, %v735_v38, 0.0  ;;  %v825_v41 = vsel %vm544_vm0, %v824_v39, 0.0  ;;  %v1285_v38 = vld [vmem:[%s2400_s9 + $0x18] sm:$0xff] }
  0xb4   : > { %580 = vadd.xlane.f32.xlu1 %v579_v36  ;;  %737 = vadd.xlane.f32.xlu0 %v736_v40  ;;  %v1284_v36 = vld [vmem:[%s2400_s9 + $0x10] sm:$0xff]  ;;  %v1286_v40 = vld [vmem:[%s2400_s9 + $0x20] sm:$0xff] }
  0xb5   : > { %v1703_v39 = vpack.c.bf16 %v1285_v38, %v1284_v36  ;;  %v2168_v38 = vld [vmem:[%s2398_s7 + $0x3] ss:$0 sm:$0xff] }
  0xb8   : > { %826 = vadd.xlane.f32.xlu1 %v825_v41  ;;  %v1287_v41 = vld [vmem:[%s2400_s9 + $0x28] sm:$0xff] }
  0xb9   : > { %v1707_v42 = vpack.c.bf16 %v1287_v41, %v1286_v40 }
 0x139   : > { %v572_v49 = vpop.xlane.xlu0 %571 }
 0x13a   : > { %v582_v50 = vmul.f32 0.03125, %v572_v49  ;;  %v1292_v49 = vld [vmem:[%s2400_s9 + $0x50] sm:$0xff] }
 0x13c   : > { %v586_v51 = vadd.f32 1e-05, %v582_v50  ;;  %v1293_v50 = vld [vmem:[%s2400_s9 + $0x58] sm:$0xff] }
 0x13d   : > { %v575_v52 = vpop.xlane.xlu1 %574  ;;  %v578_v53 = vpop.xlane.xlu0 %577 }
 0x13e   : > { %1774 = vrsqrt.f32 %v586_v51  ;;  %v583_v54 = vmul.f32 0.03125, %v575_v52  ;;  %v584_v55 = vmul.f32 0.03125, %v578_v53  ;;  %v1719_v51 = vpack.c.bf16 %v1293_v50, %v1292_v49  ;;  %v1294_v52 = vld [vmem:[%s2400_s9 + $0x60] sm:$0xff]  ;;  %v1295_v53 = vld [vmem:[%s2400_s9 + $0x68] sm:$0xff] }
 0x140   : > { %v587_v56 = vadd.f32 1e-05, %v583_v54  ;;  %v588_v57 = vadd.f32 1e-05, %v584_v55  ;;  %v1723_v54 = vpack.c.bf16 %v1295_v53, %v1294_v52  ;;  %v1296_v55 = vld [vmem:[%s2400_s9 + $0x70] sm:$0xff] }
 0x141   : > { %v581_v58 = vpop.xlane.xlu1 %580  ;;  %v738_v60 = vpop.xlane.xlu0 %737 }
 0x142   : > { %1776 = vrsqrt.f32 %v587_v56  ;;  %v585_v59 = vmul.f32 0.03125, %v581_v58  ;;  %v739_v62 = vmul.f32 0.03125, %v738_v60  ;;  %v1297_v56 = vld [vmem:[%s2400_s9 + $0x78] sm:$0xff]  ;;  %v2100_v58 = vld [vmem:[%s2397_s6] ss:$0 sm:$0xff] }
 0x143   : > { %1778 = vrsqrt.f32 %v588_v57  ;;  %v1727_v57 = vpack.c.bf16 %v1297_v56, %v1296_v55 }
 0x144   : > { %v589_v61 = vadd.f32 1e-05, %v585_v59  ;;  %v740_v3 = vadd.f32 1e-05, %v739_v62 }
 0x145   : > { %v827_v63 = vpop.xlane.xlu1 %826 }
 0x146   : > { %1780 = vrsqrt.f32 %v589_v61  ;;  %v828_v4 = vmul.f32 0.03125, %v827_v63 }
 0x147   : > { %1782 = vrsqrt.f32 %v740_v3  ;;  %v2111_v3 = vld [vmem:[%s2398_s7 + $0x1] ss:$0 sm:$0xff] }
 0x148   : > { %v1775_v6 = vpop.eup %1774  ;;  %v829_v7 = vadd.f32 1e-05, %v828_v4  ;;  %v2116_v4 = vld [vmem:[%s2398_s7 + $0x2] ss:$0 sm:$0xff] }
 0x149   : > { %v594_v9 = vmul.f32 %v1775_v6, %v1968_v16  ;;  %v2121_v6 = vld [vmem:[%s2398_s7 + $0x4] ss:$0 sm:$0xff] }
 0x14a   : > { %1784 = vrsqrt.f32 %v829_v7  ;;  %v2126_v7 = vld [vmem:[%s2398_s7 + $0x5] ss:$0 sm:$0xff] }
 0x14b   : > { %v605_v11 = vmul.f32 %v1544_v8, %v594_v9  ;;  %v909_v9 = vstv %s2102_s14 }
 0x14c   : > { %v1777_v12 = vpop.eup %1776  ;;  %vm2191_vm5 = vcmp.eq.s32.totalorder %v909_v9, 1 }
 0x14d   : > { %v1779_v13 = vpop.eup %1778  ;;  %v616_v14 = vadd.f32 %v1545_v10, %v605_v11  ;;  %v595_v15 = vmul.f32 %v1777_v12, %v1978_v24 }
 0x14e   : > { %v596_v18 = vmul.f32 %v1779_v13, %v1971_v17 }
 0x14f   : > { %1613 = vmatprep.mubr.msk.f32.mxu0 %vm544_vm0, %v616_v14  ;;  %v606_v19 = vmul.f32 %v1544_v8, %v595_v15  ;;  %v914_v14 = vstv %s2105_s15 }
 0x150   : > { %v1781_v20 = vpop.eup %1780  ;;  %v607_v21 = vmul.f32 %v1544_v8, %v596_v18  ;;  %vm2275_vm6 = vcmp.eq.s32.totalorder %v914_v14, 1 }
 0x151   : > { %v617_v22 = vadd.f32 %v1545_v10, %v606_v19  ;;  %v597_v16 = vmul.f32 %v1781_v20, %v1981_v25  ;;  %v1783_v23 = vpop.eup %1782  ;;  %v1836_v25 = vmov 0.0  }
 0x152   : > { %v618_v26 = vadd.f32 %v1545_v10, %v607_v21  ;;  %v742_v27 = vmul.f32 %v1783_v23, %v1990_v35  ;;  %v1283_v35 = vld [vmem:[%s2400_s9 + $0x8] sm:$0xff] }
 0x153   : > { %1614 = vmatmul.mubr.msk.f32.vlgmr.msra.gmra.mrb[0].mxu0 %vm544_vm0, %v617_v22  ;;  %v608_v28 = vmul.f32 %v1544_v8, %v597_v16 }
 0x154   : > { %1689 = vmatpush3.bf16.msra.mxu0 %v2007_v44  ;;  %1616 = vmatprep.mubr.msk.f32.mxu0 %vm544_vm0, %v618_v26  ;;  %v743_v24 = vmul.f32 %v1544_v8, %v742_v27  ;;  %v1785_v29 = vpop.eup %1784  ;;  %v2149_v26 = vld [vmem:[%s2398_s7 + $0x7] ss:$0 sm:$0xff]  ;;  %v2154_v27 = vld [vmem:[%s2398_s7 + $0x8] ss:$0 sm:$0xff] }
 0x155   : > { %1690 = vmatprep.subr.bf16.mxu0 %v1834_v48  ;;  %v619_v17 = vadd.f32 %v1545_v10, %v608_v28  ;;  %v831_v30 = vmul.f32 %v1785_v29, %v1993_v37  ;;  %v1699_v37 = vpack.c.bf16 %v1283_v35, %v1282_v34 }
 0x156   : > { %v744_v31 = vadd.f32 %v1545_v10, %v743_v24 }
 0x157   : > { %1617 = vmatmul.mubr.msk.f32.gmra.mrb[2].mxu0 %vm544_vm0, %v619_v17  ;;  %v832_v32 = vmul.f32 %v1544_v8, %v831_v30  ;;  %1700 = vmatprep.subr.bf16.mxu1 %v1699_v37 }
 0x158   : > { %1692 = vmatpush3.bf16.msra.mxu0 %v2017_v47  ;;  %1627 = vmatprep.mubr.msk.f32.mxu0 %vm1835_vm1, %v1836_v25 }
 0x159   : > { %1693 = vmatprep.subr.bf16.mxu0 %v1834_v48  ;;  %v833_v33 = vadd.f32 %v1545_v10, %v832_v32  ;;  %1702 = vmatpush3.bf16.msra.mxu1 %v1699_v37 }
 0x15a   : > { %1704 = vmatprep.subr.bf16.mxu1 %v1703_v39 }
 0x15b   : > { %1628 = vmatmul.mubr.msk.f32.vlgmr.msra.gmra.mrb[4].mxu0 %vm544_vm0, %v744_v31 }
 0x15c   : > { %1695 = vmatpush3.bf16.msra.mxu0 %v2007_v44  ;;  %1638 = vmatprep.mubr.msk.f32.mxu0 %vm1835_vm1, %v1836_v25  ;;  %v1289_v44 = vld [vmem:[%s2400_s9 + $0x38] sm:$0xff] }
 0x15d   : > { %1696 = vmatprep.subr.bf16.mxu0 %v1834_v48  ;;  %1706 = vmatpush3.bf16.msra.mxu1 %v1703_v39  ;;  %v1711_v45 = vpack.c.bf16 %v1289_v44, %v1288_v43 }
 0x15e   : > { %1708 = vmatprep.subr.bf16.mxu1 %v1707_v42 }
 0x160   : > { %1698 = vmatpush3.bf16.msra.mxu0 %v2017_v47  ;;  %v1291_v47 = vld [vmem:[%s2400_s9 + $0x48] sm:$0xff] }
 0x161   : > { %1710 = vmatpush3.bf16.msra.mxu1 %v1707_v42  ;;  %v1715_v48 = vpack.c.bf16 %v1291_v47, %v1290_v46 }
 0x162   : > { %1712 = vmatprep.subr.bf16.mxu1 %v1711_v45 }
 0x163   : > { %1639 = vmatmul.mubr.msk.f32.vlgmr.msra.gmra.mrb[6].mxu0 %vm544_vm0, %v833_v33 }
 0x165   : > { %1714 = vmatpush3.bf16.msra.mxu1 %v1711_v45 }
 0x166   : > { %1716 = vmatprep.subr.bf16.mxu1 %v1715_v48 }
 0x169   : > { %1718 = vmatpush3.bf16.msra.mxu1 %v1715_v48 }
 0x16a   : > { %1720 = vmatprep.subr.bf16.mxu1 %v1719_v51 }
 0x16d   : > { %1722 = vmatpush3.bf16.msra.mxu1 %v1719_v51 }
 0x16e   : > { %1724 = vmatprep.subr.bf16.mxu1 %v1723_v54 }
 0x171   : > { %1726 = vmatpush3.bf16.msra.mxu1 %v1723_v54 }
 0x172   : > { %1728 = vmatprep.subr.bf16.mxu1 %v1727_v57 }
 0x175   : > { %1730 = vmatpush3.bf16.msra.mxu1 %v1727_v57 }
 0x226   : > { %v1615_v59 = vpop.f32.mrb[0].mxu0 }
 0x227   : > { %v715_v60 = vadd.f32 %v1615_v59, %v2100_v58  ;;  %v709_v61 = vpop.f32.mrb[1].mxu0 }
 0x228   : > { %v710_v62 = vadd.f32 %v2100_v58, %v709_v61 }
 0x229   : > { %v925_v63 = vrot.slane %v715_v60, 7 }
 0x22a   : > { %v1618_v8 = vpop.f32.mrb[2].mxu0  ;;  %v924_v12 = vrot.slane %v710_v62, 7 }
 0x22b   : > { %v2130_v10 = vsel %vm935_vm2, 0.0, %v925_v63  ;;  %v944_v11 = vsel %vm935_vm2, %v925_v63, 0.0  ;;  %v719_v13 = vpop.f32.mrb[3].mxu0  ;;  %v725_v39 = vadd.f32 %v1618_v8, %v2100_v58 }
 0x22c   : > { %v970_v15 = vmul.f32 %v2111_v3, %v2130_v10  ;;  %v971_v18 = vmul.f32 %v2111_v3, %v944_v11  ;;  %v1012_v19 = vmul.f32 %v2116_v4, %v2130_v10  ;;  %v1013_v20 = vmul.f32 %v2116_v4, %v944_v11 }
 0x22d   : > { %v1065_v21 = vmul.f32 %v2121_v6, %v2130_v10  ;;  %v1066_v22 = vmul.f32 %v2121_v6, %v944_v11  ;;  %v1106_v16 = vmul.f32 %v2126_v7, %v2130_v10  ;;  %v1107_v23 = vmul.f32 %v2126_v7, %v944_v11 }
 0x22e   : > { %v989_v28 = vrot.slane %v970_v15, 1  ;;  %v990_v17 = vrot.slane %v971_v18, 1  ;;  %v1031_v24 = vrot.slane %v1012_v19, 2  ;;  %v1032_v29 = vrot.slane %v1013_v20, 2  ;;  %v814_v25 = vpop.f32.mrb[4].mxu0 }
 0x22f   : > { %v1082_v30 = vrot.slane %v1065_v21, 1  ;;  %v1083_v31 = vrot.slane %v1066_v22, 1  ;;  %v1123_v32 = vrot.slane %v1106_v16, 2  ;;  %v1124_v33 = vrot.slane %v1107_v23, 2  ;;  %v1629_v34 = vpop.f32.mrb[5].mxu0 }
 0x230   : > { %v2157_v35 = vsel %vm982_vm3, %v989_v28, %v990_v17  ;;  %v2160_v36 = vmul.f32 %v2149_v26, %v944_v11  ;;  %v2163_v37 = vmul.f32 %v2154_v27, %v944_v11  ;;  %v2172_v40 = vsel %vm1024_vm4, %v1031_v24, %v1032_v29 }
 0x231   : > { %v2175_v41 = vsel %vm982_vm3, %v1082_v30, %v1083_v31  ;;  %v937_v42 = vsel %vm935_vm2, 0.0, %v924_v12  ;;  %v943_v43 = vsel %vm935_vm2, %v924_v12, 0.0  ;;  %v2180_v44 = vsel %vm1024_vm4, %v1123_v32, %v1124_v33 }
 0x232   : > { %v1175_v45 = vrot.slane %v2160_v36, 1  ;;  %v968_v46 = vmul.f32 %v2111_v3, %v937_v42  ;;  %v969_v47 = vmul.f32 %v2111_v3, %v943_v43  ;;  %v1216_v48 = vrot.slane %v2163_v37, 2 }
 0x233   : > { %v1010_v49 = vmul.f32 %v2116_v4, %v937_v42  ;;  %v1011_v50 = vmul.f32 %v2116_v4, %v943_v43  ;;  %v2189_v51 = vmul.f32 %v2168_v38, %v937_v42  ;;  %v1063_v55 = vmul.f32 %v2121_v6, %v937_v42 }
 0x234   : > { %v986_v53 = vrot.slane %v968_v46, 1  ;;  %v987_v54 = vrot.slane %v969_v47, 1  ;;  %v1064_v56 = vmul.f32 %v2121_v6, %v943_v43  ;;  %v1104_v60 = vmul.f32 %v2126_v7, %v937_v42 }
 0x235   : > { %v1028_v57 = vrot.slane %v1010_v49, 2  ;;  %v1029_v59 = vrot.slane %v1011_v50, 2  ;;  %v1105_v61 = vmul.f32 %v2126_v7, %v943_v43  ;;  %v2201_v62 = vmul.f32 %v2168_v38, %v2130_v10 }
 0x236   : > { %v1079_v63 = vrot.slane %v1063_v55, 1  ;;  %v1080_v8 = vrot.slane %v1064_v56, 1  ;;  %v927_v9 = vrot.slane %v725_v39, 7  ;;  %v2203_v11 = vpop.f32.mrb[6].mxu0  ;;  %v2206_v12 = vsel %vm982_vm3, %v986_v53, %v987_v54 }
 0x237   : > { %v2209_v15 = vsel %vm1024_vm4, %v1028_v57, %v1029_v59  ;;  %v1120_v18 = vrot.slane %v1104_v60, 2  ;;  %v1121_v19 = vrot.slane %v1105_v61, 2  ;;  %v1640_v20 = vpop.f32.mrb[7].mxu0  ;;  %v720_v23 = vadd.f32 %v2100_v58, %v719_v13 }
 0x238   : > { %v2212_v21 = vsel %vm982_vm3, %v1079_v63, %v1080_v8  ;;  %v2215_v22 = vsel %vm935_vm2, 0.0, %v927_v9  ;;  %v946_v16 = vsel %vm935_vm2, %v927_v9, 0.0  ;;  %v815_v29 = vadd.f32 %v2100_v58, %v814_v25  ;;  %v1554_v25 = vld [vmem:[%s2398_s7] ss:$0 sm:$0xff] }
 0x239   : > { %v2220_v28 = vsel %vm1024_vm4, %v1120_v18, %v1121_v19  ;;  %v1069_v17 = vmul.f32 %v2121_v6, %v2215_v22  ;;  %v1070_v24 = vmul.f32 %v2121_v6, %v946_v16  ;;  %v2228_v30 = vmul.f32 %v2126_v7, %v2215_v22 }
 0x23a   : > { %v2231_v31 = vmul.f32 %v2126_v7, %v946_v16  ;;  %v1162_v13 = vmul.f32 %v2149_v26, %v2215_v22  ;;  %v1163_v32 = vmul.f32 %v2149_v26, %v946_v16  ;;  %v1203_v39 = vmul.f32 %v2154_v27, %v2215_v22 }
 0x23b   : > { %v1088_v33 = vrot.slane %v1069_v17, 1  ;;  %v1089_v34 = vrot.slane %v1070_v24, 1  ;;  %v1204_v43 = vmul.f32 %v2154_v27, %v946_v16  ;;  %v2244_v46 = vmul.f32 %v2168_v38, %v2215_v22 }
 0x23c   : > { %v1129_v47 = vrot.slane %v2228_v30, 2  ;;  %v1180_v49 = vrot.slane %v1162_v13, 1  ;;  %v1181_v50 = vrot.slane %v1163_v32, 1  ;;  %v1130_v54 = vrot.slane %v2231_v31, 2 }
 0x23d   : > { %v2248_v53 = vsel %vm982_vm3, %v1088_v33, %v1089_v34  ;;  %v1221_v55 = vrot.slane %v1203_v39, 2  ;;  %v926_v56 = vrot.slane %v720_v23, 7  ;;  %v1222_v59 = vrot.slane %v1204_v43, 2 }
 0x23e   : > { %v2252_v57 = vsel %vm982_vm3, %v1180_v49, %v1181_v50  ;;  %v911_v60 = vsel %vm2191_vm5, %v815_v29, 0.0  ;;  %v954_v61 = vmul.f32 %v1554_v25, %v937_v42  ;;  %v955_v18 = vmul.f32 %v1554_v25, %v2130_v10 }
 0x23f   : > { %v2257_v63 = vsel %vm935_vm2, 0.0, %v926_v56  ;;  %v945_v8 = vsel %vm935_vm2, %v926_v56, 0.0  ;;  %v923_v9 = vrot.slane %v911_v60, 7 }
 0x240   : > { %v972_v19 = vmul.f32 %v2111_v3, %v2257_v63  ;;  %v973_v20 = vmul.f32 %v2111_v3, %v945_v8  ;;  %v1014_v16 = vmul.f32 %v2116_v4, %v2257_v63  ;;  %v1015_v52 = vmul.f32 %v2116_v4, %v945_v8 }
 0x241   : > { %v1067_v42 = vmul.f32 %v2121_v6, %v2257_v63  ;;  %v1068_v23 = vmul.f32 %v2121_v6, %v945_v8  ;;  %v1108_v17 = vmul.f32 %v2126_v7, %v2257_v63  ;;  %v1109_v24 = vmul.f32 %v2126_v7, %v945_v8 }
 0x242   : > { %v992_v31 = vrot.slane %v972_v19, 1  ;;  %v993_v13 = vrot.slane %v973_v20, 1  ;;  %v1034_v32 = vrot.slane %v1014_v16, 2  ;;  %v1035_v33 = vrot.slane %v1015_v52, 2 }
 0x243   : > { %v1085_v34 = vrot.slane %v1067_v42, 1  ;;  %v1086_v39 = vrot.slane %v1068_v23, 1  ;;  %v1126_v43 = vrot.slane %v1108_v17, 2  ;;  %v1127_v49 = vrot.slane %v1109_v24, 2 }
 0x244   : > { %v2280_v6 = vsel %vm1024_vm4, %v1221_v55, %v1222_v59  ;;  %v994_v50 = vsel %vm982_vm3, %v992_v31, %v993_v13  ;;  %v1036_v7 = vsel %vm1024_vm4, %v1034_v32, %v1035_v33  ;;  %v2285_v14 = vmul.f32 %v2149_v26, %v945_v8 }
 0x245   : > { %v1087_v56 = vsel %vm982_vm3, %v1085_v34, %v1086_v39  ;;  %v2289_v60 = vmul.f32 %v2154_v27, %v945_v8  ;;  %v936_v19 = vsel %vm935_vm2, 0.0, %v923_v9  ;;  %v942_v20 = vsel %vm935_vm2, %v923_v9, 0.0 }
 0x246   : > { %v1128_v16 = vsel %vm1024_vm4, %v1126_v43, %v1127_v49  ;;  %v1178_v55 = vrot.slane %v2285_v14, 1  ;;  %v953_v59 = vmul.f32 %v1554_v25, %v936_v19  ;;  %v956_v52 = vmul.f32 %v1554_v25, %v2257_v63 }
 0x247   : > { %v966_v42 = vmul.f32 %v2111_v3, %v936_v19  ;;  %v967_v23 = vmul.f32 %v2111_v3, %v942_v20  ;;  %v1000_v17 = vadd.f32 %v2206_v12, %v954_v61  ;;  %v1001_v8 = vadd.f32 %v2157_v35, %v955_v18  ;;  %v1560_v61 = vld [vmem:[%s2398_s7 + $0x6] ss:$0 sm:$0xff] }
 0x248   : > { %v1002_v24 = vadd.f32 %v994_v50, %v956_v52  ;;  %v1008_v31 = vmul.f32 %v2116_v4, %v936_v19  ;;  %v1009_v9 = vmul.f32 %v2116_v4, %v942_v20  ;;  %v1052_v13 = vmul.f32 %v2168_v38, %v2257_v63 }
 0x249   : > { %v983_v32 = vrot.slane %v966_v42, 1  ;;  %v984_v33 = vrot.slane %v967_v23, 1  ;;  %v1042_v25 = vadd.f32 %v2209_v15, %v1000_v17  ;;  %v1043_v34 = vadd.f32 %v2172_v40, %v1001_v8 }
 0x24a   : > { %v1025_v39 = vrot.slane %v1008_v31, 2  ;;  %v1026_v3 = vrot.slane %v1009_v9, 2  ;;  %v904_v12 = vadd.f32 %v2100_v58, %v2203_v11  ;;  %v1044_v35 = vadd.f32 %v1036_v7, %v1002_v24 }
 0x24b   : > { %v985_v4 = vsel %vm982_vm3, %v983_v32, %v984_v33  ;;  %v1055_v38 = vadd.f32 %v2201_v62, %v1042_v25  ;;  %v1056_v18 = vadd.f32 %v1052_v13, %v1043_v34  ;;  %v1131_v15 = vsel %vm1024_vm4, %v1129_v47, %v1130_v54 }
 0x24c   : > { %v999_v40 = vadd.f32 %v985_v4, %v953_v59  ;;  %v1027_v43 = vsel %vm1024_vm4, %v1025_v39, %v1026_v3  ;;  %v916_v58 = vsel %vm2275_vm6, %v904_v12, 0.0  ;;  %v1057_v11 = vadd.f32 %v2244_v46, %v1044_v35 }
 0x24d   : > { %v928_v49 = vrot.slane %v916_v58, 7  ;;  %v1096_v50 = vadd.f32 %v2175_v41, %v1055_v38  ;;  %v1097_v7 = vadd.f32 %v1087_v56, %v1056_v18  ;;  %v1145_v19 = vmul.f32 %v1560_v61, %v2130_v10 }
 0x24e   : > { %v1041_v62 = vadd.f32 %v1027_v43, %v999_v40  ;;  %v1098_v20 = vadd.f32 %v2248_v53, %v1057_v11  ;;  %v1146_v30 = vmul.f32 %v1560_v61, %v2257_v63  ;;  %v1147_v47 = vmul.f32 %v1560_v61, %v2215_v22 }
 0x24f   : > { %v941_v54 = vsel %vm935_vm2, 0.0, %v928_v49  ;;  %v947_v29 = vsel %vm935_vm2, %v928_v49, 0.0  ;;  %v1137_v59 = vadd.f32 %v2180_v44, %v1096_v50  ;;  %v1138_v46 = vadd.f32 %v1128_v16, %v1097_v7 }
 0x250   : > { %v1054_v52 = vadd.f32 %v2189_v51, %v1041_v62  ;;  %v1139_v41 = vadd.f32 %v1131_v15, %v1098_v20  ;;  %v1148_v56 = vmul.f32 %v1560_v61, %v941_v54  ;;  %v1164_v42 = vmul.f32 %v2149_v26, %v941_v54 }
 0x251   : > { %v1150_v23 = vadd.f32 %v1146_v30, %v1137_v59  ;;  %v1151_v17 = vadd.f32 %v1147_v47, %v1138_v46  ;;  %v1165_v53 = vmul.f32 %v2149_v26, %v947_v29  ;;  %v1205_v8 = vmul.f32 %v2154_v27, %v941_v54 }
 0x252   : > { %v1095_v22 = vadd.f32 %v2212_v21, %v1054_v52  ;;  %v1152_v24 = vadd.f32 %v1148_v56, %v1139_v41  ;;  %v1183_v31 = vrot.slane %v1164_v42, 1  ;;  %v1206_v9 = vmul.f32 %v2154_v27, %v947_v29 }
 0x253   : > { %v1184_v44 = vrot.slane %v1165_v53, 1  ;;  %v1224_v16 = vrot.slane %v1205_v8, 2  ;;  %v1158_v51 = vmul.f32 %v2149_v26, %v2130_v10  ;;  %v1199_v13 = vmul.f32 %v2154_v27, %v2130_v10  ;;  %v1563_v10 = vld [vmem:[%s2399_s8] ss:$0 sm:$0xff] }
 0x254   : > { %v1225_v32 = vrot.slane %v1206_v9, 2  ;;  %v1136_v33 = vadd.f32 %v2220_v28, %v1095_v22  ;;  %v1160_v25 = vmul.f32 %v2149_v26, %v2257_v63  ;;  %v1201_v21 = vmul.f32 %v2154_v27, %v2257_v63 }
 0x255   : > { %v1185_v34 = vsel %vm982_vm3, %v1183_v31, %v1184_v44  ;;  %v1174_v39 = vrot.slane %v1158_v51, 1  ;;  %v1215_v3 = vrot.slane %v1199_v13, 2  ;;  %v1192_v12 = vadd.f32 %v2252_v57, %v1151_v17 }
 0x256   : > { %v1219_v35 = vrot.slane %v2289_v60, 2  ;;  %v1193_v61 = vadd.f32 %v1185_v34, %v1152_v24  ;;  %v1149_v4 = vadd.f32 %v1145_v19, %v1136_v33  ;;  %v1177_v28 = vrot.slane %v1160_v25, 1 }
 0x257   : > { %v1226_v26 = vsel %vm1024_vm4, %v1224_v16, %v1225_v32  ;;  %v1176_v27 = vsel %vm982_vm3, %v1174_v39, %v1175_v45  ;;  %v1218_v63 = vrot.slane %v1201_v21, 2  ;;  %v1233_v38 = vadd.f32 %v2280_v6, %v1192_v12  ;;  %v1564_v39 = vld [vmem:[%s2401_s10] ss:$0 sm:$0xff] }
 0x258   : > { %v1234_v18 = vadd.f32 %v1226_v26, %v1193_v61  ;;  %v1190_v57 = vadd.f32 %v1176_v27, %v1149_v4  ;;  %v1179_v60 = vsel %vm982_vm3, %v1177_v28, %v1178_v55  ;;  %v1217_v15 = vsel %vm1024_vm4, %v1215_v3, %v1216_v48 }
 0x259   : > { %v1191_v40 = vadd.f32 %v1179_v60, %v1150_v23  ;;  %v1244_v43 = vadd.f32 %v1563_v10, %v1233_v38  ;;  %v1220_v36 = vsel %vm1024_vm4, %v1218_v63, %v1219_v35 }
 0x25a   : > { %v1231_v58 = vadd.f32 %v1217_v15, %v1190_v57  ;;  %v1245_v11 = vadd.f32 %v1563_v10, %v1234_v18 }
 0x25b   : > { %v1232_v45 = vadd.f32 %v1220_v36, %v1191_v40  ;;  %v1248_v49 = vmul.f32 %v1244_v43, %v1244_v43 }
 0x25c   : > { %v1242_v50 = vadd.f32 %v1563_v10, %v1231_v58  ;;  %v1249_v6 = vmul.f32 %v1245_v11, %v1245_v11 }
 0x25d   : > { %v1243_v7 = vadd.f32 %v1563_v10, %v1232_v45  ;;  %v1252_v19 = vmul.f32 %v1248_v49, %v1244_v43 }
 0x25e   : > { %v1246_v62 = vmul.f32 %v1242_v50, %v1242_v50  ;;  %v1253_v14 = vmul.f32 %v1249_v6, %v1245_v11 }
 0x25f   : > { %v1247_v20 = vmul.f32 %v1243_v7, %v1243_v7  ;;  %v1256_v55 = vmul.f32 0.044715, %v1252_v19 }
 0x260   : > { %v1250_v30 = vmul.f32 %v1246_v62, %v1242_v50  ;;  %v1257_v37 = vmul.f32 0.044715, %v1253_v14 }
 0x261   : > { %v1251_v47 = vmul.f32 %v1247_v20, %v1243_v7  ;;  %v1260_v48 = vadd.f32 %v1256_v55, %v1244_v43 }
 0x262   : > { %v1254_v54 = vmul.f32 0.044715, %v1250_v30  ;;  %v1261_v29 = vadd.f32 %v1257_v37, %v1245_v11 }
 0x263   : > { %v1255_v59 = vmul.f32 0.044715, %v1251_v47  ;;  %v1264_v46 = vmul.f32 0.7978846, %v1260_v48 }
 0x264   : > { %v1258_v52 = vadd.f32 %v1254_v54, %v1242_v50  ;;  %v1265_v41 = vmul.f32 0.7978846, %v1261_v29 }
 0x265   : > { %v1259_v56 = vadd.f32 %v1255_v59, %v1243_v7  ;;  %1786 = vtanh.f32 %v1264_v46 }
 0x266   : > { %v1262_v42 = vmul.f32 0.7978846, %v1258_v52  ;;  %1788 = vtanh.f32 %v1265_v41 }
 0x267   : > { %v1263_v23 = vmul.f32 0.7978846, %v1259_v56 }
 0x268   : > { %1790 = vtanh.f32 %v1262_v42 }
 0x269   : > { %1792 = vtanh.f32 %v1263_v23 }
 0x26f   : > { %v1787_v17 = vpop.eup %1786 }
 0x270   : > { %v1789_v53 = vpop.eup %1788  ;;  %v1272_v8 = vadd.f32 1.0, %v1787_v17 }
 0x271   : > { %v1273_v44 = vadd.f32 1.0, %v1789_v53 }
 0x272   : > { %v1791_v22 = vpop.eup %1790  ;;  %v1276_v51 = vmul.f32 0.5, %v1272_v8 }
 0x273   : > { %v1793_v24 = vpop.eup %1792  ;;  %v1270_v31 = vadd.f32 1.0, %v1791_v22  ;;  %v1277_v25 = vmul.f32 0.5, %v1273_v44 }
 0x274   : > { %v1271_v9 = vadd.f32 1.0, %v1793_v24  ;;  %v1280_v21 = vmul.f32 %v1276_v51, %v1244_v43 }
 0x275   : > { %v1274_v16 = vmul.f32 0.5, %v1270_v31  ;;  %v1281_v34 = vmul.f32 %v1277_v25, %v1245_v11 }
 0x276   : > { %v1275_v13 = vmul.f32 0.5, %v1271_v9 }
 0x277   : > { %v1278_v32 = vmul.f32 %v1274_v16, %v1242_v50 }
 0x278   : > { %v1279_v33 = vmul.f32 %v1275_v13, %v1243_v7 }
 0x279   : > { %1673 = vmatprep.mubr.f32.mxu1 %v1278_v32 }
 0x27a   : > { %1674 = vmatmul.mubr.f32.vlgmr.msra.gmra.mrb[0].mxu1 %v1279_v33 }
 0x27b   : > { %1676 = vmatprep.mubr.f32.mxu1 %v1280_v21 }
 0x27e   : > { %1677 = vmatmul.mubr.f32.gmra.mrb[2].mxu1 %v1281_v34 }
 0x34d   : > { %v1675_v3 = vpop.f32.mrb[0].mxu1 }
 0x34e   : > { %v1377_v12 = vadd.f32 %v1675_v3, %v1564_v39  ;;  %v1371_v35 = vpop.f32.mrb[1].mxu1 }
 0x34f   : > { %v1372_v61 = vadd.f32 %v1564_v39, %v1371_v35 }
 0x350   : > { %v1391_v4 = vadd.f32 %v1377_v12, %v1945_v2 }
 0x351   : > { %v1390_v10 = vadd.f32 %v1372_v61, %v1941_v0  ;;  %v1678_v28 = vpop.f32.mrb[2].mxu1 }
 0x352   : > { %1395 = vst.msk [vmem:[%s538_s1 + $0x8] sm:$0xff] %vm544_vm0, %v1391_v4  ;;  %v1387_v26 = vadd.f32 %v1678_v28, %v1564_v39  ;;  %v1381_v27 = vpop.f32.mrb[3].mxu1 }
 0x353   : > { %1394 = vst.msk [vmem:[%s538_s1] sm:$0xff] %vm544_vm0, %v1390_v10  ;;  %v1382_v63 = vadd.f32 %v1564_v39, %v1381_v27 }
 0x354   : > { %v1393_v38 = vadd.f32 %v1387_v26, %v1951_v5 }
 0x355   : > { %v1392_v18 = vadd.f32 %v1382_v63, %v1943_v1 }
 0x356   : > { %1397 = vst.msk [vmem:[%s538_s1 + $0x18] sm:$0xff] %vm544_vm0, %v1393_v38 }
 0x357   : > { %1396 = vst.msk [vmem:[%s538_s1 + $0x10] sm:$0xff] %vm544_vm0, %v1392_v18 }
 0x358 PF: > { %s21_s21 = sadd.s32 1, %s1832_s21   ;;  %s2410_s29 = sld [smem:[#allocation2_spill]] }
 0x359   : > { %p18_p13 = scmp.ge.s32.totalorder %s21_s21, 6   ;;  %s2411_s17 = smov %s1824_s19 }
 0x35a   : > { %s2412_s18 = smov %s1828_s20  ;;  %s2413_s19 = smov %s2416_s22 }
 0x35b   :  { %20 = sbr.rel (!%p18_p13) target bundleno = 3 (0x3), region = 101 }
 0x35e   : > { %s2414_s20 = smov %s2410_s29 }

// kernel: block_forward.4
= control target key start
LH: loop header
LB: loop body
LE: loop exit
PB: predicated region body
PF: predicated region fallthrough
CT: control target
= control target key end

     0   :  { %s3375_s21 = smov 0   ;;  %s3377_s22 = smov 0   ;;  %s4201_s0 = inlined_call_operand.vmem [shape: f32[2,64,32], index: 0, kind: input, shape index: {}]   ;;  %s4202_s1 = inlined_call_operand.vmem [shape: f32[2,64,32], index: 1, kind: input, shape index: {}]   ;;  %s4203_s2 = inlined_call_operand.vmem [shape: f32[2,64,32], index: 2, kind: input, shape index: {}]   ;;  %s4204_s3 = inlined_call_operand.vmem [shape: f32[2,64,32], index: 3, kind: input, shape index: {}]   ;;  %s4205_s4 = inlined_call_operand.vmem [shape: f32[32,32], index: 4, kind: input, shape index: {}]   ;;  %s4206_s5 = inlined_call_operand.vmem [shape: f32[1,32], index: 5, kind: input, shape index: {}]   ;;  %s4207_s6 = inlined_call_operand.vmem [shape: f32[2,64,32], index: 6, kind: output, shape index: {}]  }
   0x1   :  { %4208 = sst [smem:[#allocation8_spill]] %s4201_s0  ;;  %s3379_s23 = smov 0  }
   0x2   :  { %s3381_s24 = smov 0   ;;  %s3383_s25 = smov 0  }
   0x3   :  { %s3385_s26 = smov 0   ;;  %s3387_s27 = smov 0  }
   0x4 LB: > { %s28_s28 = sadd.s32 1, %s3319_s24  ;;  %s31_s29 = sadd.s32 1, %s3323_s25  ;;  %s3331_s27 = sphi %s3387_s27, %s16_s27   ;;  %s3327_s26 = sphi %s3385_s26, %s4239_s26   ;;  %s3323_s25 = sphi %s3383_s25, %s4238_s25   ;;  %s3319_s24 = sphi %s3381_s24, %s4237_s24   ;;  %s3315_s23 = sphi %s3379_s23, %s4236_s23   ;;  %s3311_s22 = sphi %s3377_s22, %s4235_s22   ;;  %s3307_s21 = sphi %s3375_s21, %s4234_s21  }
   0x5   : > { %p29_p0 = scmp.ge.s32.totalorder %s28_s28, 2  ;;  %p2645_p1 = scmp.ge.s32.totalorder %s3331_s27, 1 }
   0x6   : > { %p291_p2 = scmp.lt.s32.totalorder %s3331_s27, 9  ;;  %s35_s30 = sadd.s32 1, %s3327_s26 }
   0x7   : > { %s4241_s28 = smov (%p29_p0, %s28_s28), 0  ;;  %s4243_s29 = smov (!%p29_p0, %s31_s29), %s3323_s25 }
   0x8   : > { %p292_p3 = pnand %p2645_p1, %p291_p2  ;;  %p33_p4 = scmp.ge.s32.totalorder %s4243_s29, 2 }
   0xa   : > { %s4245_s29 = smov (%p33_p4, %s4243_s29), 0  ;;  %s4247_s30 = smov (!%p33_p4, %s35_s30), %s3327_s26 }
   0xb   : > { %p37_p5 = scmp.ge.s32.totalorder %s4247_s30, 2  ;;  %295 = sbr.rel (%p292_p3) target bundleno = 2667 (0xa6b), region = 44 }
   0xd   : > { %s4249_s30 = smov (%p37_p5, %s4247_s30), 0 }
   0xe   : > { %4209 = sst [smem:[#allocation5_spill]] %s4249_s30 }
  0x12   : > { %s2646_s7 = sshll.u32 %s3311_s22, 2  ;;  %p357_p6 = scmp.lt.s32.totalorder %s3315_s23, 1 }
  0x13   : > { %p359_p7 = scmp.lt.s32.totalorder %s2646_s7, 7  ;;  %s2649_s8 = sshll.u32 %s3307_s21, 2 }
  0x14   : > { %s4251_s23 = smov (!%p357_p6, %s3315_s23), 1  ;;  %p369_p8 = scmp.lt.s32.totalorder %s2649_s8, 7 }
  0x15   : > { %s4253_s7 = smov (!%p359_p7, %s2646_s7), 7  ;;  %s2647_s9 = sshll.u32 %s4251_s23, 3 }
  0x16   : > { %s362_s10 = sadd.s32 %s2647_s9, %s4253_s7  ;;  %s4210_s0 = sld [smem:[#allocation8_spill]] }
  0x17   : > { %s2648_s11 = sshll.u32 %s362_s10, 3  ;;  %s4255_s8 = smov (!%p369_p8, %s2649_s8), 7 }
  0x18   : > { %s3428_s17 = scalar_lea.vmem %s4204_s3, %s2648_s11  ;;  %s3433_s20 = scalar_lea.vmem %s4207_s6, %s2648_s11 }
  0x19   : > { %s372_s22 = sadd.s32 %s2647_s9, %s4255_s8  ;;  %p2661_p9 = scmp.ne.s32.totalorder %s3307_s21, 0 }
  0x1a   : > { %s2651_s23 = sshll.u32 %s372_s22, 3  ;;  %vm410_vm0 = vcmask (!%p2661_p9), 7168   ;;  %vm443_vm1 = vcmask (!%p2661_p9), 64512   ;;  %v3333_v0 = vmov (!%p2661_p9), -inf   ;;  %v3334_v1 = vmov (!%p2661_p9), 0.0  }
  0x1b   : > { %s3438_s30 = scalar_lea.vmem %s4202_s1, %s2651_s23  ;;  %409 = sbr.rel (%p2661_p9) target bundleno = 51 (0x33), region = 48  ;;  %411 = vst.msk [vmem:[#allocation2] sm:$0xff] (!%p2661_p9), %vm410_vm0, %v3333_v0  ;;  %412 = vst.msk [vmem:[#allocation2 + $0x8] sm:$0xff] (!%p2661_p9), %vm410_vm0, %v3333_v0 }
  0x1c   : > { %s3423_s14 = scalar_lea.vmem %s4210_s0, %s2648_s11  ;;  %s3443_s0 = scalar_lea.vmem %s4203_s2, %s2651_s23  ;;  %413 = vst.msk [vmem:[#allocation2 + $0x10] sm:$0xff] (!%p2661_p9), %vm410_vm0, %v3333_v0  ;;  %414 = vst.msk [vmem:[#allocation2 + $0x18] sm:$0xff] (!%p2661_p9), %vm410_vm0, %v3333_v0 }
  0x1d   : > { %415 = vst.msk [vmem:[#allocation2 + $0x20] sm:$0xff] (!%p2661_p9), %vm410_vm0, %v3333_v0  ;;  %416 = vst.msk [vmem:[#allocation2 + $0x28] sm:$0xff] (!%p2661_p9), %vm410_vm0, %v3333_v0 }
  0x1e   : > { %417 = vst.msk [vmem:[#allocation2 + $0x30] sm:$0xff] (!%p2661_p9), %vm410_vm0, %v3333_v0  ;;  %418 = vst.msk [vmem:[#allocation2 + $0x38] sm:$0xff] (!%p2661_p9), %vm410_vm0, %v3333_v0 }
  0x1f   : > { %419 = vst.msk [vmem:[#allocation2 + $0x40] sm:$0xff] (!%p2661_p9), %vm410_vm0, %v3333_v0  ;;  %420 = vst.msk [vmem:[#allocation2 + $0x48] sm:$0xff] (!%p2661_p9), %vm410_vm0, %v3333_v0 }
  0x20   : > { %421 = vst.msk [vmem:[#allocation2 + $0x50] sm:$0xff] (!%p2661_p9), %vm410_vm0, %v3333_v0  ;;  %422 = vst.msk [vmem:[#allocation2 + $0x58] sm:$0xff] (!%p2661_p9), %vm410_vm0, %v3333_v0 }
  0x21   : > { %423 = vst.msk [vmem:[#allocation2 + $0x60] sm:$0xff] (!%p2661_p9), %vm410_vm0, %v3333_v0  ;;  %424 = vst.msk [vmem:[#allocation2 + $0x68] sm:$0xff] (!%p2661_p9), %vm410_vm0, %v3333_v0 }
  0x22   : > { %425 = vst.msk [vmem:[#allocation2 + $0x70] sm:$0xff] %vm410_vm0, %v3333_v0  ;;  %426 = vst.msk [vmem:[#allocation2 + $0x78] sm:$0xff] %vm410_vm0, %v3333_v0 }
  0x23   : > { %427 = vst.msk [vmem:[#allocation3] sm:$0xff] %vm410_vm0, %v3334_v1  ;;  %428 = vst.msk [vmem:[#allocation3 + $0x8] sm:$0xff] %vm410_vm0, %v3334_v1 }
  0x24   : > { %429 = vst.msk [vmem:[#allocation3 + $0x10] sm:$0xff] %vm410_vm0, %v3334_v1  ;;  %430 = vst.msk [vmem:[#allocation3 + $0x18] sm:$0xff] %vm410_vm0, %v3334_v1 }
  0x25   : > { %431 = vst.msk [vmem:[#allocation3 + $0x20] sm:$0xff] %vm410_vm0, %v3334_v1  ;;  %432 = vst.msk [vmem:[#allocation3 + $0x28] sm:$0xff] %vm410_vm0, %v3334_v1 }
  0x26   : > { %433 = vst.msk [vmem:[#allocation3 + $0x30] sm:$0xff] %vm410_vm0, %v3334_v1  ;;  %434 = vst.msk [vmem:[#allocation3 + $0x38] sm:$0xff] %vm410_vm0, %v3334_v1 }
  0x27   : > { %435 = vst.msk [vmem:[#allocation3 + $0x40] sm:$0xff] %vm410_vm0, %v3334_v1  ;;  %436 = vst.msk [vmem:[#allocation3 + $0x48] sm:$0xff] %vm410_vm0, %v3334_v1 }
  0x28   : > { %437 = vst.msk [vmem:[#allocation3 + $0x50] sm:$0xff] %vm410_vm0, %v3334_v1  ;;  %438 = vst.msk [vmem:[#allocation3 + $0x58] sm:$0xff] %vm410_vm0, %v3334_v1 }
  0x29   : > { %439 = vst.msk [vmem:[#allocation3 + $0x60] sm:$0xff] %vm410_vm0, %v3334_v1  ;;  %440 = vst.msk [vmem:[#allocation3 + $0x68] sm:$0xff] %vm410_vm0, %v3334_v1 }
  0x2a   : > { %441 = vst.msk [vmem:[#allocation3 + $0x70] sm:$0xff] %vm410_vm0, %v3334_v1  ;;  %442 = vst.msk [vmem:[#allocation3 + $0x78] sm:$0xff] %vm410_vm0, %v3334_v1 }
  0x2b   : > { %444 = vst.msk [vmem:[#allocation4] sm:$0xff] %vm443_vm1, %v3334_v1  ;;  %445 = vst.msk [vmem:[#allocation4 + $0x8] sm:$0xff] %vm443_vm1, %v3334_v1 }
  0x2c   : > { %446 = vst.msk [vmem:[#allocation4 + $0x10] sm:$0xff] %vm443_vm1, %v3334_v1  ;;  %447 = vst.msk [vmem:[#allocation4 + $0x18] sm:$0xff] %vm443_vm1, %v3334_v1 }
  0x2d   : > { %448 = vst.msk [vmem:[#allocation4 + $0x20] sm:$0xff] %vm443_vm1, %v3334_v1  ;;  %449 = vst.msk [vmem:[#allocation4 + $0x28] sm:$0xff] %vm443_vm1, %v3334_v1 }
  0x2e   : > { %450 = vst.msk [vmem:[#allocation4 + $0x30] sm:$0xff] %vm443_vm1, %v3334_v1  ;;  %451 = vst.msk [vmem:[#allocation4 + $0x38] sm:$0xff] %vm443_vm1, %v3334_v1 }
  0x2f   : > { %452 = vst.msk [vmem:[#allocation4 + $0x40] sm:$0xff] %vm443_vm1, %v3334_v1  ;;  %453 = vst.msk [vmem:[#allocation4 + $0x48] sm:$0xff] %vm443_vm1, %v3334_v1 }
  0x30   : > { %454 = vst.msk [vmem:[#allocation4 + $0x50] sm:$0xff] %vm443_vm1, %v3334_v1  ;;  %455 = vst.msk [vmem:[#allocation4 + $0x58] sm:$0xff] %vm443_vm1, %v3334_v1 }
  0x31   : > { %456 = vst.msk [vmem:[#allocation4 + $0x60] sm:$0xff] %vm443_vm1, %v3334_v1  ;;  %457 = vst.msk [vmem:[#allocation4 + $0x68] sm:$0xff] %vm443_vm1, %v3334_v1 }
  0x32   : > { %458 = vst.msk [vmem:[#allocation4 + $0x70] sm:$0xff] %vm443_vm1, %v3334_v1  ;;  %459 = vst.msk [vmem:[#allocation4 + $0x78] sm:$0xff] %vm443_vm1, %v3334_v1 }
  0x33 PF: > { %v3495_v2 = vld [vmem:[%s3438_s30] sm:$0xff]  ;;  %v3498_v3 = vld [vmem:[%s3438_s30 + $0x8] sm:$0xff]  ;;  %vm472_vm2 = vcmask 64512   ;;  %v3501_v4 = vld [vmem:[%s3438_s30 + $0x10] sm:$0xff]  ;;  %vm590_vm4 = vcmask 261120   ;;  %v3335_v25 = vmov 0  }
  0x34   : > { %v2958_v5 = vpack.c.bf16 %v3498_v3, %v3495_v2  ;;  %vm3507_vm3 = vmpackc.low %vm472_vm2, %vm472_vm2  ;;  %v3512_v7 = vld [vmem:[%s3438_s30 + $0x18] sm:$0xff]  ;;  %v3515_v8 = vld [vmem:[%s3423_s14] sm:$0xff]  ;;  %3117 = vset.pattern.permute.xlu0 %v3335_v25  ;;  %3118 = vset.pattern.permute.xlu1 %v3335_v25  ;;  %vm675_vm5 = vcmask 7168   ;;  %s3336_s30 = smov 120   ;;  %v3620_v48 = vpack.i.bf16 %v3498_v3, %v3495_v2  ;;  %s3338_s8 = smov 104  }
  0x35   : > { %v2964_v9 = vpack.c.bf16 %v3512_v7, %v3501_v4  ;;  %2822 = vmatprep.mubr.msk.f32.mxu0 %vm472_vm2, %v3515_v8  ;;  %v3530_v10 = vld [vmem:[%s3423_s14 + $0x8] sm:$0xff]  ;;  %v3533_v11 = vld [vmem:[%s3423_s14 + $0x10] sm:$0xff]  ;;  %v3540_v12 = vld [vmem:[%s3423_s14 + $0x18] sm:$0xff]  ;;  %v3626_v49 = vpack.i.bf16 %v3512_v7, %v3501_v4  ;;  %p2710_p10 = scmp.ne.s32.totalorder %s3307_s21, 1 }
  0x36   : > { %2960 = vmatprep.subr.msk.bf16.mxu0 %vm3507_vm3, %v2958_v5  ;;  %v3560_v26 = vld [vmem:[#allocation2] sm:$0xff]  ;;  %v3565_v29 = vld [vmem:[#allocation2 + $0x8] sm:$0xff]  ;;  %v3567_v30 = vld [vmem:[#allocation2 + $0x10] sm:$0xff] }
  0x37   : > { %2963 = vmatpush3.bf16.xpose.msk.msra.mxu0 %vm3507_vm3, %v2958_v5  ;;  %v3580_v36 = vld [vmem:[#allocation2 + $0x18] sm:$0xff]  ;;  %v3594_v39 = vld [vmem:[%s3443_s0] sm:$0xff]  ;;  %v3597_v40 = vld [vmem:[%s3443_s0 + $0x8] sm:$0xff] }
  0x38   : > { %2966 = vmatprep.subr.msk.bf16.mxu0 %vm3507_vm3, %v2964_v9  ;;  %v2970_v42 = vpack.c.bf16 %v3597_v40, %v3594_v39  ;;  %v3610_v45 = vld [vmem:[%s3443_s0 + $0x10] sm:$0xff]  ;;  %v3613_v46 = vld [vmem:[%s3443_s0 + $0x18] sm:$0xff]  ;;  %s3337_s0 = smov 112  }
  0x39   : > { %v2974_v47 = vpack.c.bf16 %v3613_v46, %v3610_v45 }
  0x3a   : > { %2971 = vmatprep.subr.bf16.mxu1 %v2970_v42 }
  0x3b   : > { %2973 = vmatpush3.bf16.msra.mxu1 %v2970_v42 }
  0x3c   : > { %2975 = vmatprep.subr.bf16.mxu1 %v2974_v47 }
  0x3f   : > { %2969 = vmatpush3.bf16.xpose.msk.msra.mxu0 %vm3507_vm3, %v2964_v9  ;;  %2977 = vmatpush3.bf16.msra.mxu1 %v2974_v47 }
  0x46   : > { %2823 = vmatmul.mubr.msk.f32.vlgmr.msra.gmra.mrb[0].mxu0 %vm472_vm2, %v3530_v10 }
  0x47   : > { %2825 = vmatprep.mubr.msk.f32.mxu0 %vm472_vm2, %v3533_v11 }
  0x4a   : > { %2826 = vmatmul.mubr.msk.f32.gmra.mrb[2].mxu0 %vm472_vm2, %v3540_v12 }
 0x119   : > { %v2824_v13 = vpop.f32.mrb[0].mxu0 }
 0x11a   : > { %v563_v14 = vpop.f32.mrb[1].mxu0  ;;  %v3546_v16 = vmul.f32 0.35355338, %v2824_v13 }
 0x11b   : > { %v3544_v15 = vmul.f32 0.35355338, %v563_v14 }
 0x11c   : > { %v594_v22 = vsel %vm590_vm4, %v3546_v16, -inf }
 0x11d   : > { %v2827_v17 = vpop.f32.mrb[2].mxu0  ;;  %v591_v18 = vsel %vm590_vm4, %v3544_v15, -inf }
 0x11e   : > { %592 = vmax.xlane.f32.xlu0 %v591_v18  ;;  %v573_v19 = vpop.f32.mrb[3].mxu0  ;;  %v3550_v20 = vmul.f32 0.35355338, %v2827_v17 }
 0x11f   : > { %v3552_v21 = vmul.f32 0.35355338, %v573_v19 }
 0x120   : > { %v600_v24 = vsel %vm590_vm4, %v3550_v20, -inf }
 0x121   : > { %v597_v23 = vsel %vm590_vm4, %v3552_v21, -inf }
 0x122   : > { %595 = vmax.xlane.f32.xlu0 %v594_v22  ;;  %598 = vmax.xlane.f32.xlu1 %v597_v23 }
 0x126   : > { %601 = vmax.xlane.f32.xlu1 %v600_v24 }
 0x1ab   : > { %v593_v27 = vpop.xlane.xlu0 %592 }
 0x1ac   : > { %v3563_v28 = vmax.f32 %v3560_v26, %v593_v27 }
 0x1ae   : > { %813 = vst.msk [vmem:[#allocation2] sm:$0xff] %vm675_vm5, %v3563_v28  ;;  %621 = vperm.xlu0 %3117, %v3563_v28  }
 0x1af   : > { %v596_v32 = vpop.xlane.xlu0 %595  ;;  %v599_v33 = vpop.xlane.xlu1 %598 }
 0x1b0   : > { %v3575_v34 = vmax.f32 %v3565_v29, %v596_v32  ;;  %v3578_v35 = vmax.f32 %v3567_v30, %v599_v33 }
 0x1b2   : > { %814 = vst.msk [vmem:[#allocation2 + $0x8] sm:$0xff] %vm675_vm5, %v3575_v34  ;;  %815 = vst.msk [vmem:[#allocation2 + $0x10] sm:$0xff] %vm675_vm5, %v3578_v35  ;;  %626 = vperm.xlu1 %3118, %v3575_v34   ;;  %823 = vrot.lane.b32.xlu0 %v3540_v12, %s3336_s30 }
 0x1b3   : > { %v602_v41 = vpop.xlane.xlu1 %601 }
 0x1b4   : > { %v3602_v43 = vmax.f32 %v3580_v36, %v602_v41 }
 0x1b6   : > { %816 = vst.msk [vmem:[#allocation2 + $0x18] sm:$0xff] %vm675_vm5, %v3602_v43  ;;  %631 = vperm.xlu1 %3118, %v3578_v35  }
 0x1ba   : > { %636 = vperm.xlu1 %3118, %v3602_v43  }
 0x1be   : > { %3120 = vrot.lane.b32.xlu1 %v3620_v48, %s3336_s30 }
 0x1c2   : > { %3125 = vrot.lane.b32.xlu1 %v3626_v49, %s3336_s30 }
 0x1c6   : > { %817 = vrot.lane.b32.xlu1 %v3515_v8, %s3336_s30 }
 0x1ca   : > { %819 = vrot.lane.b32.xlu1 %v3530_v10, %s3336_s30 }
 0x1ce   : > { %821 = vrot.lane.b32.xlu1 %v3533_v11, %s3336_s30 }
 0x22d   : > { %v622_v50 = vpop.permute.xlu0 %621 }
 0x22e   : > { %v639_v51 = vsub.f32 %v3544_v15, %v622_v50 }
 0x230   : > { %v643_v52 = vmul.f32 1.442695, %v639_v51 }
 0x231   : > { %v627_v53 = vpop.permute.xlu1 %626  ;;  %v824_v18 = vpop.permute.xlu0 %823 }
 0x232   : > { %3179 = vpow2.f32 %v643_v52  ;;  %v640_v54 = vsub.f32 %v3546_v16, %v627_v53  ;;  %v3683_v53 = vld [vmem:[#allocation2 + $0x28] sm:$0xff] }
 0x234   : > { %v645_v55 = vmul.f32 1.442695, %v640_v54  ;;  %v3685_v54 = vld [vmem:[#allocation2 + $0x20] sm:$0xff] }
 0x235   : > { %v632_v56 = vpop.permute.xlu1 %631 }
 0x236   : > { %3181 = vpow2.f32 %v645_v55  ;;  %v641_v57 = vsub.f32 %v3552_v21, %v632_v56 }
 0x238   : > { %v647_v58 = vmul.f32 1.442695, %v641_v57 }
 0x239   : > { %v637_v59 = vpop.permute.xlu1 %636 }
 0x23a   : > { %3183 = vpow2.f32 %v647_v58  ;;  %v642_v60 = vsub.f32 %v3550_v20, %v637_v59 }
 0x23c   : > { %v3640_v61 = vpop.eup %3179  ;;  %v649_v62 = vmul.f32 1.442695, %v642_v60  ;;  %v3698_v60 = vld [vmem:[#allocation2 + $0x30] sm:$0xff] }
 0x23d   : > { %2836 = vmatprep.mubr.msk.f32.mxu1 %vm590_vm4, %v3640_v61  ;;  %v3121_v63 = vpop.permute.xlu1 %3120 }
 0x23e   : > { %3185 = vpow2.f32 %v649_v62  ;;  %v3123_v0 = vunpack.i.h.bf16 %v3121_v63  ;;  %v3122_v1 = vunpack.i.l.bf16 %v3121_v63  ;;  %v3700_v62 = vld [vmem:[#allocation2 + $0x38] sm:$0xff]  ;;  %v3704_v63 = vpack.i.bf16 %v3597_v40, %v3594_v39 }
 0x23f   : > { %v3721_v39 = vpack.i.bf16 %v3613_v46, %v3610_v45 }
 0x240   : > { %v3644_v2 = vpop.eup %3181  ;;  %v2978_v3 = vpack.c.bf16 %v3123_v0, %v3122_v1 }
 0x241   : > { %2837 = vmatmul.mubr.msk.f32.vlgmr.msra.gmra.mrb[0].mxu1 %vm590_vm4, %v3644_v2  ;;  %v3126_v4 = vpop.permute.xlu1 %3125 }
 0x242   : > { %2980 = vmatprep.subr.msk.bf16.mxu1 %vm3507_vm3, %v2978_v3  ;;  %v3128_v5 = vunpack.i.h.bf16 %v3126_v4  ;;  %v3127_v7 = vunpack.i.l.bf16 %v3126_v4 }
 0x243   : > { %2983 = vmatpush3.bf16.xpose.msk.msra.mxu1 %vm3507_vm3, %v2978_v3 }
 0x244   : > { %v3652_v9 = vpop.eup %3183  ;;  %v2984_v13 = vpack.c.bf16 %v3128_v5, %v3127_v7 }
 0x245   : > { %2839 = vmatprep.mubr.msk.f32.mxu1 %vm590_vm4, %v3652_v9  ;;  %v818_v14 = vpop.permute.xlu1 %817 }
 0x246   : > { %2986 = vmatprep.subr.msk.bf16.mxu1 %vm3507_vm3, %v2984_v13 }
 0x248   : > { %v3658_v15 = vpop.eup %3185 }
 0x249   : > { %2840 = vmatmul.mubr.msk.f32.gmra.mrb[2].mxu1 %vm590_vm4, %v3658_v15  ;;  %v820_v16 = vpop.permute.xlu1 %819 }
 0x24a   : > { %2850 = vmatprep.mubr.msk.f32.mxu1 %vm472_vm2, %v818_v14 }
 0x24b   : > { %2989 = vmatpush3.bf16.xpose.msk.msra.mxu1 %vm3507_vm3, %v2984_v13 }
 0x24d   : > { %v822_v17 = vpop.permute.xlu1 %821 }
 0x252   : > { %2851 = vmatmul.mubr.msk.f32.vlgmr.msra.gmra.mrb[4].mxu1 %vm472_vm2, %v820_v16 }
 0x253   : > { %2853 = vmatprep.mubr.msk.f32.mxu1 %vm472_vm2, %v822_v17 }
 0x256   : > { %2854 = vmatmul.mubr.msk.f32.gmra.mrb[6].mxu1 %vm472_vm2, %v824_v18 }
 0x314   : > { %v3668_v19 = vpop.f32.mrb[0].mxu1 }
 0x315   : > { %v3670_v20 = vpop.f32.mrb[1].mxu1 }
 0x31c   : > { %v3672_v21 = vpop.f32.mrb[2].mxu1 }
 0x31d   : > { %v3674_v22 = vpop.f32.mrb[3].mxu1 }
 0x325   : > { %v2852_v23 = vpop.f32.mrb[4].mxu1 }
 0x326   : > { %v935_v24 = vmul.f32 0.35355338, %v2852_v23  ;;  %v915_v25 = vpop.f32.mrb[5].mxu1 }
 0x327   : > { %v934_v27 = vmul.f32 0.35355338, %v915_v25 }
 0x328   : > { %v946_v32 = vsel %vm590_vm4, %v935_v24, -inf }
 0x329   : > { %947 = vmax.xlane.f32.xlu0 %v946_v32  ;;  %v2855_v33 = vpop.f32.mrb[6].mxu1  ;;  %v943_v41 = vsel %vm590_vm4, %v934_v27, -inf }
 0x32a   : > { %v3678_v42 = vmul.f32 0.35355338, %v2855_v33  ;;  %944 = vmax.xlane.f32.xlu1 %v943_v41  ;;  %v925_v47 = vpop.f32.mrb[7].mxu1 }
 0x32b   : > { %v936_v50 = vmul.f32 0.35355338, %v925_v47 }
 0x32c   : > { %v952_v51 = vsel %vm590_vm4, %v3678_v42, -inf }
 0x32d   : > { %v949_v52 = vsel %vm590_vm4, %v936_v50, -inf }
 0x32e   : > { %950 = vmax.xlane.f32.xlu0 %v949_v52  ;;  %953 = vmax.xlane.f32.xlu1 %v952_v51 }
 0x3b6   : > { %v948_v55 = vpop.xlane.xlu0 %947 }
 0x3b7   : > { %v3688_v56 = vmax.f32 %v3683_v53, %v948_v55  ;;  %v945_v57 = vpop.xlane.xlu1 %944 }
 0x3b8   : > { %v3691_v58 = vmax.f32 %v3685_v54, %v945_v57 }
 0x3b9   : > { %1183 = vst.msk [vmem:[#allocation2 + $0x28] sm:$0xff] %vm675_vm5, %v3688_v56  ;;  %978 = vperm.xlu1 %3118, %v3688_v56  }
 0x3ba   : > { %1182 = vst.msk [vmem:[#allocation2 + $0x20] sm:$0xff] %vm675_vm5, %v3691_v58  ;;  %973 = vperm.xlu0 %3117, %v3691_v58  }
 0x3bb   : > { %v951_v1 = vpop.xlane.xlu0 %950  ;;  %v954_v3 = vpop.xlane.xlu1 %953 }
 0x3bc   : > { %v3712_v4 = vmax.f32 %v3698_v60, %v951_v1  ;;  %v3715_v5 = vmax.f32 %v3700_v62, %v954_v3 }
 0x3bd   : > { %3130 = vrot.lane.b32.xlu1 %v3704_v63, %s3336_s30 }
 0x3be   : > { %1184 = vst.msk [vmem:[#allocation2 + $0x30] sm:$0xff] %vm675_vm5, %v3712_v4  ;;  %983 = vperm.xlu0 %3117, %v3712_v4   ;;  %1185 = vst.msk [vmem:[#allocation2 + $0x38] sm:$0xff] %vm675_vm5, %v3715_v5 }
 0x3c1   : > { %3135 = vrot.lane.b32.xlu1 %v3721_v39, %s3336_s30 }
 0x3c2   : > { %988 = vperm.xlu0 %3117, %v3715_v5  }
 0x3c5   : > { %3140 = vrot.lane.b32.xlu1 %v3620_v48, %s3337_s0 }
 0x3c6   : > { %3145 = vrot.lane.b32.xlu0 %v3626_v49, %s3337_s0 }
 0x3c9   : > { %1186 = vrot.lane.b32.xlu1 %v3515_v8, %s3337_s0 }
 0x3ca   : > { %1188 = vrot.lane.b32.xlu0 %v3530_v10, %s3337_s0 }
 0x3cd   : > { %1190 = vrot.lane.b32.xlu1 %v3533_v11, %s3337_s0 }
 0x3ce   : > { %1192 = vrot.lane.b32.xlu0 %v3540_v12, %s3337_s0 }
 0x438   : > { %v979_v45 = vpop.permute.xlu1 %978 }
 0x439   : > { %v992_v46 = vsub.f32 %v935_v24, %v979_v45  ;;  %v974_v13 = vpop.permute.xlu0 %973 }
 0x43a   : > { %v991_v14 = vsub.f32 %v934_v27, %v974_v13 }
 0x43b   : > { %v997_v16 = vmul.f32 1.442695, %v992_v46 }
 0x43c   : > { %v995_v17 = vmul.f32 1.442695, %v991_v14  ;;  %v3131_v18 = vpop.permute.xlu1 %3130 }
 0x43d   : > { %v3133_v23 = vunpack.i.h.bf16 %v3131_v18  ;;  %v3132_v25 = vunpack.i.l.bf16 %v3131_v18  ;;  %v984_v32 = vpop.permute.xlu0 %983 }
 0x43e   : > { %3187 = vpow2.f32 %v995_v17  ;;  %v993_v33 = vsub.f32 %v936_v50, %v984_v32 }
 0x43f   : > { %3189 = vpow2.f32 %v997_v16  ;;  %v2990_v41 = vpack.c.bf16 %v3133_v23, %v3132_v25 }
 0x440   : > { %v999_v47 = vmul.f32 1.442695, %v993_v33  ;;  %v3136_v51 = vpop.permute.xlu1 %3135 }
 0x441   : > { %v3138_v52 = vunpack.i.h.bf16 %v3136_v51  ;;  %v3137_v55 = vunpack.i.l.bf16 %v3136_v51  ;;  %2991 = vmatprep.subr.bf16.mxu0 %v2990_v41  ;;  %v989_v57 = vpop.permute.xlu0 %988 }
 0x442   : > { %3191 = vpow2.f32 %v999_v47  ;;  %v994_v24 = vsub.f32 %v3678_v42, %v989_v57  ;;  %2993 = vmatpush3.bf16.msra.mxu0 %v2990_v41 }
 0x443   : > { %v2994_v27 = vpack.c.bf16 %v3138_v52, %v3137_v55 }
 0x444   : > { %v1001_v1 = vmul.f32 1.442695, %v994_v24  ;;  %v3141_v3 = vpop.permute.xlu1 %3140 }
 0x445   : > { %2995 = vmatprep.subr.bf16.mxu0 %v2994_v27  ;;  %v3143_v45 = vunpack.i.h.bf16 %v3141_v3  ;;  %v3142_v46 = vunpack.i.l.bf16 %v3141_v3  ;;  %v3146_v13 = vpop.permute.xlu0 %3145 }
 0x446   : > { %3193 = vpow2.f32 %v1001_v1  ;;  %2997 = vmatpush3.bf16.msra.mxu0 %v2994_v27  ;;  %v3148_v16 = vunpack.i.h.bf16 %v3146_v13  ;;  %v3147_v17 = vunpack.i.l.bf16 %v3146_v13 }
 0x447   : > { %v2998_v50 = vpack.c.bf16 %v3143_v45, %v3142_v46 }
 0x448   : > { %v3748_v14 = vpop.eup %3187  ;;  %v3004_v23 = vpack.c.bf16 %v3148_v16, %v3147_v17  ;;  %v1187_v25 = vpop.permute.xlu1 %1186 }
 0x449   : > { %v3750_v18 = vpop.eup %3189  ;;  %2864 = vmatprep.mubr.msk.f32.mxu0 %vm590_vm4, %v3748_v14  ;;  %3000 = vmatprep.subr.msk.bf16.mxu0 %vm3507_vm3, %v2998_v50  ;;  %v1189_v33 = vpop.permute.xlu0 %1188 }
 0x44a   : > { %2865 = vmatmul.mubr.msk.f32.vlgmr.msra.gmra.mrb[4].mxu0 %vm590_vm4, %v3750_v18 }
 0x44c   : > { %v3758_v42 = vpop.eup %3191  ;;  %v1191_v41 = vpop.permute.xlu1 %1190 }
 0x44d   : > { %2867 = vmatprep.mubr.msk.f32.mxu0 %vm590_vm4, %v3758_v42  ;;  %v1193_v47 = vpop.permute.xlu0 %1192 }
 0x44f   : > { %3003 = vmatpush3.bf16.xpose.msk.msra.mxu0 %vm3507_vm3, %v2998_v50 }
 0x450   : > { %v3764_v32 = vpop.eup %3193  ;;  %3006 = vmatprep.subr.msk.bf16.mxu0 %vm3507_vm3, %v3004_v23 }
 0x451   : > { %2868 = vmatmul.mubr.msk.f32.gmra.mrb[6].mxu0 %vm590_vm4, %v3764_v32 }
 0x452   : > { %2878 = vmatprep.mubr.msk.f32.mxu0 %vm472_vm2, %v1187_v25 }
 0x457   : > { %3009 = vmatpush3.bf16.xpose.msk.msra.mxu0 %vm3507_vm3, %v3004_v23 }
 0x45e   : > { %2879 = vmatmul.mubr.msk.f32.vlgmr.msra.gmra.mrb[8].mxu0 %vm472_vm2, %v1189_v33  ;;  %v3791_v33 = vld [vmem:[#allocation2 + $0x48] sm:$0xff] }
 0x45f   : > { %2881 = vmatprep.mubr.msk.f32.mxu0 %vm472_vm2, %v1191_v41  ;;  %v3793_v41 = vld [vmem:[#allocation2 + $0x40] sm:$0xff] }
 0x462   : > { %2882 = vmatmul.mubr.msk.f32.gmra.mrb[10].mxu0 %vm472_vm2, %v1193_v47 }
 0x51d   : > { %v3776_v51 = vpop.f32.mrb[4].mxu0 }
 0x51e   : > { %v3778_v52 = vpop.f32.mrb[5].mxu0 }
 0x524   : > { %v3780_v55 = vpop.f32.mrb[6].mxu0 }
 0x525   : > { %v3782_v57 = vpop.f32.mrb[7].mxu0 }
 0x531   : > { %v2880_v24 = vpop.f32.mrb[8].mxu0 }
 0x532   : > { %v1304_v27 = vmul.f32 0.35355338, %v2880_v24  ;;  %v1284_v1 = vpop.f32.mrb[9].mxu0 }
 0x533   : > { %v1303_v3 = vmul.f32 0.35355338, %v1284_v1 }
 0x534   : > { %v1315_v45 = vsel %vm590_vm4, %v1304_v27, -inf }
 0x535   : > { %1316 = vmax.xlane.f32.xlu0 %v1315_v45  ;;  %v2883_v46 = vpop.f32.mrb[10].mxu0  ;;  %v1312_v13 = vsel %vm590_vm4, %v1303_v3, -inf }
 0x536   : > { %v3786_v50 = vmul.f32 0.35355338, %v2883_v46  ;;  %1313 = vmax.xlane.f32.xlu1 %v1312_v13  ;;  %v1294_v16 = vpop.f32.mrb[11].mxu0  ;;  %v3806_v13 = vld [vmem:[#allocation2 + $0x50] sm:$0xff] }
 0x537   : > { %v1305_v17 = vmul.f32 0.35355338, %v1294_v16  ;;  %v3808_v16 = vld [vmem:[#allocation2 + $0x58] sm:$0xff] }
 0x538   : > { %v1321_v23 = vsel %vm590_vm4, %v3786_v50, -inf }
 0x539   : > { %v1318_v25 = vsel %vm590_vm4, %v1305_v17, -inf }
 0x53a   : > { %1319 = vmax.xlane.f32.xlu0 %v1318_v25  ;;  %1322 = vmax.xlane.f32.xlu1 %v1321_v23 }
 0x5c2   : > { %v1317_v47 = vpop.xlane.xlu0 %1316 }
 0x5c3   : > { %v3796_v24 = vmax.f32 %v3791_v33, %v1317_v47  ;;  %v1314_v1 = vpop.xlane.xlu1 %1313 }
 0x5c4   : > { %v3799_v45 = vmax.f32 %v3793_v41, %v1314_v1 }
 0x5c5   : > { %1548 = vst.msk [vmem:[#allocation2 + $0x48] sm:$0xff] %vm675_vm5, %v3796_v24  ;;  %1347 = vperm.xlu1 %3118, %v3796_v24  }
 0x5c6   : > { %1547 = vst.msk [vmem:[#allocation2 + $0x40] sm:$0xff] %vm675_vm5, %v3799_v45  ;;  %1342 = vperm.xlu0 %3117, %v3799_v45  }
 0x5c7   : > { %v1320_v25 = vpop.xlane.xlu0 %1319  ;;  %v1323_v47 = vpop.xlane.xlu1 %1322 }
 0x5c8   : > { %v3816_v1 = vmax.f32 %v3806_v13, %v1320_v25  ;;  %v3819_v46 = vmax.f32 %v3808_v16, %v1323_v47 }
 0x5c9   : > { %3150 = vrot.lane.b32.xlu1 %v3704_v63, %s3337_s0 }
 0x5ca   : > { %1549 = vst.msk [vmem:[#allocation2 + $0x50] sm:$0xff] %vm675_vm5, %v3816_v1  ;;  %1352 = vperm.xlu0 %3117, %v3816_v1   ;;  %1550 = vst.msk [vmem:[#allocation2 + $0x58] sm:$0xff] %vm675_vm5, %v3819_v46 }
 0x5cd   : > { %3155 = vrot.lane.b32.xlu1 %v3721_v39, %s3337_s0 }
 0x5ce   : > { %1357 = vperm.xlu0 %3117, %v3819_v46  }
 0x5d1   : > { %3160 = vrot.lane.b32.xlu1 %v3620_v48, %s3338_s8 }
 0x5d2   : > { %3165 = vrot.lane.b32.xlu0 %v3626_v49, %s3338_s8 }
 0x5d5   : > { %1551 = vrot.lane.b32.xlu1 %v3515_v8, %s3338_s8 }
 0x5d6   : > { %1553 = vrot.lane.b32.xlu0 %v3530_v10, %s3338_s8 }
 0x5d9   : > { %1555 = vrot.lane.b32.xlu1 %v3533_v11, %s3338_s8 }
 0x5da   : > { %1557 = vrot.lane.b32.xlu0 %v3540_v12, %s3338_s8 }
 0x644   : > { %v1348_v25 = vpop.permute.xlu1 %1347 }
 0x645   : > { %v1361_v47 = vsub.f32 %v1304_v27, %v1348_v25  ;;  %v1343_v23 = vpop.permute.xlu0 %1342 }
 0x646   : > { %v1360_v7 = vsub.f32 %v1303_v3, %v1343_v23 }
 0x647   : > { %v1366_v48 = vmul.f32 1.442695, %v1361_v47 }
 0x648   : > { %v1364_v40 = vmul.f32 1.442695, %v1360_v7  ;;  %v3151_v0 = vpop.permute.xlu1 %3150 }
 0x649   : > { %v3153_v49 = vunpack.i.h.bf16 %v3151_v0  ;;  %v3152_v59 = vunpack.i.l.bf16 %v3151_v0  ;;  %v1353_v44 = vpop.permute.xlu0 %1352 }
 0x64a   : > { %3195 = vpow2.f32 %v1364_v40  ;;  %v1362_v8 = vsub.f32 %v1305_v17, %v1353_v44 }
 0x64b   : > { %3197 = vpow2.f32 %v1366_v48  ;;  %v3010_v10 = vpack.c.bf16 %v3153_v49, %v3152_v59 }
 0x64c   : > { %v1368_v38 = vmul.f32 1.442695, %v1362_v8  ;;  %v3156_v37 = vpop.permute.xlu1 %3155 }
 0x64d   : > { %v3158_v11 = vunpack.i.h.bf16 %v3156_v37  ;;  %v3157_v31 = vunpack.i.l.bf16 %v3156_v37  ;;  %3011 = vmatprep.subr.bf16.mxu1 %v3010_v10  ;;  %v1358_v12 = vpop.permute.xlu0 %1357 }
 0x64e   : > { %3199 = vpow2.f32 %v1368_v38  ;;  %v1363_v27 = vsub.f32 %v3786_v50, %v1358_v12  ;;  %3013 = vmatpush3.bf16.msra.mxu1 %v3010_v10 }
 0x64f   : > { %v3014_v3 = vpack.c.bf16 %v3158_v11, %v3157_v31 }
 0x650   : > { %v1370_v7 = vmul.f32 1.442695, %v1363_v27  ;;  %v3161_v23 = vpop.permute.xlu1 %3160 }
 0x651   : > { %3015 = vmatprep.subr.bf16.mxu1 %v3014_v3  ;;  %v3163_v0 = vunpack.i.h.bf16 %v3161_v23  ;;  %v3162_v25 = vunpack.i.l.bf16 %v3161_v23  ;;  %v3166_v40 = vpop.permute.xlu0 %3165 }
 0x652   : > { %3201 = vpow2.f32 %v1370_v7  ;;  %3017 = vmatpush3.bf16.msra.mxu1 %v3014_v3  ;;  %v3168_v17 = vunpack.i.h.bf16 %v3166_v40  ;;  %v3167_v37 = vunpack.i.l.bf16 %v3166_v40 }
 0x653   : > { %v3018_v44 = vpack.c.bf16 %v3163_v0, %v3162_v25 }
 0x654   : > { %v3848_v59 = vpop.eup %3195  ;;  %v3024_v38 = vpack.c.bf16 %v3168_v17, %v3167_v37  ;;  %v1552_v50 = vpop.permute.xlu1 %1551 }
 0x655   : > { %v3850_v47 = vpop.eup %3197  ;;  %2892 = vmatprep.mubr.msk.f32.mxu1 %vm590_vm4, %v3848_v59  ;;  %3020 = vmatprep.subr.msk.bf16.mxu1 %vm3507_vm3, %v3018_v44  ;;  %v1554_v49 = vpop.permute.xlu0 %1553 }
 0x656   : > { %2893 = vmatmul.mubr.msk.f32.vlgmr.msra.gmra.mrb[8].mxu1 %vm590_vm4, %v3850_v47 }
 0x658   : > { %v3858_v31 = vpop.eup %3199  ;;  %v1556_v8 = vpop.permute.xlu1 %1555 }
 0x659   : > { %2895 = vmatprep.mubr.msk.f32.mxu1 %vm590_vm4, %v3858_v31  ;;  %v1558_v10 = vpop.permute.xlu0 %1557 }
 0x65b   : > { %3023 = vmatpush3.bf16.xpose.msk.msra.mxu1 %vm3507_vm3, %v3018_v44 }
 0x65c   : > { %v3864_v48 = vpop.eup %3201  ;;  %3026 = vmatprep.subr.msk.bf16.mxu1 %vm3507_vm3, %v3024_v38 }
 0x65d   : > { %2896 = vmatmul.mubr.msk.f32.gmra.mrb[10].mxu1 %vm590_vm4, %v3864_v48 }
 0x65e   : > { %2906 = vmatprep.mubr.msk.f32.mxu1 %vm472_vm2, %v1552_v50 }
 0x663   : > { %3029 = vmatpush3.bf16.xpose.msk.msra.mxu1 %vm3507_vm3, %v3024_v38 }
 0x66a   : > { %2907 = vmatmul.mubr.msk.f32.vlgmr.msra.gmra.mrb[12].mxu1 %vm472_vm2, %v1554_v49 }
 0x66b   : > { %2909 = vmatprep.mubr.msk.f32.mxu1 %vm472_vm2, %v1556_v8  ;;  %v3900_v8 = vld [vmem:[#allocation2 + $0x68] sm:$0xff] }
 0x66e   : > { %2910 = vmatmul.mubr.msk.f32.gmra.mrb[14].mxu1 %vm472_vm2, %v1558_v10  ;;  %v3902_v10 = vld [vmem:[#allocation2 + $0x60] sm:$0xff] }
 0x729   : > { %v3876_v11 = vpop.f32.mrb[8].mxu1 }
 0x72a   : > { %v3878_v12 = vpop.f32.mrb[9].mxu1 }
 0x730   : > { %v3880_v27 = vpop.f32.mrb[10].mxu1 }
 0x731   : > { %4213 = vst [vmem:[#allocation6_spill] sm:$0xff] %v3880_v27  ;;  %v3882_v3 = vpop.f32.mrb[11].mxu1 }
 0x732   : > { %4214 = vst [vmem:[#allocation7_spill] sm:$0xff] %v3882_v3  ;;  %v1015_v3 = vsel %vm590_vm4, %v3750_v18, 0.0  ;;  %v1381_v18 = vsel %vm590_vm4, %v3848_v59, 0.0  ;;  %v4218_v59 = vsub.f32 %v3580_v36, %v3602_v43 }
 0x73d   : > { %v2908_v7 = vpop.f32.mrb[12].mxu1 }
 0x73e   : > { %v3884_v6 = vmul.f32 0.35355338, %v2908_v7  ;;  %v1649_v23 = vpop.f32.mrb[13].mxu1 }
 0x73f   : > { %v3886_v0 = vmul.f32 0.35355338, %v1649_v23 }
 0x740   : > { %v1680_v25 = vsel %vm590_vm4, %v3884_v6, -inf }
 0x741   : > { %1681 = vmax.xlane.f32.xlu0 %v1680_v25  ;;  %v2911_v40 = vpop.f32.mrb[14].mxu1  ;;  %v1677_v44 = vsel %vm590_vm4, %v3886_v0, -inf }
 0x742   : > { %v3892_v17 = vmul.f32 0.35355338, %v2911_v40  ;;  %1678 = vmax.xlane.f32.xlu1 %v1677_v44  ;;  %v1659_v37 = vpop.f32.mrb[15].mxu1 }
 0x743   : > { %v3894_v38 = vmul.f32 0.35355338, %v1659_v37  ;;  %v3915_v37 = vld [vmem:[#allocation2 + $0x78] sm:$0xff] }
 0x744   : > { %v1686_v50 = vsel %vm590_vm4, %v3892_v17, -inf }
 0x745   : > { %v1683_v49 = vsel %vm590_vm4, %v3894_v38, -inf }
 0x746   : > { %1687 = vmax.xlane.f32.xlu1 %v1686_v50  ;;  %1684 = vmax.xlane.f32.xlu0 %v1683_v49  ;;  %v3917_v50 = vld [vmem:[#allocation2 + $0x70] sm:$0xff]  ;;  %v659_v49 = vsel %vm590_vm4, %v3640_v61, 0.0  ;;  %v1384_v61 = vsel %vm590_vm4, %v3850_v47, 0.0 }
 0x7ce   : > { %v1682_v7 = vpop.xlane.xlu0 %1681 }
 0x7cf   : > { %v3905_v23 = vmax.f32 %v3900_v8, %v1682_v7  ;;  %v1679_v25 = vpop.xlane.xlu1 %1678 }
 0x7d0   : > { %v3908_v40 = vmax.f32 %v3902_v10, %v1679_v25 }
 0x7d1   : > { %1913 = vst.msk [vmem:[#allocation2 + $0x68] sm:$0xff] %vm675_vm5, %v3905_v23  ;;  %1712 = vperm.xlu1 %3118, %v3905_v23  }
 0x7d2   : > { %1912 = vst.msk [vmem:[#allocation2 + $0x60] sm:$0xff] %vm675_vm5, %v3908_v40  ;;  %1707 = vperm.xlu0 %3117, %v3908_v40  }
 0x7d3   : > { %v1688_v7 = vpop.xlane.xlu1 %1687  ;;  %v1685_v25 = vpop.xlane.xlu0 %1684 }
 0x7d4   : > { %v3925_v44 = vmax.f32 %v3915_v37, %v1688_v7  ;;  %v3928_v27 = vmax.f32 %v3917_v50, %v1685_v25  ;;  %v662_v7 = vsel %vm590_vm4, %v3644_v2, 0.0  ;;  %v665_v25 = vsel %vm590_vm4, %v3652_v9, 0.0 }
 0x7d5   : > { %v1018_v2 = vsel %vm590_vm4, %v3758_v42, 0.0  ;;  %v1012_v9 = vsel %vm590_vm4, %v3748_v14, 0.0  ;;  %v1390_v14 = vsel %vm590_vm4, %v3864_v48, 0.0  ;;  %v4215_v42 = vsub.f32 %v3560_v26, %v3563_v28 }
 0x7d6   : > { %1915 = vst.msk [vmem:[#allocation2 + $0x78] sm:$0xff] %vm675_vm5, %v3925_v44  ;;  %1914 = vst.msk [vmem:[#allocation2 + $0x70] sm:$0xff] %vm675_vm5, %v3928_v27  ;;  %1722 = vperm.xlu0 %3117, %v3925_v44   ;;  %1717 = vperm.xlu1 %3118, %v3928_v27   ;;  %v4219_v48 = vsub.f32 %v3683_v53, %v3688_v56  ;;  %v4220_v28 = vsub.f32 %v3685_v54, %v3691_v58 }
 0x7d7   : > { %v611_v47 = vmul.f32 1.442695, %v4215_v42  ;;  %v4223_v53 = vsub.f32 %v3791_v33, %v3796_v24  ;;  %v4224_v56 = vsub.f32 %v3793_v41, %v3799_v45  ;;  %v4226_v41 = vsub.f32 %v3808_v16, %v3819_v46 }
 0x7d8   : > { %v965_v26 = vmul.f32 1.442695, %v4219_v48  ;;  %v4228_v46 = vsub.f32 %v3902_v10, %v3908_v40 }
 0x7d9   : > { %3203 = vpow2.f32 %v611_v47  ;;  %v1334_v54 = vmul.f32 1.442695, %v4223_v53  ;;  %v1332_v58 = vmul.f32 1.442695, %v4224_v56  ;;  %v1338_v45 = vmul.f32 1.442695, %v4226_v41 }
 0x7da   : > { %3175 = vrot.lane.b32.xlu0 %v3721_v39, %s3338_s8  ;;  %3170 = vrot.lane.b32.xlu1 %v3704_v63, %s3338_s8  ;;  %v668_v39 = vsel %vm590_vm4, %v3658_v15, 0.0  ;;  %v1021_v63 = vsel %vm590_vm4, %v3764_v32, 0.0  ;;  %v1387_v15 = vsel %vm590_vm4, %v3858_v31, 0.0  ;;  %v4216_v32 = vsub.f32 %v3565_v29, %v3575_v34 }
 0x7db   : > { %v4217_v31 = vsub.f32 %v3567_v30, %v3578_v35  ;;  %v963_v29 = vmul.f32 1.442695, %v4220_v28  ;;  %v4221_v30 = vsub.f32 %v3698_v60, %v3712_v4  ;;  %v4222_v35 = vsub.f32 %v3700_v62, %v3715_v5 }
 0x7dc   : > { %v4225_v4 = vsub.f32 %v3806_v13, %v3816_v1  ;;  %v4227_v13 = vsub.f32 %v3900_v8, %v3905_v23  ;;  %v1697_v16 = vmul.f32 1.442695, %v4228_v46  ;;  %v4229_v8 = vsub.f32 %v3915_v37, %v3925_v44 }
 0x7dd   : > { %v967_v34 = vmul.f32 1.442695, %v4221_v30  ;;  %v969_v36 = vmul.f32 1.442695, %v4222_v35 }
 0x7de   : > { %v1336_v5 = vmul.f32 1.442695, %v4225_v4  ;;  %v1699_v1 = vmul.f32 1.442695, %v4227_v13  ;;  %v1703_v23 = vmul.f32 1.442695, %v4229_v8 }
 0x7df   : > { %v652_v13 = vld [vmem:[#allocation3 + $0x8] sm:$0xff] }
 0x7e3   : > { %v3992_v43 = vpop.eup %3203 }
 0x7f9   : > { %663 = vadd.xlane.f32.xlu0 %v662_v7  ;;  %v617_v7 = vmul.f32 1.442695, %v4218_v59 }
 0x7fd   : > { %666 = vadd.xlane.f32.xlu0 %v665_v25 }
 0x7fe   : > { %660 = vadd.xlane.f32.xlu1 %v659_v49  ;;  %v615_v49 = vmul.f32 1.442695, %v4217_v31 }
 0x801   : > { %1016 = vadd.xlane.f32.xlu0 %v1015_v3  ;;  %v613_v3 = vmul.f32 1.442695, %v4216_v32 }
 0x802   : > { %669 = vadd.xlane.f32.xlu1 %v668_v39 }
 0x803   : > { %3205 = vpow2.f32 %v613_v3 }
 0x804   : > { %3207 = vpow2.f32 %v615_v49 }
 0x805   : > { %1019 = vadd.xlane.f32.xlu0 %v1018_v2  ;;  %3209 = vpow2.f32 %v617_v7 }
 0x806   : > { %1013 = vadd.xlane.f32.xlu1 %v1012_v9  ;;  %3211 = vpow2.f32 %v965_v26 }
 0x807   : > { %3213 = vpow2.f32 %v963_v29 }
 0x808   : > { %3215 = vpow2.f32 %v967_v34 }
 0x809   : > { %1385 = vadd.xlane.f32.xlu0 %v1384_v61  ;;  %3217 = vpow2.f32 %v969_v36 }
 0x80a   : > { %1022 = vadd.xlane.f32.xlu1 %v1021_v63  ;;  %3219 = vpow2.f32 %v1334_v54 }
 0x80b   : > { %3221 = vpow2.f32 %v1332_v58 }
 0x80c   : > { %3223 = vpow2.f32 %v1336_v5  ;;  %v4230_v5 = vsub.f32 %v3917_v50, %v3928_v27  ;;  %v1005_v50 = vld [vmem:[#allocation3 + $0x28] sm:$0xff] }
 0x80d   : > { %1388 = vadd.xlane.f32.xlu0 %v1387_v15  ;;  %v3994_v25 = vpop.eup %3205  ;;  %3225 = vpow2.f32 %v1338_v45 }
 0x80e   : > { %1382 = vadd.xlane.f32.xlu1 %v1381_v18  ;;  %v4004_v60 = vpop.eup %3207  ;;  %3227 = vpow2.f32 %v1699_v1  ;;  %v1701_v41 = vmul.f32 1.442695, %v4230_v5  ;;  %v656_v1 = vmul.f32 %v3994_v25, %v652_v13 }
 0x80f   : > { %v4006_v62 = vpop.eup %3209  ;;  %3229 = vpow2.f32 %v1697_v16  ;;  %v653_v16 = vld [vmem:[#allocation3 + $0x10] sm:$0xff] }
 0x810   : > { %v4013_v33 = vpop.eup %3211  ;;  %3231 = vpow2.f32 %v1703_v23  ;;  %v651_v23 = vld [vmem:[#allocation3] sm:$0xff] }
 0x811   : > { %v4015_v24 = vpop.eup %3213  ;;  %v655_v27 = vmul.f32 %v3992_v43, %v651_v23  ;;  %v683_v23 = vld [vmem:[#allocation4 + $0x18] sm:$0xff] }
 0x812   : > { %1391 = vadd.xlane.f32.xlu1 %v1390_v14  ;;  %v4022_v39 = vpop.eup %3215 }
 0x813   : > { %v4024_v2 = vpop.eup %3217 }
 0x814   : > { %v4031_v9 = vpop.eup %3219 }
 0x815   : > { %v4033_v61 = vpop.eup %3221 }
 0x816   : > { %v4040_v63 = vpop.eup %3223 }
 0x817   : > { %v4046_v15 = vpop.eup %3225 }
 0x818   : > { %v4049_v18 = vpop.eup %3227 }
 0x819   : > { %v4052_v10 = vpop.eup %3229 }
 0x81a   : > { %v4055_v40 = vpop.eup %3231 }
 0x823   : > { %686 = vperm.xlu0 %3117, %v3992_v43   ;;  %691 = vperm.xlu1 %3118, %v3994_v25   ;;  %v1009_v25 = vmul.f32 %v4013_v33, %v1005_v50 }
 0x827   : > { %701 = vperm.xlu0 %3117, %v4006_v62   ;;  %696 = vperm.xlu1 %3118, %v4004_v60  }
 0x82b   : > { %1039 = vperm.xlu0 %3117, %v4015_v24   ;;  %1044 = vperm.xlu1 %3118, %v4013_v33   ;;  %v1374_v33 = vld [vmem:[#allocation3 + $0x48] sm:$0xff] }
 0x82f   : > { %1054 = vperm.xlu0 %3117, %v4024_v2   ;;  %1049 = vperm.xlu1 %3118, %v4022_v39  }
 0x833   : > { %1408 = vperm.xlu0 %3117, %v4033_v61   ;;  %1413 = vperm.xlu1 %3118, %v4031_v9  }
 0x837   : > { %1418 = vperm.xlu0 %3117, %v4040_v63  }
 0x83b   : > { %1423 = vperm.xlu0 %3117, %v4046_v15  }
 0x83f   : > { %1778 = vperm.xlu0 %3117, %v4049_v18  }
 0x843   : > { %1773 = vperm.xlu0 %3117, %v4052_v10  }
 0x847   : > { %1788 = vperm.xlu0 %3117, %v4055_v40  }
 0x850   : > { %v1713_v14 = vpop.permute.xlu1 %1712 }
 0x851   : > { %v1726_v44 = vsub.f32 %v3884_v6, %v1713_v14  ;;  %v1708_v37 = vpop.permute.xlu0 %1707  ;;  %v657_v14 = vmul.f32 %v4004_v60, %v653_v16 }
 0x852   : > { %v1725_v42 = vsub.f32 %v3886_v0, %v1708_v37 }
 0x853   : > { %v1731_v47 = vmul.f32 1.442695, %v1726_v44 }
 0x854   : > { %v1729_v32 = vmul.f32 1.442695, %v1725_v42 }
 0x855   : > { %3233 = vpow2.f32 %v1731_v47  ;;  %v1718_v3 = vpop.permute.xlu1 %1717  ;;  %v1723_v31 = vpop.permute.xlu0 %1722  ;;  %v654_v47 = vld [vmem:[#allocation3 + $0x18] sm:$0xff] }
 0x856   : > { %3235 = vpow2.f32 %v1729_v32  ;;  %v1727_v49 = vsub.f32 %v3894_v38, %v1718_v3  ;;  %v1728_v59 = vsub.f32 %v3892_v17, %v1723_v31  ;;  %v658_v31 = vmul.f32 %v4006_v62, %v654_v47  ;;  %v1033_v47 = vld [vmem:[#allocation4 + $0x20] sm:$0xff] }
 0x857   : > { %v1378_v62 = vmul.f32 %v4031_v9, %v1374_v33 }
 0x858   : > { %v1733_v7 = vmul.f32 1.442695, %v1727_v49  ;;  %v1735_v48 = vmul.f32 1.442695, %v1728_v59  ;;  %v1006_v49 = vld [vmem:[#allocation3 + $0x30] sm:$0xff] }
 0x859   : > { %v3171_v26 = vpop.permute.xlu1 %3170  ;;  %v3176_v28 = vpop.permute.xlu0 %3175  ;;  %v1010_v43 = vmul.f32 %v4022_v39, %v1006_v49  ;;  %v1375_v39 = vld [vmem:[#allocation3 + $0x50] sm:$0xff] }
 0x85a   : > { %v3173_v29 = vunpack.i.h.bf16 %v3171_v26  ;;  %v3172_v30 = vunpack.i.l.bf16 %v3171_v26  ;;  %v3178_v6 = vunpack.i.h.bf16 %v3176_v28  ;;  %3237 = vpow2.f32 %v1735_v48 }
 0x85b   : > { %v3177_v34 = vunpack.i.l.bf16 %v3176_v28  ;;  %3239 = vpow2.f32 %v1733_v7  ;;  %v1004_v7 = vld [vmem:[#allocation3 + $0x20] sm:$0xff] }
 0x85c   : > { %v3030_v0 = vpack.c.bf16 %v3173_v29, %v3172_v30  ;;  %3241 = vpow2.f32 %v1701_v41  ;;  %v1008_v28 = vmul.f32 %v4015_v24, %v1004_v7  ;;  %v1379_v24 = vmul.f32 %v4040_v63, %v1375_v39  ;;  %v1035_v7 = vld [vmem:[#allocation4 + $0x30] sm:$0xff] }
 0x85d   : > { %v3034_v35 = vpack.c.bf16 %v3178_v6, %v3177_v34  ;;  %v1007_v6 = vld [vmem:[#allocation3 + $0x38] sm:$0xff] }
 0x85e   : > { %3031 = vmatprep.subr.bf16.mxu0 %v3030_v0 }
 0x85f   : > { %v3234_v36 = vpop.eup %3233  ;;  %3033 = vmatpush3.bf16.msra.mxu0 %v3030_v0 }
 0x860   : > { %v3236_v53 = vpop.eup %3235  ;;  %v1749_v38 = vsel %vm590_vm4, %v3234_v36, 0.0  ;;  %3035 = vmatprep.subr.bf16.mxu0 %v3034_v35 }
 0x861   : > { %1750 = vadd.xlane.f32.xlu1 %v1749_v38  ;;  %2920 = vmatprep.mubr.msk.f32.mxu0 %vm590_vm4, %v3236_v53  ;;  %v1746_v17 = vsel %vm590_vm4, %v3236_v53, 0.0  ;;  %v1373_v38 = vld [vmem:[#allocation3 + $0x40] sm:$0xff] }
 0x863   : > { %3037 = vmatpush3.bf16.msra.mxu0 %v3034_v35  ;;  %v1011_v35 = vmul.f32 %v4024_v2, %v1007_v6 }
 0x864   : > { %v3238_v54 = vpop.eup %3237 }
 0x865   : > { %1747 = vadd.xlane.f32.xlu1 %v1746_v17  ;;  %v3240_v56 = vpop.eup %3239  ;;  %v1755_v58 = vsel %vm590_vm4, %v3238_v54, 0.0 }
 0x866   : > { %2921 = vmatmul.mubr.msk.f32.vlgmr.msra.gmra.mrb[12].mxu0 %vm590_vm4, %v3234_v36  ;;  %v1752_v4 = vsel %vm590_vm4, %v3240_v56, 0.0  ;;  %v4073_v45 = vpop.eup %3241 }
 0x867   : > { %2923 = vmatprep.mubr.msk.f32.mxu0 %vm590_vm4, %v3240_v56  ;;  %v1377_v56 = vmul.f32 %v4033_v61, %v1373_v38 }
 0x869   : > { %1756 = vadd.xlane.f32.xlu1 %v1755_v58 }
 0x86a   : > { %2924 = vmatmul.mubr.msk.f32.gmra.mrb[14].mxu0 %vm590_vm4, %v3238_v54 }
 0x86d   : > { %1753 = vadd.xlane.f32.xlu1 %v1752_v4  ;;  %v1376_v4 = vld [vmem:[#allocation3 + $0x58] sm:$0xff] }
 0x86e   : > { %v1380_v2 = vmul.f32 %v4046_v15, %v1376_v4 }
 0x87e   : > { %1783 = vperm.xlu1 %3118, %v4073_v45  }
 0x886   : > { %v664_v46 = vpop.xlane.xlu0 %663 }
 0x887   : > { %v672_v8 = vadd.f32 %v664_v46, %v656_v1  ;;  %v680_v1 = vld [vmem:[#allocation4] sm:$0xff]  ;;  %v681_v46 = vld [vmem:[#allocation4 + $0x8] sm:$0xff] }
 0x889   : > { %677 = vst.msk [vmem:[#allocation3 + $0x8] sm:$0xff] %vm675_vm5, %v672_v8 }
 0x88a   : > { %v667_v44 = vpop.xlane.xlu0 %666 }
 0x88b   : > { %v673_v37 = vadd.f32 %v667_v44, %v657_v14  ;;  %v661_v42 = vpop.xlane.xlu1 %660  ;;  %v682_v44 = vld [vmem:[#allocation4 + $0x10] sm:$0xff] }
 0x88c   : > { %v671_v32 = vadd.f32 %v661_v42, %v655_v27 }
 0x88d   : > { %678 = vst.msk [vmem:[#allocation3 + $0x10] sm:$0xff] %vm675_vm5, %v673_v37 }
 0x88e   : > { %676 = vst.msk [vmem:[#allocation3] sm:$0xff] %vm675_vm5, %v671_v32  ;;  %v1017_v3 = vpop.xlane.xlu0 %1016 }
 0x88f   : > { %v1025_v59 = vadd.f32 %v1017_v3, %v1009_v25  ;;  %v670_v60 = vpop.xlane.xlu1 %669  ;;  %v1034_v25 = vld [vmem:[#allocation4 + $0x28] sm:$0xff] }
 0x890   : > { %v674_v48 = vadd.f32 %v670_v60, %v658_v31 }
 0x891   : > { %1029 = vst.msk [vmem:[#allocation3 + $0x28] sm:$0xff] %vm675_vm5, %v1025_v59  ;;  %v1036_v59 = vld [vmem:[#allocation4 + $0x38] sm:$0xff] }
 0x892   : > { %679 = vst.msk [vmem:[#allocation3 + $0x18] sm:$0xff] %vm675_vm5, %v674_v48  ;;  %v1020_v26 = vpop.xlane.xlu0 %1019 }
 0x893   : > { %v1026_v29 = vadd.f32 %v1020_v26, %v1010_v43  ;;  %v1014_v30 = vpop.xlane.xlu1 %1013 }
 0x894   : > { %v1024_v34 = vadd.f32 %v1014_v30, %v1008_v28  ;;  %v1402_v28 = vld [vmem:[#allocation4 + $0x40] sm:$0xff] }
 0x895   : > { %1030 = vst.msk [vmem:[#allocation3 + $0x30] sm:$0xff] %vm675_vm5, %v1026_v29  ;;  %v1403_v29 = vld [vmem:[#allocation4 + $0x48] sm:$0xff] }
 0x896   : > { %1028 = vst.msk [vmem:[#allocation3 + $0x20] sm:$0xff] %vm675_vm5, %v1024_v34  ;;  %v1386_v0 = vpop.xlane.xlu0 %1385 }
 0x897   : > { %v1394_v36 = vadd.f32 %v1386_v0, %v1378_v62  ;;  %v1023_v53 = vpop.xlane.xlu1 %1022  ;;  %v1404_v62 = vld [vmem:[#allocation4 + $0x50] sm:$0xff] }
 0x898   : > { %v1027_v17 = vadd.f32 %v1023_v53, %v1011_v35 }
 0x899   : > { %1398 = vst.msk [vmem:[#allocation3 + $0x48] sm:$0xff] %vm675_vm5, %v1394_v36  ;;  %v4231_v36 = vld [vmem:[#allocation7_spill] sm:$0xff] }
 0x89a   : > { %1031 = vst.msk [vmem:[#allocation3 + $0x38] sm:$0xff] %vm675_vm5, %v1027_v17  ;;  %v1389_v54 = vpop.xlane.xlu0 %1388 }
 0x89b   : > { %v1395_v9 = vadd.f32 %v1389_v54, %v1379_v24  ;;  %v1383_v58 = vpop.xlane.xlu1 %1382  ;;  %v4232_v24 = vld [vmem:[#allocation6_spill] sm:$0xff] }
 0x89c   : > { %v1393_v5 = vadd.f32 %v1383_v58, %v1377_v56 }
 0x89d   : > { %1399 = vst.msk [vmem:[#allocation3 + $0x50] sm:$0xff] %vm675_vm5, %v1395_v9  ;;  %v1738_v9 = vld [vmem:[#allocation3 + $0x60] sm:$0xff] }
 0x89e   : > { %1397 = vst.msk [vmem:[#allocation3 + $0x40] sm:$0xff] %vm675_vm5, %v1393_v5  ;;  %v1742_v4 = vmul.f32 %v4052_v10, %v1738_v9 }
 0x89f   : > { %v1392_v41 = vpop.xlane.xlu1 %1391 }
 0x8a0   : > { %v1396_v13 = vadd.f32 %v1392_v41, %v1380_v2  ;;  %v1741_v2 = vld [vmem:[#allocation3 + $0x78] sm:$0xff] }
 0x8a2   : > { %1400 = vst.msk [vmem:[#allocation3 + $0x58] sm:$0xff] %vm675_vm5, %v1396_v13  ;;  %v687_v63 = vpop.permute.xlu0 %686  ;;  %v1745_v13 = vmul.f32 %v4055_v40, %v1741_v2 }
 0x8a3   : > { %v704_v16 = vmul.f32 %v687_v63, %v680_v1  ;;  %v692_v8 = vpop.permute.xlu1 %691 }
 0x8a4   : > { %v705_v61 = vmul.f32 %v692_v8, %v681_v46  ;;  %v1740_v46 = vld [vmem:[#allocation3 + $0x70] sm:$0xff] }
 0x8a5   : > { %v805_v14 = vadd.f32 %v3670_v20, %v704_v16 }
 0x8a6   : > { %v806_v27 = vadd.f32 %v3668_v19, %v705_v61  ;;  %v702_v50 = vpop.permute.xlu0 %701 }
 0x8a7   : > { %809 = vst.msk [vmem:[#allocation4] sm:$0xff] %vm472_vm2, %v805_v14  ;;  %v707_v15 = vmul.f32 %v702_v50, %v683_v23  ;;  %v697_v37 = vpop.permute.xlu1 %696  ;;  %v1768_v23 = vld [vmem:[#allocation4 + $0x68] sm:$0xff]  ;;  %v1767_v14 = vld [vmem:[#allocation4 + $0x60] sm:$0xff]  ;;  %v1770_v50 = vld [vmem:[#allocation4 + $0x78] sm:$0xff] }
 0x8a8   : > { %810 = vst.msk [vmem:[#allocation4 + $0x8] sm:$0xff] %vm472_vm2, %v806_v27  ;;  %v706_v42 = vmul.f32 %v697_v37, %v682_v44  ;;  %v1769_v37 = vld [vmem:[#allocation4 + $0x70] sm:$0xff] }
 0x8a9   : > { %v808_v32 = vadd.f32 %v3672_v21, %v707_v15 }
 0x8aa   : > { %v807_v3 = vadd.f32 %v3674_v22, %v706_v42  ;;  %v1040_v31 = vpop.permute.xlu0 %1039 }
 0x8ab   : > { %812 = vst.msk [vmem:[#allocation4 + $0x18] sm:$0xff] %vm472_vm2, %v808_v32  ;;  %v1057_v20 = vmul.f32 %v1040_v31, %v1033_v47  ;;  %v1045_v49 = vpop.permute.xlu1 %1044 }
 0x8ac   : > { %811 = vst.msk [vmem:[#allocation4 + $0x10] sm:$0xff] %vm472_vm2, %v807_v3  ;;  %v1058_v19 = vmul.f32 %v1045_v49, %v1034_v25 }
 0x8ad   : > { %v1174_v60 = vadd.f32 %v3778_v52, %v1057_v20 }
 0x8ae   : > { %v1175_v48 = vadd.f32 %v3776_v51, %v1058_v19  ;;  %v1055_v43 = vpop.permute.xlu0 %1054 }
 0x8af   : > { %1178 = vst.msk [vmem:[#allocation4 + $0x20] sm:$0xff] %vm472_vm2, %v1174_v60  ;;  %v1060_v21 = vmul.f32 %v1055_v43, %v1036_v59  ;;  %v1050_v26 = vpop.permute.xlu1 %1049  ;;  %v2217_v59 = vld [vmem:[#allocation3 + $0x40] sm:$0xff] (!%p2710_p10)  ;;  %v1944_v43 = vld [vmem:[#allocation3 + $0x8] sm:$0xff] (!%p2710_p10) }
 0x8b0   : > { %1179 = vst.msk [vmem:[#allocation4 + $0x28] sm:$0xff] %vm472_vm2, %v1175_v48  ;;  %v1059_v22 = vmul.f32 %v1050_v26, %v1035_v7  ;;  %v1943_v60 = vld [vmem:[#allocation3] sm:$0xff] (!%p2710_p10)  ;;  %v2218_v7 = vld [vmem:[#allocation3 + $0x48] sm:$0xff] (!%p2710_p10)  ;;  %v3339_v48 = vmov (!%p2710_p10), 0   ;;  %3245 = vrcp.f32 (!%p2710_p10), %v2217_v59  ;;  %v1945_v26 = vld [vmem:[#allocation3 + $0x10] sm:$0xff] (!%p2710_p10) }
 0x8b1   : > { %v1177_v33 = vadd.f32 %v3780_v55, %v1060_v21  ;;  %3244 = vset.pattern.permute.xlu1 (!%p2710_p10), %v3339_v48  ;;  %3243 = vset.pattern.permute.xlu0 (!%p2710_p10), %v3339_v48  ;;  %3247 = vrcp.f32 (!%p2710_p10), %v1943_v60  ;;  %v1946_v21 = vld [vmem:[#allocation3 + $0x18] sm:$0xff] (!%p2710_p10) }
 0x8b2   : > { %v1176_v30 = vadd.f32 %v3782_v57, %v1059_v22  ;;  %v1409_v6 = vpop.permute.xlu0 %1408  ;;  %v1405_v57 = vld [vmem:[#allocation4 + $0x58] sm:$0xff]  ;;  %3249 = vrcp.f32 (!%p2710_p10), %v2218_v7 }
 0x8b3   : > { %1181 = vst.msk [vmem:[#allocation4 + $0x38] sm:$0xff] %vm472_vm2, %v1177_v33  ;;  %v1426_v52 = vmul.f32 %v1409_v6, %v1402_v28  ;;  %v1414_v34 = vpop.permute.xlu1 %1413  ;;  %3251 = vrcp.f32 (!%p2710_p10), %v1944_v43  ;;  %v2220_v22 = vld [vmem:[#allocation3 + $0x58] sm:$0xff] (!%p2710_p10)  ;;  %v2219_v28 = vld [vmem:[#allocation3 + $0x50] sm:$0xff] (!%p2710_p10) }
 0x8b4   : > { %1180 = vst.msk [vmem:[#allocation4 + $0x30] sm:$0xff] %vm472_vm2, %v1176_v30  ;;  %v1427_v51 = vmul.f32 %v1414_v34, %v1403_v29  ;;  %3253 = vrcp.f32 (!%p2710_p10), %v1946_v21  ;;  %v2081_v30 = vld [vmem:[#allocation3 + $0x28] sm:$0xff] (!%p2710_p10) }
 0x8b5   : > { %v1539_v0 = vadd.f32 %v3878_v12, %v1426_v52  ;;  %v1739_v12 = vld [vmem:[#allocation3 + $0x68] sm:$0xff]  ;;  %3255 = vrcp.f32 (!%p2710_p10), %v1945_v26  ;;  %v2080_v52 = vld [vmem:[#allocation3 + $0x20] sm:$0xff] (!%p2710_p10) }
 0x8b6   : > { %v1540_v35 = vadd.f32 %v3876_v11, %v1427_v51  ;;  %v1419_v39 = vpop.permute.xlu0 %1418  ;;  %v1743_v11 = vmul.f32 %v4049_v18, %v1739_v12  ;;  %v1744_v18 = vmul.f32 %v4073_v45, %v1740_v46  ;;  %3257 = vrcp.f32 (!%p2710_p10), %v2220_v22 }
 0x8b7   : > { %1543 = vst.msk [vmem:[#allocation4 + $0x40] sm:$0xff] %vm472_vm2, %v1539_v0  ;;  %v1428_v55 = vmul.f32 %v1419_v39, %v1404_v62  ;;  %3259 = vrcp.f32 (!%p2710_p10), %v2219_v28  ;;  %v1920_v62 = vld [vmem:[%s4205_s4] sm:$0xff] (!%p2710_p10)  ;;  %v1922_v0 = vld [vmem:[%s4205_s4 + $0x10] sm:$0xff] (!%p2710_p10) }
 0x8b8   : > { %1544 = vst.msk [vmem:[#allocation4 + $0x48] sm:$0xff] %vm472_vm2, %v1540_v35  ;;  %3261 = vrcp.f32 (!%p2710_p10), %v2081_v30  ;;  %2926 = vmatprep.subr.mxu1 (!%p2710_p10), %v1920_v62  ;;  %2942 = vmatprep.subr.mxu0 (!%p2710_p10), %v1922_v0 }
 0x8b9   : > { %v1541_v53 = vadd.f32 %v4231_v36, %v1428_v55  ;;  %3263 = vrcp.f32 (!%p2710_p10), %v2080_v52  ;;  %2927 = vmatpush3.msra.mxu1 (!%p2710_p10), %v1920_v62  ;;  %2943 = vmatpush3.msra.mxu0 (!%p2710_p10), %v1922_v0 }
 0x8ba   : > { %v1424_v38 = vpop.permute.xlu0 %1423  ;;  %v3246_v33 = vpop.eup (!%p2710_p10), %3245 }
 0x8bb   : > { %1545 = vst.msk [vmem:[#allocation4 + $0x50] sm:$0xff] %vm472_vm2, %v1541_v53  ;;  %v1429_v17 = vmul.f32 %v1424_v38, %v1405_v57  ;;  %v3248_v29 = vpop.eup (!%p2710_p10), %3247  ;;  %2227 = vperm.xlu1 (!%p2710_p10), %3244, %v3246_v33   ;;  %v2083_v57 = vld [vmem:[#allocation3 + $0x38] sm:$0xff] (!%p2710_p10)  ;;  %v2082_v53 = vld [vmem:[#allocation3 + $0x30] sm:$0xff] (!%p2710_p10) }
 0x8bc   : > { %v3250_v6 = vpop.eup (!%p2710_p10), %3249  ;;  %1953 = vperm.xlu0 (!%p2710_p10), %3243, %v3248_v29   ;;  %v2079_v33 = vld [vmem:[#allocation4 + $0x38] sm:$0xff] (!%p2710_p10)  ;;  %v2078_v29 = vld [vmem:[#allocation4 + $0x30] sm:$0xff] (!%p2710_p10) }
 0x8bd   : > { %v1542_v54 = vadd.f32 %v4232_v24, %v1429_v17  ;;  %v3252_v34 = vpop.eup (!%p2710_p10), %3251 }
 0x8be   : > { %v1779_v61 = vpop.permute.xlu0 %1778  ;;  %v3254_v35 = vpop.eup (!%p2710_p10), %3253 }
 0x8bf   : > { %1546 = vst.msk [vmem:[#allocation4 + $0x58] sm:$0xff] %vm472_vm2, %v1542_v54  ;;  %v1792_v44 = vmul.f32 %v1779_v61, %v1768_v23  ;;  %2232 = vperm.xlu1 (!%p2710_p10), %3244, %v3250_v6   ;;  %v3256_v55 = vpop.eup (!%p2710_p10), %3255  ;;  %v1940_v61 = vld [vmem:[#allocation4 + $0x8] sm:$0xff] (!%p2710_p10) }
 0x8c0   : > { %1958 = vperm.xlu0 (!%p2710_p10), %3243, %v3252_v34   ;;  %v3258_v36 = vpop.eup (!%p2710_p10), %3257 }
 0x8c1   : > { %v3260_v38 = vpop.eup (!%p2710_p10), %3259 }
 0x8c2   : > { %v1774_v10 = vpop.permute.xlu0 %1773  ;;  %v3262_v24 = vpop.eup (!%p2710_p10), %3261 }
 0x8c3   : > { %v1791_v27 = vmul.f32 %v1774_v10, %v1767_v14  ;;  %1968 = vperm.xlu1 (!%p2710_p10), %3244, %v3254_v35   ;;  %v3264_v12 = vpop.eup (!%p2710_p10), %3263 }
 0x8c4   : > { %1963 = vperm.xlu0 (!%p2710_p10), %3243, %v3256_v55  }
 0x8c6   : > { %v1789_v15 = vpop.permute.xlu0 %1788 }
 0x8c7   : > { %v1794_v3 = vmul.f32 %v1789_v15, %v1770_v50  ;;  %2242 = vperm.xlu1 (!%p2710_p10), %3244, %v3258_v36   ;;  %v1941_v50 = vld [vmem:[#allocation4 + $0x10] sm:$0xff] (!%p2710_p10)  ;;  %v2711_v36 = vld [vmem:[%s4206_s5] ss:$0 sm:$0xff] (!%p2710_p10) }
 0x8c8   : > { %2237 = vperm.xlu0 (!%p2710_p10), %3243, %v3260_v38  }
 0x8cb   : > { %2095 = vperm.xlu1 (!%p2710_p10), %3244, %v3262_v24  }
 0x8cc   : > { %2090 = vperm.xlu0 (!%p2710_p10), %3243, %v3264_v12  }
 0x8ee   : > { %v1751_v56 = vpop.xlane.xlu1 %1750 }
 0x8ef   : > { %v1759_v58 = vadd.f32 %v1751_v56, %v1743_v11  ;;  %v1921_v56 = vld [vmem:[%s4205_s4 + $0x8] sm:$0xff] (!%p2710_p10) }
 0x8f0   : > { %2934 = vmatprep.subr.mxu1 (!%p2710_p10), %v1921_v56 }
 0x8f1   : > { %1763 = vst.msk [vmem:[#allocation3 + $0x68] sm:$0xff] %vm675_vm5, %v1759_v58  ;;  %v1923_v58 = vld [vmem:[%s4205_s4 + $0x18] sm:$0xff] (!%p2710_p10) }
 0x8f2   : > { %v1748_v5 = vpop.xlane.xlu1 %1747  ;;  %2950 = vmatprep.subr.mxu0 (!%p2710_p10), %v1923_v58 }
 0x8f3   : > { %v1758_v41 = vadd.f32 %v1748_v5, %v1742_v4 }
 0x8f5   : > { %1762 = vst.msk [vmem:[#allocation3 + $0x60] sm:$0xff] %vm675_vm5, %v1758_v41 }
 0x8f6   : > { %v1757_v1 = vpop.xlane.xlu1 %1756 }
 0x8f7   : > { %v1761_v63 = vadd.f32 %v1757_v1, %v1745_v13  ;;  %v2213_v13 = vld [vmem:[#allocation4 + $0x40] sm:$0xff] (!%p2710_p10) }
 0x8f8   : > { %v2355_v51 = vld [vmem:[#allocation3 + $0x68] sm:$0xff] (!%p2710_p10)  ;;  %v1939_v1 = vld [vmem:[#allocation4] sm:$0xff] (!%p2710_p10) }
 0x8f9   : > { %1765 = vst.msk [vmem:[#allocation3 + $0x78] sm:$0xff] %vm675_vm5, %v1761_v63  ;;  %3265 = vrcp.f32 (!%p2710_p10), %v2355_v51 }
 0x8fa   : > { %v1754_v16 = vpop.xlane.xlu1 %1753 }
 0x8fb   : > { %v1760_v8 = vadd.f32 %v1754_v16, %v1744_v18 }
 0x8fc   : > { %v2354_v39 = vld [vmem:[#allocation3 + $0x60] sm:$0xff] (!%p2710_p10) }
 0x8fd   : > { %1764 = vst.msk [vmem:[#allocation3 + $0x70] sm:$0xff] %vm675_vm5, %v1760_v8  ;;  %3267 = vrcp.f32 (!%p2710_p10), %v2354_v39  ;;  %v2214_v8 = vld [vmem:[#allocation4 + $0x48] sm:$0xff] (!%p2710_p10) }
 0x8fe   : > { %v1784_v42 = vpop.permute.xlu1 %1783  ;;  %3269 = vrcp.f32 (!%p2710_p10), %v2083_v57  ;;  %v1925_v57 = vld [vmem:[%s3428_s17 + $0x8] sm:$0xff] (!%p2710_p10) }
 0x8ff   : > { %v1793_v45 = vmul.f32 %v1784_v42, %v1769_v37  ;;  %3271 = vrcp.f32 (!%p2710_p10), %v2082_v53  ;;  %v1924_v53 = vld [vmem:[%s3428_s17] sm:$0xff] (!%p2710_p10)  ;;  %v1936_v38 = vadd.f32 (!%p2710_p10), %v2711_v36, %v1925_v57 }
 0x900   : > { %v2357_v17 = vld [vmem:[#allocation3 + $0x78] sm:$0xff] (!%p2710_p10)  ;;  %v1935_v24 = vadd.f32 (!%p2710_p10), %v2711_v36, %v1924_v53 }
 0x901   : > { %3273 = vrcp.f32 (!%p2710_p10), %v2357_v17 }
 0x903   : > { %v3266_v11 = vpop.eup (!%p2710_p10), %3265 }
 0x904   : > { %v2356_v54 = vld [vmem:[#allocation3 + $0x70] sm:$0xff] (!%p2710_p10)  ;;  %2369 = vperm.xlu1 (!%p2710_p10), %3244, %v3266_v11  }
 0x905   : > { %3275 = vrcp.f32 (!%p2710_p10), %v2356_v54 }
 0x907   : > { %v3268_v9 = vpop.eup (!%p2710_p10), %3267 }
 0x908   : > { %v3270_v4 = vpop.eup (!%p2710_p10), %3269  ;;  %2364 = vperm.xlu0 (!%p2710_p10), %3243, %v3268_v9   ;;  %v1927_v9 = vld [vmem:[%s3428_s17 + $0x18] sm:$0xff] (!%p2710_p10) }
 0x909   : > { %v3272_v5 = vpop.eup (!%p2710_p10), %3271  ;;  %2105 = vperm.xlu1 (!%p2710_p10), %3244, %v3270_v4  }
 0x90b   : > { %v3274_v2 = vpop.eup (!%p2710_p10), %3273 }
 0x90c   : > { %2100 = vperm.xlu0 (!%p2710_p10), %3243, %v3272_v5   ;;  %v1926_v5 = vld [vmem:[%s3428_s17 + $0x10] sm:$0xff] (!%p2710_p10) }
 0x90d   : > { %2379 = vperm.xlu1 (!%p2710_p10), %3244, %v3274_v2  }
 0x90f   : > { %v3276_v41 = vpop.eup (!%p2710_p10), %3275 }
 0x910   : > { %2374 = vperm.xlu0 (!%p2710_p10), %3243, %v3276_v41   ;;  %v1938_v41 = vadd.f32 (!%p2710_p10), %v2711_v36, %v1927_v9 }
 0x939   : > { %v2922_v40 = vpop.f32.mrb[12].mxu0 }
 0x93a   : > { %v1905_v47 = vadd.f32 %v2922_v40, %v1792_v44  ;;  %v1885_v32 = vpop.f32.mrb[13].mxu0  ;;  %v2228_v46 = vpop.permute.xlu1 (!%p2710_p10), %2227 }
 0x93b   : > { %v1904_v25 = vadd.f32 %v1885_v32, %v1791_v27  ;;  %1919 = sbr.rel (%p2710_p10) target bundleno = 2667 (0xa6b), region = 52  ;;  %v1954_v63 = vpop.permute.xlu0 (!%p2710_p10), %1953  ;;  %v2245_v18 = vmul.f32 (!%p2710_p10), %v2228_v46, %v2213_v13  ;;  %v1942_v27 = vld [vmem:[#allocation4 + $0x18] sm:$0xff] (!%p2710_p10)  ;;  %v2215_v32 = vld [vmem:[#allocation4 + $0x50] sm:$0xff] (!%p2710_p10) }
 0x93c   : > { %1909 = vst.msk [vmem:[#allocation4 + $0x68] sm:$0xff] %vm472_vm2, %v1905_v47  ;;  %v1971_v16 = vmul.f32 (!%p2710_p10), %v1954_v63, %v1939_v1  ;;  %v2216_v47 = vld [vmem:[#allocation4 + $0x58] sm:$0xff] (!%p2710_p10)  ;;  %v1937_v1 = vadd.f32 (!%p2710_p10), %v2711_v36, %v1926_v5 }
 0x93d   : > { %1908 = vst.msk [vmem:[#allocation4 + $0x60] sm:$0xff] %vm472_vm2, %v1904_v25  ;;  %v2925_v31 = vpop.f32.mrb[14].mxu0  ;;  %2944 = vmatprep.mubr.msk.f32.mxu0 (!%p2710_p10), %vm472_vm2, %v2245_v18 }
 0x93e   : > { %v1907_v20 = vadd.f32 %v2925_v31, %v1794_v3  ;;  %v1895_v49 = vpop.f32.mrb[15].mxu0  ;;  %2928 = vmatprep.mubr.msk.f32.mxu1 (!%p2710_p10), %vm472_vm2, %v1971_v16  ;;  %v2233_v10 = vpop.permute.xlu1 (!%p2710_p10), %2232 }
 0x93f   : > { %v1906_v19 = vadd.f32 %v1895_v49, %v1793_v45  ;;  %v2246_v23 = vmul.f32 (!%p2710_p10), %v2233_v10, %v2214_v8  ;;  %v1959_v14 = vpop.permute.xlu0 (!%p2710_p10), %1958  ;;  %v2076_v49 = vld [vmem:[#allocation4 + $0x20] sm:$0xff] (!%p2710_p10) }
 0x940   : > { %1911 = vst.msk [vmem:[#allocation4 + $0x78] sm:$0xff] %vm472_vm2, %v1907_v20  ;;  %v1972_v44 = vmul.f32 (!%p2710_p10), %v1959_v14, %v1940_v61  ;;  %v2077_v20 = vld [vmem:[#allocation4 + $0x28] sm:$0xff] (!%p2710_p10) }
 0x941   : > { %1910 = vst.msk [vmem:[#allocation4 + $0x70] sm:$0xff] %vm472_vm2, %v1906_v19  ;;  %2945 = vmatmul.mubr.msk.f32.vlgmr.msra.gmra.mrb[0].mxu0 (!%p2710_p10), %vm472_vm2, %v2246_v23 }
 0x942   : > { %2929 = vmatmul.mubr.msk.f32.vlgmr.msra.gmra.mrb[0].mxu1 %vm472_vm2, %v1972_v44  ;;  %v1969_v15 = vpop.permute.xlu1 %1968  ;;  %2951 = vmatpush3.msra.mxu0 %v1923_v58 }
 0x943   : > { %v1974_v40 = vmul.f32 %v1969_v15, %v1942_v27  ;;  %v1964_v37 = vpop.permute.xlu0 %1963  ;;  %2935 = vmatpush3.msra.mxu1 %v1921_v56  ;;  %v2351_v48 = vld [vmem:[#allocation4 + $0x68] sm:$0xff] }
 0x944   : > { %v1973_v42 = vmul.f32 %v1964_v37, %v1941_v50  ;;  %v2350_v43 = vld [vmem:[#allocation4 + $0x60] sm:$0xff] }
 0x946   : > { %2931 = vmatprep.mubr.msk.f32.mxu1 %vm472_vm2, %v1973_v42  ;;  %v2243_v25 = vpop.permute.xlu1 %2242 }
 0x947   : > { %v2248_v3 = vmul.f32 %v2243_v25, %v2216_v47  ;;  %v2238_v45 = vpop.permute.xlu0 %2237  ;;  %2932 = vmatmul.mubr.msk.f32.gmra.mrb[2].mxu1 %vm472_vm2, %v1974_v40  ;;  %v2353_v51 = vld [vmem:[#allocation4 + $0x78] sm:$0xff] }
 0x948   : > { %v2247_v31 = vmul.f32 %v2238_v45, %v2215_v32  ;;  %v2352_v62 = vld [vmem:[#allocation4 + $0x70] sm:$0xff] }
 0x94a   : > { %2947 = vmatprep.mubr.msk.f32.mxu0 %vm472_vm2, %v2247_v31  ;;  %v2096_v19 = vpop.permute.xlu1 %2095 }
 0x94b   : > { %v2109_v59 = vmul.f32 %v2096_v19, %v2077_v20  ;;  %v2091_v60 = vpop.permute.xlu0 %2090  ;;  %2948 = vmatmul.mubr.msk.f32.gmra.mrb[2].mxu0 %vm472_vm2, %v2248_v3 }
 0x94c   : > { %v2108_v7 = vmul.f32 %v2091_v60, %v2076_v49 }
 0x94e   : > { %2936 = vmatprep.mubr.msk.f32.mxu1 %vm472_vm2, %v2108_v7 }
 0x94f   : > { %2937 = vmatmul.mubr.msk.f32.vlgmr.msra.gmra.mrb[0].mxu1 %vm472_vm2, %v2109_v59 }
 0x983   : > { %v2370_v21 = vpop.permute.xlu1 %2369 }
 0x984   : > { %v2383_v26 = vmul.f32 %v2370_v21, %v2351_v48 }
 0x987   : > { %v2365_v22 = vpop.permute.xlu0 %2364 }
 0x988   : > { %v2382_v28 = vmul.f32 %v2365_v22, %v2350_v43  ;;  %v2106_v30 = vpop.permute.xlu1 %2105 }
 0x989   : > { %v2111_v6 = vmul.f32 %v2106_v30, %v2079_v33 }
 0x98a   : > { %2952 = vmatprep.mubr.msk.f32.mxu0 %vm472_vm2, %v2382_v28 }
 0x98b   : > { %v2101_v52 = vpop.permute.xlu0 %2100  ;;  %2953 = vmatmul.mubr.msk.f32.vlgmr.msra.gmra.mrb[0].mxu0 %vm472_vm2, %v2383_v26 }
 0x98c   : > { %v2110_v34 = vmul.f32 %v2101_v52, %v2078_v29  ;;  %v2380_v0 = vpop.permute.xlu1 %2379 }
 0x98d   : > { %v2385_v35 = vmul.f32 %v2380_v0, %v2353_v51 }
 0x98e   : > { %2939 = vmatprep.mubr.msk.f32.mxu1 %vm472_vm2, %v2110_v34 }
 0x98f   : > { %v2375_v39 = vpop.permute.xlu0 %2374  ;;  %2940 = vmatmul.mubr.msk.f32.gmra.mrb[2].mxu1 %vm472_vm2, %v2111_v6 }
 0x990   : > { %v2384_v55 = vmul.f32 %v2375_v39, %v2352_v62 }
 0x992   : > { %2955 = vmatprep.mubr.msk.f32.mxu0 %vm472_vm2, %v2384_v55 }
 0x993   : > { %2956 = vmatmul.mubr.msk.f32.gmra.mrb[2].mxu0 %vm472_vm2, %v2385_v35 }
 0xa22   : > { %v2938_v17 = vpop.f32.mrb[0].mxu1 }
 0xa23   : > { %v2190_v54 = vpop.f32.mrb[1].mxu1  ;;  %v3038_v12 = vadd.f32 %v2938_v17, %v1936_v38 }
 0xa24   : > { %v3040_v11 = vadd.f32 %v2190_v54, %v1935_v24 }
 0xa5e   : > { %v2954_v56 = vpop.f32.mrb[0].mxu0 }
 0xa5f   : > { %v3039_v58 = vadd.f32 %v3038_v12, %v2954_v56  ;;  %v2464_v4 = vpop.f32.mrb[1].mxu0 }
 0xa60   : > { %v3041_v2 = vadd.f32 %v3040_v11, %v2464_v4 }
 0xa61   : > { %2488 = vst.msk [vmem:[%s3433_s20 + $0x8] sm:$0xff] %vm590_vm4, %v3039_v58 }
 0xa62   : > { %2487 = vst.msk [vmem:[%s3433_s20] sm:$0xff] %vm590_vm4, %v3041_v2  ;;  %v2941_v13 = vpop.f32.mrb[2].mxu1 }
 0xa63   : > { %v2200_v46 = vpop.f32.mrb[3].mxu1  ;;  %v3042_v63 = vadd.f32 %v2941_v13, %v1938_v41 }
 0xa64   : > { %v3044_v18 = vadd.f32 %v2200_v46, %v1937_v1 }
 0xa66   : > { %v2957_v16 = vpop.f32.mrb[2].mxu0 }
 0xa67   : > { %v3043_v8 = vadd.f32 %v3042_v63, %v2957_v16  ;;  %v2474_v61 = vpop.f32.mrb[3].mxu0 }
 0xa68   : > { %v3045_v10 = vadd.f32 %v3044_v18, %v2474_v61 }
 0xa69   : > { %2490 = vst.msk [vmem:[%s3433_s20 + $0x18] sm:$0xff] %vm590_vm4, %v3043_v8 }
 0xa6a   : > { %2489 = vst.msk [vmem:[%s3433_s20 + $0x10] sm:$0xff] %vm590_vm4, %v3045_v10 }
 0xa6b PF: > { %s16_s27 = sadd.s32 1, %s3331_s27   ;;  %s4233_s17 = sld [smem:[#allocation5_spill]] }
 0xa6c   : > { %p13_p11 = scmp.ge.s32.totalorder %s16_s27, 10   ;;  %s4234_s21 = smov %s3319_s24 }
 0xa6d   : > { %s4235_s22 = smov %s3323_s25  ;;  %s4236_s23 = smov %s3327_s26 }
 0xa6e   : > { %s4237_s24 = smov %s4241_s28  ;;  %s4238_s25 = smov %s4245_s29 }
 0xa6f   :  { %15 = sbr.rel (!%p13_p11) target bundleno = 4 (0x4), region = 100 }
 0xa71   : > { %s4239_s26 = smov %s4233_s17 }

</bundles_post_ra>
